<compile_context>
chip_gen: v6e
topology: v6e:2x2x1
jax: 0.10.0
libtpu: 0.0.40
codegen_flags: <defaults>
</compile_context>

<pallas_src>
import functools

import jax
import jax.numpy as jnp
from jax.experimental import pallas as pl
from jax.experimental.pallas import tpu as pltpu


# ---------------------------------------------------------------------------
# In-kernel exact-form GELU (erf-based, matches nn.GELU(approximate='none')).
# erf uses the Abramowitz-Stegun 7.1.26 polynomial (|err| < 1.5e-7).
# ---------------------------------------------------------------------------
def _erf(x):
    p = 0.3275911
    a1, a2, a3, a4, a5 = (0.254829592, -0.284496736, 1.421413741,
                          -1.453152027, 1.061405429)
    ax = jnp.abs(x)
    t = pl.reciprocal(1.0 + p * ax, approx=True)   # EUP op, co-issues with exp
    poly = ((((a5 * t + a4) * t + a3) * t + a2) * t + a1) * t
    y = 1.0 - poly * jnp.exp(-ax * ax)
    return jnp.where(x >= 0.0, y, -y)


def _gelu(x):
    return 0.5 * x * (1.0 + _erf(x * 0.7071067811865476))


# ---------------------------------------------------------------------------
# Pallas kernel: one batch tile per grid step, all weights VMEM-resident.
# ---------------------------------------------------------------------------
def _bgl_kernel(num_bs,
                x_ref,
                w1_ref, b1_ref, w2_ref, b2_ref, w3_ref, b3_ref,
                hw1_ref, hb1_ref, hw2_ref, hb2_ref,
                hw3_ref, hb3_ref, hw4_ref, hb4_ref,
                out_ref):
    f32 = jnp.float32

    def dense(a, w, b):
        # w arrives as bf16 (HBM-byte savings); upcast and accumulate in f32.
        return jnp.dot(a, w.astype(f32), preferred_element_type=f32) + b

    # shared trunk: F -> 256 -> 256 -> 128
    h = dense(x_ref[...].astype(f32), w1_ref[...], b1_ref[...])
    h = _gelu(h)
    h = _gelu(dense(h, w2_ref[...], b2_ref[...]))
    h = _gelu(dense(h, w3_ref[...], b3_ref[...]))

    # per-head MLPs, unrolled over the (small, static) number of heads
    head_outs = []
    for hd in range(num_bs):
        y = _gelu(dense(h, hw1_ref[hd], hb1_ref[hd]))
        y = _gelu(dense(y, hw2_ref[hd], hb2_ref[hd]))
        y = _gelu(dense(y, hw3_ref[hd], hb3_ref[hd]))
        y = dense(y, hw4_ref[hd], hb4_ref[hd])          # no GELU on final layer
        head_outs.append(y)

    # single lane-dense store; wrapper reshape reproduces stack(dim=-2)
    out_ref[...] = jnp.concatenate(head_outs, axis=-1)


def _pick_batch_tile(B, max_tile=512):
    if B <= max_tile:
        return B
    for tb in range(max_tile, 7, -8):
        if B % tb == 0:
            return tb
    return B  # fallback: single tile


def best_gain_level_forward(x, kernel_params, *, num_bs, num_dBlevel):
    """x: (B, F) float32 -> (B, num_bs, num_dBlevel) float32."""
    B, F = x.shape
    (w1, b1, w2, b2, w3, b3,
     hw1, hb1, hw2, hb2, hw3, hb3, hw4, hb4) = kernel_params

    TB = _pick_batch_tile(B)
    grid = (B // TB,)

    def resident(a):
        # whole array as one block; same block index every step -> stays in VMEM
        return pl.BlockSpec(a.shape, lambda i, nd=a.ndim: (0,) * nd)

    weight_args = (w1, b1, w2, b2, w3, b3,
                   hw1, hb1, hw2, hb2, hw3, hb3, hw4, hb4)

    out = pl.pallas_call(
        functools.partial(_bgl_kernel, num_bs),
        out_shape=jax.ShapeDtypeStruct((B, num_bs * num_dBlevel), jnp.float32),
        grid=grid,
        in_specs=[pl.BlockSpec((TB, F), lambda i: (i, 0))]
                 + [resident(a) for a in weight_args],
        out_specs=pl.BlockSpec((TB, num_bs * num_dBlevel), lambda i: (i, 0)),
        compiler_params=pltpu.CompilerParams(
            dimension_semantics=("parallel",)),
    )(x, *weight_args)

    # head h occupies columns [h*num_dBlevel:(h+1)*num_dBlevel]; contiguous
    # reshape reproduces torch.stack(outputs, dim=-2).
    return out.reshape(B, num_bs, num_dBlevel)


# ---------------------------------------------------------------------------
# Parameter init (Xavier-normal weights, zero biases, heads stacked per head)
# and bf16 weight cast for the kernel.
# ---------------------------------------------------------------------------
def _xavier_normal(key, fan_in, fan_out):
    std = (2.0 / (fan_in + fan_out)) ** 0.5
    return std * jax.random.normal(key, (fan_in, fan_out), dtype=jnp.float32)


def init_params(key, feature_input_dim, num_bs, num_dBlevel):
    keys = jax.random.split(key, 3 + 4 * num_bs)
    w1 = _xavier_normal(keys[0], feature_input_dim, 256)
    w2 = _xavier_normal(keys[1], 256, 256)
    w3 = _xavier_normal(keys[2], 256, 128)
    b1 = jnp.zeros((1, 256), jnp.float32)
    b2 = jnp.zeros((1, 256), jnp.float32)
    b3 = jnp.zeros((1, 128), jnp.float32)

    head_dims = [128, 128, 128, 128, num_dBlevel]
    hws = [[], [], [], []]
    for h in range(num_bs):
        for layer in range(4):
            k = keys[3 + 4 * h + layer]
            hws[layer].append(_xavier_normal(k, head_dims[layer], head_dims[layer + 1]))
    hw1, hw2, hw3, hw4 = (jnp.stack(ws, axis=0) for ws in hws)
    hb1 = jnp.zeros((num_bs, 1, 128), jnp.float32)
    hb2 = jnp.zeros((num_bs, 1, 128), jnp.float32)
    hb3 = jnp.zeros((num_bs, 1, 128), jnp.float32)
    hb4 = jnp.zeros((num_bs, 1, num_dBlevel), jnp.float32)
    return (w1, b1, w2, b2, w3, b3,
            hw1, hb1, hw2, hb2, hw3, hb3, hw4, hb4)


def to_kernel_params(params):
    """Cast weight matrices to bf16 (halved HBM traffic); biases stay f32."""
    (w1, b1, w2, b2, w3, b3,
     hw1, hb1, hw2, hb2, hw3, hb3, hw4, hb4) = params
    bf = lambda w: w.astype(jnp.bfloat16)
    return (bf(w1), b1, bf(w2), b2, bf(w3), b3,
            bf(hw1), hb1, bf(hw2), hb2, bf(hw3), hb3, bf(hw4), hb4)


# ---------------------------------------------------------------------------
# Pure-JAX reference (exact GELU, f32 math; weights upcast if bf16).
# ---------------------------------------------------------------------------
def reference_forward(x, params):
    (w1, b1, w2, b2, w3, b3,
     hw1, hb1, hw2, hb2, hw3, hb3, hw4, hb4) = [
        p.astype(jnp.float32) for p in params]
    gelu = functools.partial(jax.nn.gelu, approximate=False)
    h = gelu(x @ w1 + b1)
    h = gelu(h @ w2 + b2)
    h = gelu(h @ w3 + b3)
    outs = []
    for i in range(hw1.shape[0]):
        y = gelu(h @ hw1[i] + hb1[i])
        y = gelu(y @ hw2[i] + hb2[i])
        y = gelu(y @ hw3[i] + hb3[i])
        y = y @ hw4[i] + hb4[i]
        outs.append(y)
    return jnp.stack(outs, axis=-2)


if __name__ == "__main__":
    feature_input_dim = 32
    num_bs = 4
    num_dBlevel = 64
    batch = 8

    key = jax.random.PRNGKey(0)
    kx, kp = jax.random.split(key)
    x = jax.random.normal(kx, (batch, feature_input_dim), dtype=jnp.float32)

    params = init_params(kp, feature_input_dim, num_bs, num_dBlevel)
    kparams = to_kernel_params(params)

    out = best_gain_level_forward(x, kparams, num_bs=num_bs, num_dBlevel=num_dBlevel)
    out = jax.block_until_ready(out)
    assert out.shape == (batch, num_bs, num_dBlevel), out.shape

    # Compare against a pure-JAX reference using the SAME (bf16-cast) weights,
    # so the check isolates kernel correctness (erf-poly GELU + approx
    # reciprocal contribute only ~1e-4-scale differences).
    ref = jax.block_until_ready(reference_forward(x, kparams))
    max_diff = float(jnp.max(jnp.abs(out - ref)))
    assert jnp.allclose(out, ref, rtol=5e-3, atol=5e-3), max_diff

    # Sanity vs the full-precision f32 model (bf16 weights dominate this gap).
    ref_f32 = jax.block_until_ready(reference_forward(x, params))
    assert jnp.allclose(out, ref_f32, rtol=5e-2, atol=5e-2), \
        float(jnp.max(jnp.abs(out - ref_f32)))

    print("KERNEL_OK")
</pallas_src>

<mosaic_0001>
module attributes {stable_mosaic.version = 11 : i64} {
  func.func @_bgl_kernel(%arg0: i32, %arg1: memref<8x32xf32, #tpu.memory_space<vmem>>, %arg2: memref<32x256xbf16, #tpu.memory_space<vmem>>, %arg3: memref<1x256xf32, #tpu.memory_space<vmem>>, %arg4: memref<256x256xbf16, #tpu.memory_space<vmem>>, %arg5: memref<1x256xf32, #tpu.memory_space<vmem>>, %arg6: memref<256x128xbf16, #tpu.memory_space<vmem>>, %arg7: memref<1x128xf32, #tpu.memory_space<vmem>>, %arg8: memref<4x128x128xbf16, #tpu.memory_space<vmem>>, %arg9: memref<4x1x128xf32, #tpu.memory_space<vmem>>, %arg10: memref<4x128x128xbf16, #tpu.memory_space<vmem>>, %arg11: memref<4x1x128xf32, #tpu.memory_space<vmem>>, %arg12: memref<4x128x128xbf16, #tpu.memory_space<vmem>>, %arg13: memref<4x1x128xf32, #tpu.memory_space<vmem>>, %arg14: memref<4x128x64xbf16, #tpu.memory_space<vmem>>, %arg15: memref<4x1x64xf32, #tpu.memory_space<vmem>>, %arg16: memref<8x256xf32, #tpu.memory_space<vmem>>) attributes {dimension_semantics = [#tpu.dimension_semantics<parallel>], iteration_bounds = array<i64: 1>, scalar_prefetch = 0 : i64, scratch_operands = 0 : i64, tpu.core_type = #tpu.core_type<tc>, window_params = [{transform_indices = @transform_0, window_bounds = array<i64: 8, 32>}, {pipeline_mode = #tpu.pipeline_mode<synchronous>, transform_indices = @transform_1, window_bounds = array<i64: 32, 256>}, {pipeline_mode = #tpu.pipeline_mode<synchronous>, transform_indices = @transform_2, window_bounds = array<i64: 1, 256>}, {pipeline_mode = #tpu.pipeline_mode<synchronous>, transform_indices = @transform_3, window_bounds = array<i64: 256, 256>}, {pipeline_mode = #tpu.pipeline_mode<synchronous>, transform_indices = @transform_4, window_bounds = array<i64: 1, 256>}, {pipeline_mode = #tpu.pipeline_mode<synchronous>, transform_indices = @transform_5, window_bounds = array<i64: 256, 128>}, {pipeline_mode = #tpu.pipeline_mode<synchronous>, transform_indices = @transform_6, window_bounds = array<i64: 1, 128>}, {pipeline_mode = #tpu.pipeline_mode<synchronous>, transform_indices = @transform_7, window_bounds = array<i64: 4, 128, 128>}, {pipeline_mode = #tpu.pipeline_mode<synchronous>, transform_indices = @transform_8, window_bounds = array<i64: 4, 1, 128>}, {pipeline_mode = #tpu.pipeline_mode<synchronous>, transform_indices = @transform_9, window_bounds = array<i64: 4, 128, 128>}, {pipeline_mode = #tpu.pipeline_mode<synchronous>, transform_indices = @transform_10, window_bounds = array<i64: 4, 1, 128>}, {pipeline_mode = #tpu.pipeline_mode<synchronous>, transform_indices = @transform_11, window_bounds = array<i64: 4, 128, 128>}, {pipeline_mode = #tpu.pipeline_mode<synchronous>, transform_indices = @transform_12, window_bounds = array<i64: 4, 1, 128>}, {pipeline_mode = #tpu.pipeline_mode<synchronous>, transform_indices = @transform_13, window_bounds = array<i64: 4, 128, 64>}, {pipeline_mode = #tpu.pipeline_mode<synchronous>, transform_indices = @transform_14, window_bounds = array<i64: 4, 1, 64>}, {transform_indices = @transform_15, window_bounds = array<i64: 8, 256>}]} {
    %c0 = arith.constant 0 : index
    %c0_0 = arith.constant 0 : index
    %0 = vector.load %arg1[%c0, %c0_0] : memref<8x32xf32, #tpu.memory_space<vmem>>, vector<8x32xf32>
    %c0_1 = arith.constant 0 : index
    %c0_2 = arith.constant 0 : index
    %1 = vector.load %arg2[%c0_1, %c0_2] : memref<32x256xbf16, #tpu.memory_space<vmem>>, vector<32x256xbf16>
    %c0_3 = arith.constant 0 : index
    %c0_4 = arith.constant 0 : index
    %2 = vector.load %arg3[%c0_3, %c0_4] : memref<1x256xf32, #tpu.memory_space<vmem>>, vector<1x256xf32>
    %3 = arith.extf %1 : vector<32x256xbf16> to vector<32x256xf32>
    %cst = arith.constant dense<0.000000e+00> : vector<8x256xf32>
    %4 = tpu.matmul %0, %3, %cst {dimension_numbers = #tpu.dot_dimension_numbers<[1], [0], [0], [1], [0, 0, 1, 1], [], []>} : vector<8x32xf32>, vector<32x256xf32>, vector<8x256xf32> -> vector<8x256xf32>
    %5 = vector.broadcast %2 : vector<1x256xf32> to vector<8x256xf32>
    %6 = arith.addf %4, %5 : vector<8x256xf32>
    %cst_5 = arith.constant 5.000000e-01 : f32
    %7 = vector.broadcast %cst_5 : f32 to vector<8x256xf32>
    %8 = arith.mulf %7, %6 : vector<8x256xf32>
    %cst_6 = arith.constant 0.707106769 : f32
    %9 = vector.broadcast %cst_6 : f32 to vector<8x256xf32>
    %10 = arith.mulf %6, %9 : vector<8x256xf32>
    %11 = math.absf %10 : vector<8x256xf32>
    %cst_7 = arith.constant 0.327591091 : f32
    %12 = vector.broadcast %cst_7 : f32 to vector<8x256xf32>
    %13 = arith.mulf %12, %11 : vector<8x256xf32>
    %cst_8 = arith.constant 1.000000e+00 : f32
    %14 = vector.broadcast %cst_8 : f32 to vector<8x256xf32>
    %15 = arith.addf %14, %13 : vector<8x256xf32>
    %16 = tpu.reciprocal %15 {approx = true} : vector<8x256xf32> -> vector<8x256xf32>
    %cst_9 = arith.constant 1.06140542 : f32
    %17 = vector.broadcast %cst_9 : f32 to vector<8x256xf32>
    %18 = arith.mulf %17, %16 : vector<8x256xf32>
    %cst_10 = arith.constant -1.45315206 : f32
    %19 = vector.broadcast %cst_10 : f32 to vector<8x256xf32>
    %20 = arith.addf %18, %19 : vector<8x256xf32>
    %21 = arith.mulf %20, %16 : vector<8x256xf32>
    %cst_11 = arith.constant 1.42141378 : f32
    %22 = vector.broadcast %cst_11 : f32 to vector<8x256xf32>
    %23 = arith.addf %21, %22 : vector<8x256xf32>
    %24 = arith.mulf %23, %16 : vector<8x256xf32>
    %cst_12 = arith.constant -0.284496725 : f32
    %25 = vector.broadcast %cst_12 : f32 to vector<8x256xf32>
    %26 = arith.addf %24, %25 : vector<8x256xf32>
    %27 = arith.mulf %26, %16 : vector<8x256xf32>
    %cst_13 = arith.constant 0.254829586 : f32
    %28 = vector.broadcast %cst_13 : f32 to vector<8x256xf32>
    %29 = arith.addf %27, %28 : vector<8x256xf32>
    %30 = arith.mulf %29, %16 : vector<8x256xf32>
    %cst_14 = arith.constant 0.000000e+00 : f32
    %31 = vector.broadcast %cst_14 : f32 to vector<8x256xf32>
    %32 = arith.subf %31, %11 : vector<8x256xf32>
    %33 = arith.mulf %32, %11 : vector<8x256xf32>
    %34 = math.exp %33 : vector<8x256xf32>
    %35 = arith.mulf %30, %34 : vector<8x256xf32>
    %cst_15 = arith.constant 1.000000e+00 : f32
    %36 = vector.broadcast %cst_15 : f32 to vector<8x256xf32>
    %37 = arith.subf %36, %35 : vector<8x256xf32>
    %cst_16 = arith.constant 0.000000e+00 : f32
    %38 = vector.broadcast %cst_16 : f32 to vector<8x256xf32>
    %39 = arith.cmpf oge, %10, %38 : vector<8x256xf32>
    %cst_17 = arith.constant 0.000000e+00 : f32
    %40 = vector.broadcast %cst_17 : f32 to vector<8x256xf32>
    %41 = arith.subf %40, %37 : vector<8x256xf32>
    %42 = arith.select %39, %37, %41 : vector<8x256xi1>, vector<8x256xf32>
    %cst_18 = arith.constant 1.000000e+00 : f32
    %43 = vector.broadcast %cst_18 : f32 to vector<8x256xf32>
    %44 = arith.addf %43, %42 : vector<8x256xf32>
    %45 = arith.mulf %8, %44 : vector<8x256xf32>
    %c0_19 = arith.constant 0 : index
    %c0_20 = arith.constant 0 : index
    %46 = vector.load %arg4[%c0_19, %c0_20] : memref<256x256xbf16, #tpu.memory_space<vmem>>, vector<256x256xbf16>
    %c0_21 = arith.constant 0 : index
    %c0_22 = arith.constant 0 : index
    %47 = vector.load %arg5[%c0_21, %c0_22] : memref<1x256xf32, #tpu.memory_space<vmem>>, vector<1x256xf32>
    %48 = arith.extf %46 : vector<256x256xbf16> to vector<256x256xf32>
    %cst_23 = arith.constant dense<0.000000e+00> : vector<8x256xf32>
    %49 = tpu.matmul %45, %48, %cst_23 {dimension_numbers = #tpu.dot_dimension_numbers<[1], [0], [0], [1], [0, 0, 1, 1], [], []>} : vector<8x256xf32>, vector<256x256xf32>, vector<8x256xf32> -> vector<8x256xf32>
    %50 = vector.broadcast %47 : vector<1x256xf32> to vector<8x256xf32>
    %51 = arith.addf %49, %50 : vector<8x256xf32>
    %cst_24 = arith.constant 5.000000e-01 : f32
    %52 = vector.broadcast %cst_24 : f32 to vector<8x256xf32>
    %53 = arith.mulf %52, %51 : vector<8x256xf32>
    %cst_25 = arith.constant 0.707106769 : f32
    %54 = vector.broadcast %cst_25 : f32 to vector<8x256xf32>
    %55 = arith.mulf %51, %54 : vector<8x256xf32>
    %56 = math.absf %55 : vector<8x256xf32>
    %cst_26 = arith.constant 0.327591091 : f32
    %57 = vector.broadcast %cst_26 : f32 to vector<8x256xf32>
    %58 = arith.mulf %57, %56 : vector<8x256xf32>
    %cst_27 = arith.constant 1.000000e+00 : f32
    %59 = vector.broadcast %cst_27 : f32 to vector<8x256xf32>
    %60 = arith.addf %59, %58 : vector<8x256xf32>
    %61 = tpu.reciprocal %60 {approx = true} : vector<8x256xf32> -> vector<8x256xf32>
    %cst_28 = arith.constant 1.06140542 : f32
    %62 = vector.broadcast %cst_28 : f32 to vector<8x256xf32>
    %63 = arith.mulf %62, %61 : vector<8x256xf32>
    %cst_29 = arith.constant -1.45315206 : f32
    %64 = vector.broadcast %cst_29 : f32 to vector<8x256xf32>
    %65 = arith.addf %63, %64 : vector<8x256xf32>
    %66 = arith.mulf %65, %61 : vector<8x256xf32>
    %cst_30 = arith.constant 1.42141378 : f32
    %67 = vector.broadcast %cst_30 : f32 to vector<8x256xf32>
    %68 = arith.addf %66, %67 : vector<8x256xf32>
    %69 = arith.mulf %68, %61 : vector<8x256xf32>
    %cst_31 = arith.constant -0.284496725 : f32
    %70 = vector.broadcast %cst_31 : f32 to vector<8x256xf32>
    %71 = arith.addf %69, %70 : vector<8x256xf32>
    %72 = arith.mulf %71, %61 : vector<8x256xf32>
    %cst_32 = arith.constant 0.254829586 : f32
    %73 = vector.broadcast %cst_32 : f32 to vector<8x256xf32>
    %74 = arith.addf %72, %73 : vector<8x256xf32>
    %75 = arith.mulf %74, %61 : vector<8x256xf32>
    %cst_33 = arith.constant 0.000000e+00 : f32
    %76 = vector.broadcast %cst_33 : f32 to vector<8x256xf32>
    %77 = arith.subf %76, %56 : vector<8x256xf32>
    %78 = arith.mulf %77, %56 : vector<8x256xf32>
    %79 = math.exp %78 : vector<8x256xf32>
    %80 = arith.mulf %75, %79 : vector<8x256xf32>
    %cst_34 = arith.constant 1.000000e+00 : f32
    %81 = vector.broadcast %cst_34 : f32 to vector<8x256xf32>
    %82 = arith.subf %81, %80 : vector<8x256xf32>
    %cst_35 = arith.constant 0.000000e+00 : f32
    %83 = vector.broadcast %cst_35 : f32 to vector<8x256xf32>
    %84 = arith.cmpf oge, %55, %83 : vector<8x256xf32>
    %cst_36 = arith.constant 0.000000e+00 : f32
    %85 = vector.broadcast %cst_36 : f32 to vector<8x256xf32>
    %86 = arith.subf %85, %82 : vector<8x256xf32>
    %87 = arith.select %84, %82, %86 : vector<8x256xi1>, vector<8x256xf32>
    %cst_37 = arith.constant 1.000000e+00 : f32
    %88 = vector.broadcast %cst_37 : f32 to vector<8x256xf32>
    %89 = arith.addf %88, %87 : vector<8x256xf32>
    %90 = arith.mulf %53, %89 : vector<8x256xf32>
    %c0_38 = arith.constant 0 : index
    %c0_39 = arith.constant 0 : index
    %91 = vector.load %arg6[%c0_38, %c0_39] : memref<256x128xbf16, #tpu.memory_space<vmem>>, vector<256x128xbf16>
    %c0_40 = arith.constant 0 : index
    %c0_41 = arith.constant 0 : index
    %92 = vector.load %arg7[%c0_40, %c0_41] : memref<1x128xf32, #tpu.memory_space<vmem>>, vector<1x128xf32>
    %93 = arith.extf %91 : vector<256x128xbf16> to vector<256x128xf32>
    %cst_42 = arith.constant dense<0.000000e+00> : vector<8x128xf32>
    %94 = tpu.matmul %90, %93, %cst_42 {dimension_numbers = #tpu.dot_dimension_numbers<[1], [0], [0], [1], [0, 0, 1, 1], [], []>} : vector<8x256xf32>, vector<256x128xf32>, vector<8x128xf32> -> vector<8x128xf32>
    %95 = vector.broadcast %92 : vector<1x128xf32> to vector<8x128xf32>
    %96 = arith.addf %94, %95 : vector<8x128xf32>
    %cst_43 = arith.constant 5.000000e-01 : f32
    %97 = vector.broadcast %cst_43 : f32 to vector<8x128xf32>
    %98 = arith.mulf %97, %96 : vector<8x128xf32>
    %cst_44 = arith.constant 0.707106769 : f32
    %99 = vector.broadcast %cst_44 : f32 to vector<8x128xf32>
    %100 = arith.mulf %96, %99 : vector<8x128xf32>
    %101 = math.absf %100 : vector<8x128xf32>
    %cst_45 = arith.constant 0.327591091 : f32
    %102 = vector.broadcast %cst_45 : f32 to vector<8x128xf32>
    %103 = arith.mulf %102, %101 : vector<8x128xf32>
    %cst_46 = arith.constant 1.000000e+00 : f32
    %104 = vector.broadcast %cst_46 : f32 to vector<8x128xf32>
    %105 = arith.addf %104, %103 : vector<8x128xf32>
    %106 = tpu.reciprocal %105 {approx = true} : vector<8x128xf32> -> vector<8x128xf32>
    %cst_47 = arith.constant 1.06140542 : f32
    %107 = vector.broadcast %cst_47 : f32 to vector<8x128xf32>
    %108 = arith.mulf %107, %106 : vector<8x128xf32>
    %cst_48 = arith.constant -1.45315206 : f32
    %109 = vector.broadcast %cst_48 : f32 to vector<8x128xf32>
    %110 = arith.addf %108, %109 : vector<8x128xf32>
    %111 = arith.mulf %110, %106 : vector<8x128xf32>
    %cst_49 = arith.constant 1.42141378 : f32
    %112 = vector.broadcast %cst_49 : f32 to vector<8x128xf32>
    %113 = arith.addf %111, %112 : vector<8x128xf32>
    %114 = arith.mulf %113, %106 : vector<8x128xf32>
    %cst_50 = arith.constant -0.284496725 : f32
    %115 = vector.broadcast %cst_50 : f32 to vector<8x128xf32>
    %116 = arith.addf %114, %115 : vector<8x128xf32>
    %117 = arith.mulf %116, %106 : vector<8x128xf32>
    %cst_51 = arith.constant 0.254829586 : f32
    %118 = vector.broadcast %cst_51 : f32 to vector<8x128xf32>
    %119 = arith.addf %117, %118 : vector<8x128xf32>
    %120 = arith.mulf %119, %106 : vector<8x128xf32>
    %cst_52 = arith.constant 0.000000e+00 : f32
    %121 = vector.broadcast %cst_52 : f32 to vector<8x128xf32>
    %122 = arith.subf %121, %101 : vector<8x128xf32>
    %123 = arith.mulf %122, %101 : vector<8x128xf32>
    %124 = math.exp %123 : vector<8x128xf32>
    %125 = arith.mulf %120, %124 : vector<8x128xf32>
    %cst_53 = arith.constant 1.000000e+00 : f32
    %126 = vector.broadcast %cst_53 : f32 to vector<8x128xf32>
    %127 = arith.subf %126, %125 : vector<8x128xf32>
    %cst_54 = arith.constant 0.000000e+00 : f32
    %128 = vector.broadcast %cst_54 : f32 to vector<8x128xf32>
    %129 = arith.cmpf oge, %100, %128 : vector<8x128xf32>
    %cst_55 = arith.constant 0.000000e+00 : f32
    %130 = vector.broadcast %cst_55 : f32 to vector<8x128xf32>
    %131 = arith.subf %130, %127 : vector<8x128xf32>
    %132 = arith.select %129, %127, %131 : vector<8x128xi1>, vector<8x128xf32>
    %cst_56 = arith.constant 1.000000e+00 : f32
    %133 = vector.broadcast %cst_56 : f32 to vector<8x128xf32>
    %134 = arith.addf %133, %132 : vector<8x128xf32>
    %135 = arith.mulf %98, %134 : vector<8x128xf32>
    %c0_57 = arith.constant 0 : index
    %c0_58 = arith.constant 0 : index
    %c0_59 = arith.constant 0 : index
    %136 = vector.load %arg8[%c0_57, %c0_58, %c0_59] : memref<4x128x128xbf16, #tpu.memory_space<vmem>>, vector<1x128x128xbf16>
    %137 = vector.shape_cast %136 : vector<1x128x128xbf16> to vector<128x128xbf16>
    %c0_60 = arith.constant 0 : index
    %c0_61 = arith.constant 0 : index
    %c0_62 = arith.constant 0 : index
    %138 = vector.load %arg9[%c0_60, %c0_61, %c0_62] : memref<4x1x128xf32, #tpu.memory_space<vmem>>, vector<1x1x128xf32>
    %139 = vector.shape_cast %138 : vector<1x1x128xf32> to vector<1x128xf32>
    %140 = arith.extf %137 : vector<128x128xbf16> to vector<128x128xf32>
    %cst_63 = arith.constant dense<0.000000e+00> : vector<8x128xf32>
    %141 = tpu.matmul %135, %140, %cst_63 {dimension_numbers = #tpu.dot_dimension_numbers<[1], [0], [0], [1], [0, 0, 1, 1], [], []>} : vector<8x128xf32>, vector<128x128xf32>, vector<8x128xf32> -> vector<8x128xf32>
    %142 = vector.broadcast %139 : vector<1x128xf32> to vector<8x128xf32>
    %143 = arith.addf %141, %142 : vector<8x128xf32>
    %cst_64 = arith.constant 5.000000e-01 : f32
    %144 = vector.broadcast %cst_64 : f32 to vector<8x128xf32>
    %145 = arith.mulf %144, %143 : vector<8x128xf32>
    %cst_65 = arith.constant 0.707106769 : f32
    %146 = vector.broadcast %cst_65 : f32 to vector<8x128xf32>
    %147 = arith.mulf %143, %146 : vector<8x128xf32>
    %148 = math.absf %147 : vector<8x128xf32>
    %cst_66 = arith.constant 0.327591091 : f32
    %149 = vector.broadcast %cst_66 : f32 to vector<8x128xf32>
    %150 = arith.mulf %149, %148 : vector<8x128xf32>
    %cst_67 = arith.constant 1.000000e+00 : f32
    %151 = vector.broadcast %cst_67 : f32 to vector<8x128xf32>
    %152 = arith.addf %151, %150 : vector<8x128xf32>
    %153 = tpu.reciprocal %152 {approx = true} : vector<8x128xf32> -> vector<8x128xf32>
    %cst_68 = arith.constant 1.06140542 : f32
    %154 = vector.broadcast %cst_68 : f32 to vector<8x128xf32>
    %155 = arith.mulf %154, %153 : vector<8x128xf32>
    %cst_69 = arith.constant -1.45315206 : f32
    %156 = vector.broadcast %cst_69 : f32 to vector<8x128xf32>
    %157 = arith.addf %155, %156 : vector<8x128xf32>
    %158 = arith.mulf %157, %153 : vector<8x128xf32>
    %cst_70 = arith.constant 1.42141378 : f32
    %159 = vector.broadcast %cst_70 : f32 to vector<8x128xf32>
    %160 = arith.addf %158, %159 : vector<8x128xf32>
    %161 = arith.mulf %160, %153 : vector<8x128xf32>
    %cst_71 = arith.constant -0.284496725 : f32
    %162 = vector.broadcast %cst_71 : f32 to vector<8x128xf32>
    %163 = arith.addf %161, %162 : vector<8x128xf32>
    %164 = arith.mulf %163, %153 : vector<8x128xf32>
    %cst_72 = arith.constant 0.254829586 : f32
    %165 = vector.broadcast %cst_72 : f32 to vector<8x128xf32>
    %166 = arith.addf %164, %165 : vector<8x128xf32>
    %167 = arith.mulf %166, %153 : vector<8x128xf32>
    %cst_73 = arith.constant 0.000000e+00 : f32
    %168 = vector.broadcast %cst_73 : f32 to vector<8x128xf32>
    %169 = arith.subf %168, %148 : vector<8x128xf32>
    %170 = arith.mulf %169, %148 : vector<8x128xf32>
    %171 = math.exp %170 : vector<8x128xf32>
    %172 = arith.mulf %167, %171 : vector<8x128xf32>
    %cst_74 = arith.constant 1.000000e+00 : f32
    %173 = vector.broadcast %cst_74 : f32 to vector<8x128xf32>
    %174 = arith.subf %173, %172 : vector<8x128xf32>
    %cst_75 = arith.constant 0.000000e+00 : f32
    %175 = vector.broadcast %cst_75 : f32 to vector<8x128xf32>
    %176 = arith.cmpf oge, %147, %175 : vector<8x128xf32>
    %cst_76 = arith.constant 0.000000e+00 : f32
    %177 = vector.broadcast %cst_76 : f32 to vector<8x128xf32>
    %178 = arith.subf %177, %174 : vector<8x128xf32>
    %179 = arith.select %176, %174, %178 : vector<8x128xi1>, vector<8x128xf32>
    %cst_77 = arith.constant 1.000000e+00 : f32
    %180 = vector.broadcast %cst_77 : f32 to vector<8x128xf32>
    %181 = arith.addf %180, %179 : vector<8x128xf32>
    %182 = arith.mulf %145, %181 : vector<8x128xf32>
    %c0_78 = arith.constant 0 : index
    %c0_79 = arith.constant 0 : index
    %c0_80 = arith.constant 0 : index
    %183 = vector.load %arg10[%c0_78, %c0_79, %c0_80] : memref<4x128x128xbf16, #tpu.memory_space<vmem>>, vector<1x128x128xbf16>
    %184 = vector.shape_cast %183 : vector<1x128x128xbf16> to vector<128x128xbf16>
    %c0_81 = arith.constant 0 : index
    %c0_82 = arith.constant 0 : index
    %c0_83 = arith.constant 0 : index
    %185 = vector.load %arg11[%c0_81, %c0_82, %c0_83] : memref<4x1x128xf32, #tpu.memory_space<vmem>>, vector<1x1x128xf32>
    %186 = vector.shape_cast %185 : vector<1x1x128xf32> to vector<1x128xf32>
    %187 = arith.extf %184 : vector<128x128xbf16> to vector<128x128xf32>
    %cst_84 = arith.constant dense<0.000000e+00> : vector<8x128xf32>
    %188 = tpu.matmul %182, %187, %cst_84 {dimension_numbers = #tpu.dot_dimension_numbers<[1], [0], [0], [1], [0, 0, 1, 1], [], []>} : vector<8x128xf32>, vector<128x128xf32>, vector<8x128xf32> -> vector<8x128xf32>
    %189 = vector.broadcast %186 : vector<1x128xf32> to vector<8x128xf32>
    %190 = arith.addf %188, %189 : vector<8x128xf32>
    %cst_85 = arith.constant 5.000000e-01 : f32
    %191 = vector.broadcast %cst_85 : f32 to vector<8x128xf32>
    %192 = arith.mulf %191, %190 : vector<8x128xf32>
    %cst_86 = arith.constant 0.707106769 : f32
    %193 = vector.broadcast %cst_86 : f32 to vector<8x128xf32>
    %194 = arith.mulf %190, %193 : vector<8x128xf32>
    %195 = math.absf %194 : vector<8x128xf32>
    %cst_87 = arith.constant 0.327591091 : f32
    %196 = vector.broadcast %cst_87 : f32 to vector<8x128xf32>
    %197 = arith.mulf %196, %195 : vector<8x128xf32>
    %cst_88 = arith.constant 1.000000e+00 : f32
    %198 = vector.broadcast %cst_88 : f32 to vector<8x128xf32>
    %199 = arith.addf %198, %197 : vector<8x128xf32>
    %200 = tpu.reciprocal %199 {approx = true} : vector<8x128xf32> -> vector<8x128xf32>
    %cst_89 = arith.constant 1.06140542 : f32
    %201 = vector.broadcast %cst_89 : f32 to vector<8x128xf32>
    %202 = arith.mulf %201, %200 : vector<8x128xf32>
    %cst_90 = arith.constant -1.45315206 : f32
    %203 = vector.broadcast %cst_90 : f32 to vector<8x128xf32>
    %204 = arith.addf %202, %203 : vector<8x128xf32>
    %205 = arith.mulf %204, %200 : vector<8x128xf32>
    %cst_91 = arith.constant 1.42141378 : f32
    %206 = vector.broadcast %cst_91 : f32 to vector<8x128xf32>
    %207 = arith.addf %205, %206 : vector<8x128xf32>
    %208 = arith.mulf %207, %200 : vector<8x128xf32>
    %cst_92 = arith.constant -0.284496725 : f32
    %209 = vector.broadcast %cst_92 : f32 to vector<8x128xf32>
    %210 = arith.addf %208, %209 : vector<8x128xf32>
    %211 = arith.mulf %210, %200 : vector<8x128xf32>
    %cst_93 = arith.constant 0.254829586 : f32
    %212 = vector.broadcast %cst_93 : f32 to vector<8x128xf32>
    %213 = arith.addf %211, %212 : vector<8x128xf32>
    %214 = arith.mulf %213, %200 : vector<8x128xf32>
    %cst_94 = arith.constant 0.000000e+00 : f32
    %215 = vector.broadcast %cst_94 : f32 to vector<8x128xf32>
    %216 = arith.subf %215, %195 : vector<8x128xf32>
    %217 = arith.mulf %216, %195 : vector<8x128xf32>
    %218 = math.exp %217 : vector<8x128xf32>
    %219 = arith.mulf %214, %218 : vector<8x128xf32>
    %cst_95 = arith.constant 1.000000e+00 : f32
    %220 = vector.broadcast %cst_95 : f32 to vector<8x128xf32>
    %221 = arith.subf %220, %219 : vector<8x128xf32>
    %cst_96 = arith.constant 0.000000e+00 : f32
    %222 = vector.broadcast %cst_96 : f32 to vector<8x128xf32>
    %223 = arith.cmpf oge, %194, %222 : vector<8x128xf32>
    %cst_97 = arith.constant 0.000000e+00 : f32
    %224 = vector.broadcast %cst_97 : f32 to vector<8x128xf32>
    %225 = arith.subf %224, %221 : vector<8x128xf32>
    %226 = arith.select %223, %221, %225 : vector<8x128xi1>, vector<8x128xf32>
    %cst_98 = arith.constant 1.000000e+00 : f32
    %227 = vector.broadcast %cst_98 : f32 to vector<8x128xf32>
    %228 = arith.addf %227, %226 : vector<8x128xf32>
    %229 = arith.mulf %192, %228 : vector<8x128xf32>
    %c0_99 = arith.constant 0 : index
    %c0_100 = arith.constant 0 : index
    %c0_101 = arith.constant 0 : index
    %230 = vector.load %arg12[%c0_99, %c0_100, %c0_101] : memref<4x128x128xbf16, #tpu.memory_space<vmem>>, vector<1x128x128xbf16>
    %231 = vector.shape_cast %230 : vector<1x128x128xbf16> to vector<128x128xbf16>
    %c0_102 = arith.constant 0 : index
    %c0_103 = arith.constant 0 : index
    %c0_104 = arith.constant 0 : index
    %232 = vector.load %arg13[%c0_102, %c0_103, %c0_104] : memref<4x1x128xf32, #tpu.memory_space<vmem>>, vector<1x1x128xf32>
    %233 = vector.shape_cast %232 : vector<1x1x128xf32> to vector<1x128xf32>
    %234 = arith.extf %231 : vector<128x128xbf16> to vector<128x128xf32>
    %cst_105 = arith.constant dense<0.000000e+00> : vector<8x128xf32>
    %235 = tpu.matmul %229, %234, %cst_105 {dimension_numbers = #tpu.dot_dimension_numbers<[1], [0], [0], [1], [0, 0, 1, 1], [], []>} : vector<8x128xf32>, vector<128x128xf32>, vector<8x128xf32> -> vector<8x128xf32>
    %236 = vector.broadcast %233 : vector<1x128xf32> to vector<8x128xf32>
    %237 = arith.addf %235, %236 : vector<8x128xf32>
    %cst_106 = arith.constant 5.000000e-01 : f32
    %238 = vector.broadcast %cst_106 : f32 to vector<8x128xf32>
    %239 = arith.mulf %238, %237 : vector<8x128xf32>
    %cst_107 = arith.constant 0.707106769 : f32
    %240 = vector.broadcast %cst_107 : f32 to vector<8x128xf32>
    %241 = arith.mulf %237, %240 : vector<8x128xf32>
    %242 = math.absf %241 : vector<8x128xf32>
    %cst_108 = arith.constant 0.327591091 : f32
    %243 = vector.broadcast %cst_108 : f32 to vector<8x128xf32>
    %244 = arith.mulf %243, %242 : vector<8x128xf32>
    %cst_109 = arith.constant 1.000000e+00 : f32
    %245 = vector.broadcast %cst_109 : f32 to vector<8x128xf32>
    %246 = arith.addf %245, %244 : vector<8x128xf32>
    %247 = tpu.reciprocal %246 {approx = true} : vector<8x128xf32> -> vector<8x128xf32>
    %cst_110 = arith.constant 1.06140542 : f32
    %248 = vector.broadcast %cst_110 : f32 to vector<8x128xf32>
    %249 = arith.mulf %248, %247 : vector<8x128xf32>
    %cst_111 = arith.constant -1.45315206 : f32
    %250 = vector.broadcast %cst_111 : f32 to vector<8x128xf32>
    %251 = arith.addf %249, %250 : vector<8x128xf32>
    %252 = arith.mulf %251, %247 : vector<8x128xf32>
    %cst_112 = arith.constant 1.42141378 : f32
    %253 = vector.broadcast %cst_112 : f32 to vector<8x128xf32>
    %254 = arith.addf %252, %253 : vector<8x128xf32>
    %255 = arith.mulf %254, %247 : vector<8x128xf32>
    %cst_113 = arith.constant -0.284496725 : f32
    %256 = vector.broadcast %cst_113 : f32 to vector<8x128xf32>
    %257 = arith.addf %255, %256 : vector<8x128xf32>
    %258 = arith.mulf %257, %247 : vector<8x128xf32>
    %cst_114 = arith.constant 0.254829586 : f32
    %259 = vector.broadcast %cst_114 : f32 to vector<8x128xf32>
    %260 = arith.addf %258, %259 : vector<8x128xf32>
    %261 = arith.mulf %260, %247 : vector<8x128xf32>
    %cst_115 = arith.constant 0.000000e+00 : f32
    %262 = vector.broadcast %cst_115 : f32 to vector<8x128xf32>
    %263 = arith.subf %262, %242 : vector<8x128xf32>
    %264 = arith.mulf %263, %242 : vector<8x128xf32>
    %265 = math.exp %264 : vector<8x128xf32>
    %266 = arith.mulf %261, %265 : vector<8x128xf32>
    %cst_116 = arith.constant 1.000000e+00 : f32
    %267 = vector.broadcast %cst_116 : f32 to vector<8x128xf32>
    %268 = arith.subf %267, %266 : vector<8x128xf32>
    %cst_117 = arith.constant 0.000000e+00 : f32
    %269 = vector.broadcast %cst_117 : f32 to vector<8x128xf32>
    %270 = arith.cmpf oge, %241, %269 : vector<8x128xf32>
    %cst_118 = arith.constant 0.000000e+00 : f32
    %271 = vector.broadcast %cst_118 : f32 to vector<8x128xf32>
    %272 = arith.subf %271, %268 : vector<8x128xf32>
    %273 = arith.select %270, %268, %272 : vector<8x128xi1>, vector<8x128xf32>
    %cst_119 = arith.constant 1.000000e+00 : f32
    %274 = vector.broadcast %cst_119 : f32 to vector<8x128xf32>
    %275 = arith.addf %274, %273 : vector<8x128xf32>
    %276 = arith.mulf %239, %275 : vector<8x128xf32>
    %c0_120 = arith.constant 0 : index
    %c0_121 = arith.constant 0 : index
    %c0_122 = arith.constant 0 : index
    %277 = vector.load %arg14[%c0_120, %c0_121, %c0_122] : memref<4x128x64xbf16, #tpu.memory_space<vmem>>, vector<1x128x64xbf16>
    %278 = vector.shape_cast %277 : vector<1x128x64xbf16> to vector<128x64xbf16>
    %c0_123 = arith.constant 0 : index
    %c0_124 = arith.constant 0 : index
    %c0_125 = arith.constant 0 : index
    %279 = vector.load %arg15[%c0_123, %c0_124, %c0_125] : memref<4x1x64xf32, #tpu.memory_space<vmem>>, vector<1x1x64xf32>
    %280 = vector.shape_cast %279 : vector<1x1x64xf32> to vector<1x64xf32>
    %281 = arith.extf %278 : vector<128x64xbf16> to vector<128x64xf32>
    %cst_126 = arith.constant dense<0.000000e+00> : vector<8x64xf32>
    %282 = tpu.matmul %276, %281, %cst_126 {dimension_numbers = #tpu.dot_dimension_numbers<[1], [0], [0], [1], [0, 0, 1, 1], [], []>} : vector<8x128xf32>, vector<128x64xf32>, vector<8x64xf32> -> vector<8x64xf32>
    %283 = vector.broadcast %280 : vector<1x64xf32> to vector<8x64xf32>
    %284 = arith.addf %282, %283 : vector<8x64xf32>
    %c1 = arith.constant 1 : index
    %c0_127 = arith.constant 0 : index
    %c0_128 = arith.constant 0 : index
    %285 = vector.load %arg8[%c1, %c0_127, %c0_128] : memref<4x128x128xbf16, #tpu.memory_space<vmem>>, vector<1x128x128xbf16>
    %286 = vector.shape_cast %285 : vector<1x128x128xbf16> to vector<128x128xbf16>
    %c1_129 = arith.constant 1 : index
    %c0_130 = arith.constant 0 : index
    %c0_131 = arith.constant 0 : index
    %287 = vector.load %arg9[%c1_129, %c0_130, %c0_131] : memref<4x1x128xf32, #tpu.memory_space<vmem>>, vector<1x1x128xf32>
    %288 = vector.shape_cast %287 : vector<1x1x128xf32> to vector<1x128xf32>
    %289 = arith.extf %286 : vector<128x128xbf16> to vector<128x128xf32>
    %cst_132 = arith.constant dense<0.000000e+00> : vector<8x128xf32>
    %290 = tpu.matmul %135, %289, %cst_132 {dimension_numbers = #tpu.dot_dimension_numbers<[1], [0], [0], [1], [0, 0, 1, 1], [], []>} : vector<8x128xf32>, vector<128x128xf32>, vector<8x128xf32> -> vector<8x128xf32>
    %291 = vector.broadcast %288 : vector<1x128xf32> to vector<8x128xf32>
    %292 = arith.addf %290, %291 : vector<8x128xf32>
    %cst_133 = arith.constant 5.000000e-01 : f32
    %293 = vector.broadcast %cst_133 : f32 to vector<8x128xf32>
    %294 = arith.mulf %293, %292 : vector<8x128xf32>
    %cst_134 = arith.constant 0.707106769 : f32
    %295 = vector.broadcast %cst_134 : f32 to vector<8x128xf32>
    %296 = arith.mulf %292, %295 : vector<8x128xf32>
    %297 = math.absf %296 : vector<8x128xf32>
    %cst_135 = arith.constant 0.327591091 : f32
    %298 = vector.broadcast %cst_135 : f32 to vector<8x128xf32>
    %299 = arith.mulf %298, %297 : vector<8x128xf32>
    %cst_136 = arith.constant 1.000000e+00 : f32
    %300 = vector.broadcast %cst_136 : f32 to vector<8x128xf32>
    %301 = arith.addf %300, %299 : vector<8x128xf32>
    %302 = tpu.reciprocal %301 {approx = true} : vector<8x128xf32> -> vector<8x128xf32>
    %cst_137 = arith.constant 1.06140542 : f32
    %303 = vector.broadcast %cst_137 : f32 to vector<8x128xf32>
    %304 = arith.mulf %303, %302 : vector<8x128xf32>
    %cst_138 = arith.constant -1.45315206 : f32
    %305 = vector.broadcast %cst_138 : f32 to vector<8x128xf32>
    %306 = arith.addf %304, %305 : vector<8x128xf32>
    %307 = arith.mulf %306, %302 : vector<8x128xf32>
    %cst_139 = arith.constant 1.42141378 : f32
    %308 = vector.broadcast %cst_139 : f32 to vector<8x128xf32>
    %309 = arith.addf %307, %308 : vector<8x128xf32>
    %310 = arith.mulf %309, %302 : vector<8x128xf32>
    %cst_140 = arith.constant -0.284496725 : f32
    %311 = vector.broadcast %cst_140 : f32 to vector<8x128xf32>
    %312 = arith.addf %310, %311 : vector<8x128xf32>
    %313 = arith.mulf %312, %302 : vector<8x128xf32>
    %cst_141 = arith.constant 0.254829586 : f32
    %314 = vector.broadcast %cst_141 : f32 to vector<8x128xf32>
    %315 = arith.addf %313, %314 : vector<8x128xf32>
    %316 = arith.mulf %315, %302 : vector<8x128xf32>
    %cst_142 = arith.constant 0.000000e+00 : f32
    %317 = vector.broadcast %cst_142 : f32 to vector<8x128xf32>
    %318 = arith.subf %317, %297 : vector<8x128xf32>
    %319 = arith.mulf %318, %297 : vector<8x128xf32>
    %320 = math.exp %319 : vector<8x128xf32>
    %321 = arith.mulf %316, %320 : vector<8x128xf32>
    %cst_143 = arith.constant 1.000000e+00 : f32
    %322 = vector.broadcast %cst_143 : f32 to vector<8x128xf32>
    %323 = arith.subf %322, %321 : vector<8x128xf32>
    %cst_144 = arith.constant 0.000000e+00 : f32
    %324 = vector.broadcast %cst_144 : f32 to vector<8x128xf32>
    %325 = arith.cmpf oge, %296, %324 : vector<8x128xf32>
    %cst_145 = arith.constant 0.000000e+00 : f32
    %326 = vector.broadcast %cst_145 : f32 to vector<8x128xf32>
    %327 = arith.subf %326, %323 : vector<8x128xf32>
    %328 = arith.select %325, %323, %327 : vector<8x128xi1>, vector<8x128xf32>
    %cst_146 = arith.constant 1.000000e+00 : f32
    %329 = vector.broadcast %cst_146 : f32 to vector<8x128xf32>
    %330 = arith.addf %329, %328 : vector<8x128xf32>
    %331 = arith.mulf %294, %330 : vector<8x128xf32>
    %c1_147 = arith.constant 1 : index
    %c0_148 = arith.constant 0 : index
    %c0_149 = arith.constant 0 : index
    %332 = vector.load %arg10[%c1_147, %c0_148, %c0_149] : memref<4x128x128xbf16, #tpu.memory_space<vmem>>, vector<1x128x128xbf16>
    %333 = vector.shape_cast %332 : vector<1x128x128xbf16> to vector<128x128xbf16>
    %c1_150 = arith.constant 1 : index
    %c0_151 = arith.constant 0 : index
    %c0_152 = arith.constant 0 : index
    %334 = vector.load %arg11[%c1_150, %c0_151, %c0_152] : memref<4x1x128xf32, #tpu.memory_space<vmem>>, vector<1x1x128xf32>
    %335 = vector.shape_cast %334 : vector<1x1x128xf32> to vector<1x128xf32>
    %336 = arith.extf %333 : vector<128x128xbf16> to vector<128x128xf32>
    %cst_153 = arith.constant dense<0.000000e+00> : vector<8x128xf32>
    %337 = tpu.matmul %331, %336, %cst_153 {dimension_numbers = #tpu.dot_dimension_numbers<[1], [0], [0], [1], [0, 0, 1, 1], [], []>} : vector<8x128xf32>, vector<128x128xf32>, vector<8x128xf32> -> vector<8x128xf32>
    %338 = vector.broadcast %335 : vector<1x128xf32> to vector<8x128xf32>
    %339 = arith.addf %337, %338 : vector<8x128xf32>
    %cst_154 = arith.constant 5.000000e-01 : f32
    %340 = vector.broadcast %cst_154 : f32 to vector<8x128xf32>
    %341 = arith.mulf %340, %339 : vector<8x128xf32>
    %cst_155 = arith.constant 0.707106769 : f32
    %342 = vector.broadcast %cst_155 : f32 to vector<8x128xf32>
    %343 = arith.mulf %339, %342 : vector<8x128xf32>
    %344 = math.absf %343 : vector<8x128xf32>
    %cst_156 = arith.constant 0.327591091 : f32
    %345 = vector.broadcast %cst_156 : f32 to vector<8x128xf32>
    %346 = arith.mulf %345, %344 : vector<8x128xf32>
    %cst_157 = arith.constant 1.000000e+00 : f32
    %347 = vector.broadcast %cst_157 : f32 to vector<8x128xf32>
    %348 = arith.addf %347, %346 : vector<8x128xf32>
    %349 = tpu.reciprocal %348 {approx = true} : vector<8x128xf32> -> vector<8x128xf32>
    %cst_158 = arith.constant 1.06140542 : f32
    %350 = vector.broadcast %cst_158 : f32 to vector<8x128xf32>
    %351 = arith.mulf %350, %349 : vector<8x128xf32>
    %cst_159 = arith.constant -1.45315206 : f32
    %352 = vector.broadcast %cst_159 : f32 to vector<8x128xf32>
    %353 = arith.addf %351, %352 : vector<8x128xf32>
    %354 = arith.mulf %353, %349 : vector<8x128xf32>
    %cst_160 = arith.constant 1.42141378 : f32
    %355 = vector.broadcast %cst_160 : f32 to vector<8x128xf32>
    %356 = arith.addf %354, %355 : vector<8x128xf32>
    %357 = arith.mulf %356, %349 : vector<8x128xf32>
    %cst_161 = arith.constant -0.284496725 : f32
    %358 = vector.broadcast %cst_161 : f32 to vector<8x128xf32>
    %359 = arith.addf %357, %358 : vector<8x128xf32>
    %360 = arith.mulf %359, %349 : vector<8x128xf32>
    %cst_162 = arith.constant 0.254829586 : f32
    %361 = vector.broadcast %cst_162 : f32 to vector<8x128xf32>
    %362 = arith.addf %360, %361 : vector<8x128xf32>
    %363 = arith.mulf %362, %349 : vector<8x128xf32>
    %cst_163 = arith.constant 0.000000e+00 : f32
    %364 = vector.broadcast %cst_163 : f32 to vector<8x128xf32>
    %365 = arith.subf %364, %344 : vector<8x128xf32>
    %366 = arith.mulf %365, %344 : vector<8x128xf32>
    %367 = math.exp %366 : vector<8x128xf32>
    %368 = arith.mulf %363, %367 : vector<8x128xf32>
    %cst_164 = arith.constant 1.000000e+00 : f32
    %369 = vector.broadcast %cst_164 : f32 to vector<8x128xf32>
    %370 = arith.subf %369, %368 : vector<8x128xf32>
    %cst_165 = arith.constant 0.000000e+00 : f32
    %371 = vector.broadcast %cst_165 : f32 to vector<8x128xf32>
    %372 = arith.cmpf oge, %343, %371 : vector<8x128xf32>
    %cst_166 = arith.constant 0.000000e+00 : f32
    %373 = vector.broadcast %cst_166 : f32 to vector<8x128xf32>
    %374 = arith.subf %373, %370 : vector<8x128xf32>
    %375 = arith.select %372, %370, %374 : vector<8x128xi1>, vector<8x128xf32>
    %cst_167 = arith.constant 1.000000e+00 : f32
    %376 = vector.broadcast %cst_167 : f32 to vector<8x128xf32>
    %377 = arith.addf %376, %375 : vector<8x128xf32>
    %378 = arith.mulf %341, %377 : vector<8x128xf32>
    %c1_168 = arith.constant 1 : index
    %c0_169 = arith.constant 0 : index
    %c0_170 = arith.constant 0 : index
    %379 = vector.load %arg12[%c1_168, %c0_169, %c0_170] : memref<4x128x128xbf16, #tpu.memory_space<vmem>>, vector<1x128x128xbf16>
    %380 = vector.shape_cast %379 : vector<1x128x128xbf16> to vector<128x128xbf16>
    %c1_171 = arith.constant 1 : index
    %c0_172 = arith.constant 0 : index
    %c0_173 = arith.constant 0 : index
    %381 = vector.load %arg13[%c1_171, %c0_172, %c0_173] : memref<4x1x128xf32, #tpu.memory_space<vmem>>, vector<1x1x128xf32>
    %382 = vector.shape_cast %381 : vector<1x1x128xf32> to vector<1x128xf32>
    %383 = arith.extf %380 : vector<128x128xbf16> to vector<128x128xf32>
    %cst_174 = arith.constant dense<0.000000e+00> : vector<8x128xf32>
    %384 = tpu.matmul %378, %383, %cst_174 {dimension_numbers = #tpu.dot_dimension_numbers<[1], [0], [0], [1], [0, 0, 1, 1], [], []>} : vector<8x128xf32>, vector<128x128xf32>, vector<8x128xf32> -> vector<8x128xf32>
    %385 = vector.broadcast %382 : vector<1x128xf32> to vector<8x128xf32>
    %386 = arith.addf %384, %385 : vector<8x128xf32>
    %cst_175 = arith.constant 5.000000e-01 : f32
    %387 = vector.broadcast %cst_175 : f32 to vector<8x128xf32>
    %388 = arith.mulf %387, %386 : vector<8x128xf32>
    %cst_176 = arith.constant 0.707106769 : f32
    %389 = vector.broadcast %cst_176 : f32 to vector<8x128xf32>
    %390 = arith.mulf %386, %389 : vector<8x128xf32>
    %391 = math.absf %390 : vector<8x128xf32>
    %cst_177 = arith.constant 0.327591091 : f32
    %392 = vector.broadcast %cst_177 : f32 to vector<8x128xf32>
    %393 = arith.mulf %392, %391 : vector<8x128xf32>
    %cst_178 = arith.constant 1.000000e+00 : f32
    %394 = vector.broadcast %cst_178 : f32 to vector<8x128xf32>
    %395 = arith.addf %394, %393 : vector<8x128xf32>
    %396 = tpu.reciprocal %395 {approx = true} : vector<8x128xf32> -> vector<8x128xf32>
    %cst_179 = arith.constant 1.06140542 : f32
    %397 = vector.broadcast %cst_179 : f32 to vector<8x128xf32>
    %398 = arith.mulf %397, %396 : vector<8x128xf32>
    %cst_180 = arith.constant -1.45315206 : f32
    %399 = vector.broadcast %cst_180 : f32 to vector<8x128xf32>
    %400 = arith.addf %398, %399 : vector<8x128xf32>
    %401 = arith.mulf %400, %396 : vector<8x128xf32>
    %cst_181 = arith.constant 1.42141378 : f32
    %402 = vector.broadcast %cst_181 : f32 to vector<8x128xf32>
    %403 = arith.addf %401, %402 : vector<8x128xf32>
    %404 = arith.mulf %403, %396 : vector<8x128xf32>
    %cst_182 = arith.constant -0.284496725 : f32
    %405 = vector.broadcast %cst_182 : f32 to vector<8x128xf32>
    %406 = arith.addf %404, %405 : vector<8x128xf32>
    %407 = arith.mulf %406, %396 : vector<8x128xf32>
    %cst_183 = arith.constant 0.254829586 : f32
    %408 = vector.broadcast %cst_183 : f32 to vector<8x128xf32>
    %409 = arith.addf %407, %408 : vector<8x128xf32>
    %410 = arith.mulf %409, %396 : vector<8x128xf32>
    %cst_184 = arith.constant 0.000000e+00 : f32
    %411 = vector.broadcast %cst_184 : f32 to vector<8x128xf32>
    %412 = arith.subf %411, %391 : vector<8x128xf32>
    %413 = arith.mulf %412, %391 : vector<8x128xf32>
    %414 = math.exp %413 : vector<8x128xf32>
    %415 = arith.mulf %410, %414 : vector<8x128xf32>
    %cst_185 = arith.constant 1.000000e+00 : f32
    %416 = vector.broadcast %cst_185 : f32 to vector<8x128xf32>
    %417 = arith.subf %416, %415 : vector<8x128xf32>
    %cst_186 = arith.constant 0.000000e+00 : f32
    %418 = vector.broadcast %cst_186 : f32 to vector<8x128xf32>
    %419 = arith.cmpf oge, %390, %418 : vector<8x128xf32>
    %cst_187 = arith.constant 0.000000e+00 : f32
    %420 = vector.broadcast %cst_187 : f32 to vector<8x128xf32>
    %421 = arith.subf %420, %417 : vector<8x128xf32>
    %422 = arith.select %419, %417, %421 : vector<8x128xi1>, vector<8x128xf32>
    %cst_188 = arith.constant 1.000000e+00 : f32
    %423 = vector.broadcast %cst_188 : f32 to vector<8x128xf32>
    %424 = arith.addf %423, %422 : vector<8x128xf32>
    %425 = arith.mulf %388, %424 : vector<8x128xf32>
    %c1_189 = arith.constant 1 : index
    %c0_190 = arith.constant 0 : index
    %c0_191 = arith.constant 0 : index
    %426 = vector.load %arg14[%c1_189, %c0_190, %c0_191] : memref<4x128x64xbf16, #tpu.memory_space<vmem>>, vector<1x128x64xbf16>
    %427 = vector.shape_cast %426 : vector<1x128x64xbf16> to vector<128x64xbf16>
    %c1_192 = arith.constant 1 : index
    %c0_193 = arith.constant 0 : index
    %c0_194 = arith.constant 0 : index
    %428 = vector.load %arg15[%c1_192, %c0_193, %c0_194] : memref<4x1x64xf32, #tpu.memory_space<vmem>>, vector<1x1x64xf32>
    %429 = vector.shape_cast %428 : vector<1x1x64xf32> to vector<1x64xf32>
    %430 = arith.extf %427 : vector<128x64xbf16> to vector<128x64xf32>
    %cst_195 = arith.constant dense<0.000000e+00> : vector<8x64xf32>
    %431 = tpu.matmul %425, %430, %cst_195 {dimension_numbers = #tpu.dot_dimension_numbers<[1], [0], [0], [1], [0, 0, 1, 1], [], []>} : vector<8x128xf32>, vector<128x64xf32>, vector<8x64xf32> -> vector<8x64xf32>
    %432 = vector.broadcast %429 : vector<1x64xf32> to vector<8x64xf32>
    %433 = arith.addf %431, %432 : vector<8x64xf32>
    %c2 = arith.constant 2 : index
    %c0_196 = arith.constant 0 : index
    %c0_197 = arith.constant 0 : index
    %434 = vector.load %arg8[%c2, %c0_196, %c0_197] : memref<4x128x128xbf16, #tpu.memory_space<vmem>>, vector<1x128x128xbf16>
    %435 = vector.shape_cast %434 : vector<1x128x128xbf16> to vector<128x128xbf16>
    %c2_198 = arith.constant 2 : index
    %c0_199 = arith.constant 0 : index
    %c0_200 = arith.constant 0 : index
    %436 = vector.load %arg9[%c2_198, %c0_199, %c0_200] : memref<4x1x128xf32, #tpu.memory_space<vmem>>, vector<1x1x128xf32>
    %437 = vector.shape_cast %436 : vector<1x1x128xf32> to vector<1x128xf32>
    %438 = arith.extf %435 : vector<128x128xbf16> to vector<128x128xf32>
    %cst_201 = arith.constant dense<0.000000e+00> : vector<8x128xf32>
    %439 = tpu.matmul %135, %438, %cst_201 {dimension_numbers = #tpu.dot_dimension_numbers<[1], [0], [0], [1], [0, 0, 1, 1], [], []>} : vector<8x128xf32>, vector<128x128xf32>, vector<8x128xf32> -> vector<8x128xf32>
    %440 = vector.broadcast %437 : vector<1x128xf32> to vector<8x128xf32>
    %441 = arith.addf %439, %440 : vector<8x128xf32>
    %cst_202 = arith.constant 5.000000e-01 : f32
    %442 = vector.broadcast %cst_202 : f32 to vector<8x128xf32>
    %443 = arith.mulf %442, %441 : vector<8x128xf32>
    %cst_203 = arith.constant 0.707106769 : f32
    %444 = vector.broadcast %cst_203 : f32 to vector<8x128xf32>
    %445 = arith.mulf %441, %444 : vector<8x128xf32>
    %446 = math.absf %445 : vector<8x128xf32>
    %cst_204 = arith.constant 0.327591091 : f32
    %447 = vector.broadcast %cst_204 : f32 to vector<8x128xf32>
    %448 = arith.mulf %447, %446 : vector<8x128xf32>
    %cst_205 = arith.constant 1.000000e+00 : f32
    %449 = vector.broadcast %cst_205 : f32 to vector<8x128xf32>
    %450 = arith.addf %449, %448 : vector<8x128xf32>
    %451 = tpu.reciprocal %450 {approx = true} : vector<8x128xf32> -> vector<8x128xf32>
    %cst_206 = arith.constant 1.06140542 : f32
    %452 = vector.broadcast %cst_206 : f32 to vector<8x128xf32>
    %453 = arith.mulf %452, %451 : vector<8x128xf32>
    %cst_207 = arith.constant -1.45315206 : f32
    %454 = vector.broadcast %cst_207 : f32 to vector<8x128xf32>
    %455 = arith.addf %453, %454 : vector<8x128xf32>
    %456 = arith.mulf %455, %451 : vector<8x128xf32>
    %cst_208 = arith.constant 1.42141378 : f32
    %457 = vector.broadcast %cst_208 : f32 to vector<8x128xf32>
    %458 = arith.addf %456, %457 : vector<8x128xf32>
    %459 = arith.mulf %458, %451 : vector<8x128xf32>
    %cst_209 = arith.constant -0.284496725 : f32
    %460 = vector.broadcast %cst_209 : f32 to vector<8x128xf32>
    %461 = arith.addf %459, %460 : vector<8x128xf32>
    %462 = arith.mulf %461, %451 : vector<8x128xf32>
    %cst_210 = arith.constant 0.254829586 : f32
    %463 = vector.broadcast %cst_210 : f32 to vector<8x128xf32>
    %464 = arith.addf %462, %463 : vector<8x128xf32>
    %465 = arith.mulf %464, %451 : vector<8x128xf32>
    %cst_211 = arith.constant 0.000000e+00 : f32
    %466 = vector.broadcast %cst_211 : f32 to vector<8x128xf32>
    %467 = arith.subf %466, %446 : vector<8x128xf32>
    %468 = arith.mulf %467, %446 : vector<8x128xf32>
    %469 = math.exp %468 : vector<8x128xf32>
    %470 = arith.mulf %465, %469 : vector<8x128xf32>
    %cst_212 = arith.constant 1.000000e+00 : f32
    %471 = vector.broadcast %cst_212 : f32 to vector<8x128xf32>
    %472 = arith.subf %471, %470 : vector<8x128xf32>
    %cst_213 = arith.constant 0.000000e+00 : f32
    %473 = vector.broadcast %cst_213 : f32 to vector<8x128xf32>
    %474 = arith.cmpf oge, %445, %473 : vector<8x128xf32>
    %cst_214 = arith.constant 0.000000e+00 : f32
    %475 = vector.broadcast %cst_214 : f32 to vector<8x128xf32>
    %476 = arith.subf %475, %472 : vector<8x128xf32>
    %477 = arith.select %474, %472, %476 : vector<8x128xi1>, vector<8x128xf32>
    %cst_215 = arith.constant 1.000000e+00 : f32
    %478 = vector.broadcast %cst_215 : f32 to vector<8x128xf32>
    %479 = arith.addf %478, %477 : vector<8x128xf32>
    %480 = arith.mulf %443, %479 : vector<8x128xf32>
    %c2_216 = arith.constant 2 : index
    %c0_217 = arith.constant 0 : index
    %c0_218 = arith.constant 0 : index
    %481 = vector.load %arg10[%c2_216, %c0_217, %c0_218] : memref<4x128x128xbf16, #tpu.memory_space<vmem>>, vector<1x128x128xbf16>
    %482 = vector.shape_cast %481 : vector<1x128x128xbf16> to vector<128x128xbf16>
    %c2_219 = arith.constant 2 : index
    %c0_220 = arith.constant 0 : index
    %c0_221 = arith.constant 0 : index
    %483 = vector.load %arg11[%c2_219, %c0_220, %c0_221] : memref<4x1x128xf32, #tpu.memory_space<vmem>>, vector<1x1x128xf32>
    %484 = vector.shape_cast %483 : vector<1x1x128xf32> to vector<1x128xf32>
    %485 = arith.extf %482 : vector<128x128xbf16> to vector<128x128xf32>
    %cst_222 = arith.constant dense<0.000000e+00> : vector<8x128xf32>
    %486 = tpu.matmul %480, %485, %cst_222 {dimension_numbers = #tpu.dot_dimension_numbers<[1], [0], [0], [1], [0, 0, 1, 1], [], []>} : vector<8x128xf32>, vector<128x128xf32>, vector<8x128xf32> -> vector<8x128xf32>
    %487 = vector.broadcast %484 : vector<1x128xf32> to vector<8x128xf32>
    %488 = arith.addf %486, %487 : vector<8x128xf32>
    %cst_223 = arith.constant 5.000000e-01 : f32
    %489 = vector.broadcast %cst_223 : f32 to vector<8x128xf32>
    %490 = arith.mulf %489, %488 : vector<8x128xf32>
    %cst_224 = arith.constant 0.707106769 : f32
    %491 = vector.broadcast %cst_224 : f32 to vector<8x128xf32>
    %492 = arith.mulf %488, %491 : vector<8x128xf32>
    %493 = math.absf %492 : vector<8x128xf32>
    %cst_225 = arith.constant 0.327591091 : f32
    %494 = vector.broadcast %cst_225 : f32 to vector<8x128xf32>
    %495 = arith.mulf %494, %493 : vector<8x128xf32>
    %cst_226 = arith.constant 1.000000e+00 : f32
    %496 = vector.broadcast %cst_226 : f32 to vector<8x128xf32>
    %497 = arith.addf %496, %495 : vector<8x128xf32>
    %498 = tpu.reciprocal %497 {approx = true} : vector<8x128xf32> -> vector<8x128xf32>
    %cst_227 = arith.constant 1.06140542 : f32
    %499 = vector.broadcast %cst_227 : f32 to vector<8x128xf32>
    %500 = arith.mulf %499, %498 : vector<8x128xf32>
    %cst_228 = arith.constant -1.45315206 : f32
    %501 = vector.broadcast %cst_228 : f32 to vector<8x128xf32>
    %502 = arith.addf %500, %501 : vector<8x128xf32>
    %503 = arith.mulf %502, %498 : vector<8x128xf32>
    %cst_229 = arith.constant 1.42141378 : f32
    %504 = vector.broadcast %cst_229 : f32 to vector<8x128xf32>
    %505 = arith.addf %503, %504 : vector<8x128xf32>
    %506 = arith.mulf %505, %498 : vector<8x128xf32>
    %cst_230 = arith.constant -0.284496725 : f32
    %507 = vector.broadcast %cst_230 : f32 to vector<8x128xf32>
    %508 = arith.addf %506, %507 : vector<8x128xf32>
    %509 = arith.mulf %508, %498 : vector<8x128xf32>
    %cst_231 = arith.constant 0.254829586 : f32
    %510 = vector.broadcast %cst_231 : f32 to vector<8x128xf32>
    %511 = arith.addf %509, %510 : vector<8x128xf32>
    %512 = arith.mulf %511, %498 : vector<8x128xf32>
    %cst_232 = arith.constant 0.000000e+00 : f32
    %513 = vector.broadcast %cst_232 : f32 to vector<8x128xf32>
    %514 = arith.subf %513, %493 : vector<8x128xf32>
    %515 = arith.mulf %514, %493 : vector<8x128xf32>
    %516 = math.exp %515 : vector<8x128xf32>
    %517 = arith.mulf %512, %516 : vector<8x128xf32>
    %cst_233 = arith.constant 1.000000e+00 : f32
    %518 = vector.broadcast %cst_233 : f32 to vector<8x128xf32>
    %519 = arith.subf %518, %517 : vector<8x128xf32>
    %cst_234 = arith.constant 0.000000e+00 : f32
    %520 = vector.broadcast %cst_234 : f32 to vector<8x128xf32>
    %521 = arith.cmpf oge, %492, %520 : vector<8x128xf32>
    %cst_235 = arith.constant 0.000000e+00 : f32
    %522 = vector.broadcast %cst_235 : f32 to vector<8x128xf32>
    %523 = arith.subf %522, %519 : vector<8x128xf32>
    %524 = arith.select %521, %519, %523 : vector<8x128xi1>, vector<8x128xf32>
    %cst_236 = arith.constant 1.000000e+00 : f32
    %525 = vector.broadcast %cst_236 : f32 to vector<8x128xf32>
    %526 = arith.addf %525, %524 : vector<8x128xf32>
    %527 = arith.mulf %490, %526 : vector<8x128xf32>
    %c2_237 = arith.constant 2 : index
    %c0_238 = arith.constant 0 : index
    %c0_239 = arith.constant 0 : index
    %528 = vector.load %arg12[%c2_237, %c0_238, %c0_239] : memref<4x128x128xbf16, #tpu.memory_space<vmem>>, vector<1x128x128xbf16>
    %529 = vector.shape_cast %528 : vector<1x128x128xbf16> to vector<128x128xbf16>
    %c2_240 = arith.constant 2 : index
    %c0_241 = arith.constant 0 : index
    %c0_242 = arith.constant 0 : index
    %530 = vector.load %arg13[%c2_240, %c0_241, %c0_242] : memref<4x1x128xf32, #tpu.memory_space<vmem>>, vector<1x1x128xf32>
    %531 = vector.shape_cast %530 : vector<1x1x128xf32> to vector<1x128xf32>
    %532 = arith.extf %529 : vector<128x128xbf16> to vector<128x128xf32>
    %cst_243 = arith.constant dense<0.000000e+00> : vector<8x128xf32>
    %533 = tpu.matmul %527, %532, %cst_243 {dimension_numbers = #tpu.dot_dimension_numbers<[1], [0], [0], [1], [0, 0, 1, 1], [], []>} : vector<8x128xf32>, vector<128x128xf32>, vector<8x128xf32> -> vector<8x128xf32>
    %534 = vector.broadcast %531 : vector<1x128xf32> to vector<8x128xf32>
    %535 = arith.addf %533, %534 : vector<8x128xf32>
    %cst_244 = arith.constant 5.000000e-01 : f32
    %536 = vector.broadcast %cst_244 : f32 to vector<8x128xf32>
    %537 = arith.mulf %536, %535 : vector<8x128xf32>
    %cst_245 = arith.constant 0.707106769 : f32
    %538 = vector.broadcast %cst_245 : f32 to vector<8x128xf32>
    %539 = arith.mulf %535, %538 : vector<8x128xf32>
    %540 = math.absf %539 : vector<8x128xf32>
    %cst_246 = arith.constant 0.327591091 : f32
    %541 = vector.broadcast %cst_246 : f32 to vector<8x128xf32>
    %542 = arith.mulf %541, %540 : vector<8x128xf32>
    %cst_247 = arith.constant 1.000000e+00 : f32
    %543 = vector.broadcast %cst_247 : f32 to vector<8x128xf32>
    %544 = arith.addf %543, %542 : vector<8x128xf32>
    %545 = tpu.reciprocal %544 {approx = true} : vector<8x128xf32> -> vector<8x128xf32>
    %cst_248 = arith.constant 1.06140542 : f32
    %546 = vector.broadcast %cst_248 : f32 to vector<8x128xf32>
    %547 = arith.mulf %546, %545 : vector<8x128xf32>
    %cst_249 = arith.constant -1.45315206 : f32
    %548 = vector.broadcast %cst_249 : f32 to vector<8x128xf32>
    %549 = arith.addf %547, %548 : vector<8x128xf32>
    %550 = arith.mulf %549, %545 : vector<8x128xf32>
    %cst_250 = arith.constant 1.42141378 : f32
    %551 = vector.broadcast %cst_250 : f32 to vector<8x128xf32>
    %552 = arith.addf %550, %551 : vector<8x128xf32>
    %553 = arith.mulf %552, %545 : vector<8x128xf32>
    %cst_251 = arith.constant -0.284496725 : f32
    %554 = vector.broadcast %cst_251 : f32 to vector<8x128xf32>
    %555 = arith.addf %553, %554 : vector<8x128xf32>
    %556 = arith.mulf %555, %545 : vector<8x128xf32>
    %cst_252 = arith.constant 0.254829586 : f32
    %557 = vector.broadcast %cst_252 : f32 to vector<8x128xf32>
    %558 = arith.addf %556, %557 : vector<8x128xf32>
    %559 = arith.mulf %558, %545 : vector<8x128xf32>
    %cst_253 = arith.constant 0.000000e+00 : f32
    %560 = vector.broadcast %cst_253 : f32 to vector<8x128xf32>
    %561 = arith.subf %560, %540 : vector<8x128xf32>
    %562 = arith.mulf %561, %540 : vector<8x128xf32>
    %563 = math.exp %562 : vector<8x128xf32>
    %564 = arith.mulf %559, %563 : vector<8x128xf32>
    %cst_254 = arith.constant 1.000000e+00 : f32
    %565 = vector.broadcast %cst_254 : f32 to vector<8x128xf32>
    %566 = arith.subf %565, %564 : vector<8x128xf32>
    %cst_255 = arith.constant 0.000000e+00 : f32
    %567 = vector.broadcast %cst_255 : f32 to vector<8x128xf32>
    %568 = arith.cmpf oge, %539, %567 : vector<8x128xf32>
    %cst_256 = arith.constant 0.000000e+00 : f32
    %569 = vector.broadcast %cst_256 : f32 to vector<8x128xf32>
    %570 = arith.subf %569, %566 : vector<8x128xf32>
    %571 = arith.select %568, %566, %570 : vector<8x128xi1>, vector<8x128xf32>
    %cst_257 = arith.constant 1.000000e+00 : f32
    %572 = vector.broadcast %cst_257 : f32 to vector<8x128xf32>
    %573 = arith.addf %572, %571 : vector<8x128xf32>
    %574 = arith.mulf %537, %573 : vector<8x128xf32>
    %c2_258 = arith.constant 2 : index
    %c0_259 = arith.constant 0 : index
    %c0_260 = arith.constant 0 : index
    %575 = vector.load %arg14[%c2_258, %c0_259, %c0_260] : memref<4x128x64xbf16, #tpu.memory_space<vmem>>, vector<1x128x64xbf16>
    %576 = vector.shape_cast %575 : vector<1x128x64xbf16> to vector<128x64xbf16>
    %c2_261 = arith.constant 2 : index
    %c0_262 = arith.constant 0 : index
    %c0_263 = arith.constant 0 : index
    %577 = vector.load %arg15[%c2_261, %c0_262, %c0_263] : memref<4x1x64xf32, #tpu.memory_space<vmem>>, vector<1x1x64xf32>
    %578 = vector.shape_cast %577 : vector<1x1x64xf32> to vector<1x64xf32>
    %579 = arith.extf %576 : vector<128x64xbf16> to vector<128x64xf32>
    %cst_264 = arith.constant dense<0.000000e+00> : vector<8x64xf32>
    %580 = tpu.matmul %574, %579, %cst_264 {dimension_numbers = #tpu.dot_dimension_numbers<[1], [0], [0], [1], [0, 0, 1, 1], [], []>} : vector<8x128xf32>, vector<128x64xf32>, vector<8x64xf32> -> vector<8x64xf32>
    %581 = vector.broadcast %578 : vector<1x64xf32> to vector<8x64xf32>
    %582 = arith.addf %580, %581 : vector<8x64xf32>
    %c3 = arith.constant 3 : index
    %c0_265 = arith.constant 0 : index
    %c0_266 = arith.constant 0 : index
    %583 = vector.load %arg8[%c3, %c0_265, %c0_266] : memref<4x128x128xbf16, #tpu.memory_space<vmem>>, vector<1x128x128xbf16>
    %584 = vector.shape_cast %583 : vector<1x128x128xbf16> to vector<128x128xbf16>
    %c3_267 = arith.constant 3 : index
    %c0_268 = arith.constant 0 : index
    %c0_269 = arith.constant 0 : index
    %585 = vector.load %arg9[%c3_267, %c0_268, %c0_269] : memref<4x1x128xf32, #tpu.memory_space<vmem>>, vector<1x1x128xf32>
    %586 = vector.shape_cast %585 : vector<1x1x128xf32> to vector<1x128xf32>
    %587 = arith.extf %584 : vector<128x128xbf16> to vector<128x128xf32>
    %cst_270 = arith.constant dense<0.000000e+00> : vector<8x128xf32>
    %588 = tpu.matmul %135, %587, %cst_270 {dimension_numbers = #tpu.dot_dimension_numbers<[1], [0], [0], [1], [0, 0, 1, 1], [], []>} : vector<8x128xf32>, vector<128x128xf32>, vector<8x128xf32> -> vector<8x128xf32>
    %589 = vector.broadcast %586 : vector<1x128xf32> to vector<8x128xf32>
    %590 = arith.addf %588, %589 : vector<8x128xf32>
    %cst_271 = arith.constant 5.000000e-01 : f32
    %591 = vector.broadcast %cst_271 : f32 to vector<8x128xf32>
    %592 = arith.mulf %591, %590 : vector<8x128xf32>
    %cst_272 = arith.constant 0.707106769 : f32
    %593 = vector.broadcast %cst_272 : f32 to vector<8x128xf32>
    %594 = arith.mulf %590, %593 : vector<8x128xf32>
    %595 = math.absf %594 : vector<8x128xf32>
    %cst_273 = arith.constant 0.327591091 : f32
    %596 = vector.broadcast %cst_273 : f32 to vector<8x128xf32>
    %597 = arith.mulf %596, %595 : vector<8x128xf32>
    %cst_274 = arith.constant 1.000000e+00 : f32
    %598 = vector.broadcast %cst_274 : f32 to vector<8x128xf32>
    %599 = arith.addf %598, %597 : vector<8x128xf32>
    %600 = tpu.reciprocal %599 {approx = true} : vector<8x128xf32> -> vector<8x128xf32>
    %cst_275 = arith.constant 1.06140542 : f32
    %601 = vector.broadcast %cst_275 : f32 to vector<8x128xf32>
    %602 = arith.mulf %601, %600 : vector<8x128xf32>
    %cst_276 = arith.constant -1.45315206 : f32
    %603 = vector.broadcast %cst_276 : f32 to vector<8x128xf32>
    %604 = arith.addf %602, %603 : vector<8x128xf32>
    %605 = arith.mulf %604, %600 : vector<8x128xf32>
    %cst_277 = arith.constant 1.42141378 : f32
    %606 = vector.broadcast %cst_277 : f32 to vector<8x128xf32>
    %607 = arith.addf %605, %606 : vector<8x128xf32>
    %608 = arith.mulf %607, %600 : vector<8x128xf32>
    %cst_278 = arith.constant -0.284496725 : f32
    %609 = vector.broadcast %cst_278 : f32 to vector<8x128xf32>
    %610 = arith.addf %608, %609 : vector<8x128xf32>
    %611 = arith.mulf %610, %600 : vector<8x128xf32>
    %cst_279 = arith.constant 0.254829586 : f32
    %612 = vector.broadcast %cst_279 : f32 to vector<8x128xf32>
    %613 = arith.addf %611, %612 : vector<8x128xf32>
    %614 = arith.mulf %613, %600 : vector<8x128xf32>
    %cst_280 = arith.constant 0.000000e+00 : f32
    %615 = vector.broadcast %cst_280 : f32 to vector<8x128xf32>
    %616 = arith.subf %615, %595 : vector<8x128xf32>
    %617 = arith.mulf %616, %595 : vector<8x128xf32>
    %618 = math.exp %617 : vector<8x128xf32>
    %619 = arith.mulf %614, %618 : vector<8x128xf32>
    %cst_281 = arith.constant 1.000000e+00 : f32
    %620 = vector.broadcast %cst_281 : f32 to vector<8x128xf32>
    %621 = arith.subf %620, %619 : vector<8x128xf32>
    %cst_282 = arith.constant 0.000000e+00 : f32
    %622 = vector.broadcast %cst_282 : f32 to vector<8x128xf32>
    %623 = arith.cmpf oge, %594, %622 : vector<8x128xf32>
    %cst_283 = arith.constant 0.000000e+00 : f32
    %624 = vector.broadcast %cst_283 : f32 to vector<8x128xf32>
    %625 = arith.subf %624, %621 : vector<8x128xf32>
    %626 = arith.select %623, %621, %625 : vector<8x128xi1>, vector<8x128xf32>
    %cst_284 = arith.constant 1.000000e+00 : f32
    %627 = vector.broadcast %cst_284 : f32 to vector<8x128xf32>
    %628 = arith.addf %627, %626 : vector<8x128xf32>
    %629 = arith.mulf %592, %628 : vector<8x128xf32>
    %c3_285 = arith.constant 3 : index
    %c0_286 = arith.constant 0 : index
    %c0_287 = arith.constant 0 : index
    %630 = vector.load %arg10[%c3_285, %c0_286, %c0_287] : memref<4x128x128xbf16, #tpu.memory_space<vmem>>, vector<1x128x128xbf16>
    %631 = vector.shape_cast %630 : vector<1x128x128xbf16> to vector<128x128xbf16>
    %c3_288 = arith.constant 3 : index
    %c0_289 = arith.constant 0 : index
    %c0_290 = arith.constant 0 : index
    %632 = vector.load %arg11[%c3_288, %c0_289, %c0_290] : memref<4x1x128xf32, #tpu.memory_space<vmem>>, vector<1x1x128xf32>
    %633 = vector.shape_cast %632 : vector<1x1x128xf32> to vector<1x128xf32>
    %634 = arith.extf %631 : vector<128x128xbf16> to vector<128x128xf32>
    %cst_291 = arith.constant dense<0.000000e+00> : vector<8x128xf32>
    %635 = tpu.matmul %629, %634, %cst_291 {dimension_numbers = #tpu.dot_dimension_numbers<[1], [0], [0], [1], [0, 0, 1, 1], [], []>} : vector<8x128xf32>, vector<128x128xf32>, vector<8x128xf32> -> vector<8x128xf32>
    %636 = vector.broadcast %633 : vector<1x128xf32> to vector<8x128xf32>
    %637 = arith.addf %635, %636 : vector<8x128xf32>
    %cst_292 = arith.constant 5.000000e-01 : f32
    %638 = vector.broadcast %cst_292 : f32 to vector<8x128xf32>
    %639 = arith.mulf %638, %637 : vector<8x128xf32>
    %cst_293 = arith.constant 0.707106769 : f32
    %640 = vector.broadcast %cst_293 : f32 to vector<8x128xf32>
    %641 = arith.mulf %637, %640 : vector<8x128xf32>
    %642 = math.absf %641 : vector<8x128xf32>
    %cst_294 = arith.constant 0.327591091 : f32
    %643 = vector.broadcast %cst_294 : f32 to vector<8x128xf32>
    %644 = arith.mulf %643, %642 : vector<8x128xf32>
    %cst_295 = arith.constant 1.000000e+00 : f32
    %645 = vector.broadcast %cst_295 : f32 to vector<8x128xf32>
    %646 = arith.addf %645, %644 : vector<8x128xf32>
    %647 = tpu.reciprocal %646 {approx = true} : vector<8x128xf32> -> vector<8x128xf32>
    %cst_296 = arith.constant 1.06140542 : f32
    %648 = vector.broadcast %cst_296 : f32 to vector<8x128xf32>
    %649 = arith.mulf %648, %647 : vector<8x128xf32>
    %cst_297 = arith.constant -1.45315206 : f32
    %650 = vector.broadcast %cst_297 : f32 to vector<8x128xf32>
    %651 = arith.addf %649, %650 : vector<8x128xf32>
    %652 = arith.mulf %651, %647 : vector<8x128xf32>
    %cst_298 = arith.constant 1.42141378 : f32
    %653 = vector.broadcast %cst_298 : f32 to vector<8x128xf32>
    %654 = arith.addf %652, %653 : vector<8x128xf32>
    %655 = arith.mulf %654, %647 : vector<8x128xf32>
    %cst_299 = arith.constant -0.284496725 : f32
    %656 = vector.broadcast %cst_299 : f32 to vector<8x128xf32>
    %657 = arith.addf %655, %656 : vector<8x128xf32>
    %658 = arith.mulf %657, %647 : vector<8x128xf32>
    %cst_300 = arith.constant 0.254829586 : f32
    %659 = vector.broadcast %cst_300 : f32 to vector<8x128xf32>
    %660 = arith.addf %658, %659 : vector<8x128xf32>
    %661 = arith.mulf %660, %647 : vector<8x128xf32>
    %cst_301 = arith.constant 0.000000e+00 : f32
    %662 = vector.broadcast %cst_301 : f32 to vector<8x128xf32>
    %663 = arith.subf %662, %642 : vector<8x128xf32>
    %664 = arith.mulf %663, %642 : vector<8x128xf32>
    %665 = math.exp %664 : vector<8x128xf32>
    %666 = arith.mulf %661, %665 : vector<8x128xf32>
    %cst_302 = arith.constant 1.000000e+00 : f32
    %667 = vector.broadcast %cst_302 : f32 to vector<8x128xf32>
    %668 = arith.subf %667, %666 : vector<8x128xf32>
    %cst_303 = arith.constant 0.000000e+00 : f32
    %669 = vector.broadcast %cst_303 : f32 to vector<8x128xf32>
    %670 = arith.cmpf oge, %641, %669 : vector<8x128xf32>
    %cst_304 = arith.constant 0.000000e+00 : f32
    %671 = vector.broadcast %cst_304 : f32 to vector<8x128xf32>
    %672 = arith.subf %671, %668 : vector<8x128xf32>
    %673 = arith.select %670, %668, %672 : vector<8x128xi1>, vector<8x128xf32>
    %cst_305 = arith.constant 1.000000e+00 : f32
    %674 = vector.broadcast %cst_305 : f32 to vector<8x128xf32>
    %675 = arith.addf %674, %673 : vector<8x128xf32>
    %676 = arith.mulf %639, %675 : vector<8x128xf32>
    %c3_306 = arith.constant 3 : index
    %c0_307 = arith.constant 0 : index
    %c0_308 = arith.constant 0 : index
    %677 = vector.load %arg12[%c3_306, %c0_307, %c0_308] : memref<4x128x128xbf16, #tpu.memory_space<vmem>>, vector<1x128x128xbf16>
    %678 = vector.shape_cast %677 : vector<1x128x128xbf16> to vector<128x128xbf16>
    %c3_309 = arith.constant 3 : index
    %c0_310 = arith.constant 0 : index
    %c0_311 = arith.constant 0 : index
    %679 = vector.load %arg13[%c3_309, %c0_310, %c0_311] : memref<4x1x128xf32, #tpu.memory_space<vmem>>, vector<1x1x128xf32>
    %680 = vector.shape_cast %679 : vector<1x1x128xf32> to vector<1x128xf32>
    %681 = arith.extf %678 : vector<128x128xbf16> to vector<128x128xf32>
    %cst_312 = arith.constant dense<0.000000e+00> : vector<8x128xf32>
    %682 = tpu.matmul %676, %681, %cst_312 {dimension_numbers = #tpu.dot_dimension_numbers<[1], [0], [0], [1], [0, 0, 1, 1], [], []>} : vector<8x128xf32>, vector<128x128xf32>, vector<8x128xf32> -> vector<8x128xf32>
    %683 = vector.broadcast %680 : vector<1x128xf32> to vector<8x128xf32>
    %684 = arith.addf %682, %683 : vector<8x128xf32>
    %cst_313 = arith.constant 5.000000e-01 : f32
    %685 = vector.broadcast %cst_313 : f32 to vector<8x128xf32>
    %686 = arith.mulf %685, %684 : vector<8x128xf32>
    %cst_314 = arith.constant 0.707106769 : f32
    %687 = vector.broadcast %cst_314 : f32 to vector<8x128xf32>
    %688 = arith.mulf %684, %687 : vector<8x128xf32>
    %689 = math.absf %688 : vector<8x128xf32>
    %cst_315 = arith.constant 0.327591091 : f32
    %690 = vector.broadcast %cst_315 : f32 to vector<8x128xf32>
    %691 = arith.mulf %690, %689 : vector<8x128xf32>
    %cst_316 = arith.constant 1.000000e+00 : f32
    %692 = vector.broadcast %cst_316 : f32 to vector<8x128xf32>
    %693 = arith.addf %692, %691 : vector<8x128xf32>
    %694 = tpu.reciprocal %693 {approx = true} : vector<8x128xf32> -> vector<8x128xf32>
    %cst_317 = arith.constant 1.06140542 : f32
    %695 = vector.broadcast %cst_317 : f32 to vector<8x128xf32>
    %696 = arith.mulf %695, %694 : vector<8x128xf32>
    %cst_318 = arith.constant -1.45315206 : f32
    %697 = vector.broadcast %cst_318 : f32 to vector<8x128xf32>
    %698 = arith.addf %696, %697 : vector<8x128xf32>
    %699 = arith.mulf %698, %694 : vector<8x128xf32>
    %cst_319 = arith.constant 1.42141378 : f32
    %700 = vector.broadcast %cst_319 : f32 to vector<8x128xf32>
    %701 = arith.addf %699, %700 : vector<8x128xf32>
    %702 = arith.mulf %701, %694 : vector<8x128xf32>
    %cst_320 = arith.constant -0.284496725 : f32
    %703 = vector.broadcast %cst_320 : f32 to vector<8x128xf32>
    %704 = arith.addf %702, %703 : vector<8x128xf32>
    %705 = arith.mulf %704, %694 : vector<8x128xf32>
    %cst_321 = arith.constant 0.254829586 : f32
    %706 = vector.broadcast %cst_321 : f32 to vector<8x128xf32>
    %707 = arith.addf %705, %706 : vector<8x128xf32>
    %708 = arith.mulf %707, %694 : vector<8x128xf32>
    %cst_322 = arith.constant 0.000000e+00 : f32
    %709 = vector.broadcast %cst_322 : f32 to vector<8x128xf32>
    %710 = arith.subf %709, %689 : vector<8x128xf32>
    %711 = arith.mulf %710, %689 : vector<8x128xf32>
    %712 = math.exp %711 : vector<8x128xf32>
    %713 = arith.mulf %708, %712 : vector<8x128xf32>
    %cst_323 = arith.constant 1.000000e+00 : f32
    %714 = vector.broadcast %cst_323 : f32 to vector<8x128xf32>
    %715 = arith.subf %714, %713 : vector<8x128xf32>
    %cst_324 = arith.constant 0.000000e+00 : f32
    %716 = vector.broadcast %cst_324 : f32 to vector<8x128xf32>
    %717 = arith.cmpf oge, %688, %716 : vector<8x128xf32>
    %cst_325 = arith.constant 0.000000e+00 : f32
    %718 = vector.broadcast %cst_325 : f32 to vector<8x128xf32>
    %719 = arith.subf %718, %715 : vector<8x128xf32>
    %720 = arith.select %717, %715, %719 : vector<8x128xi1>, vector<8x128xf32>
    %cst_326 = arith.constant 1.000000e+00 : f32
    %721 = vector.broadcast %cst_326 : f32 to vector<8x128xf32>
    %722 = arith.addf %721, %720 : vector<8x128xf32>
    %723 = arith.mulf %686, %722 : vector<8x128xf32>
    %c3_327 = arith.constant 3 : index
    %c0_328 = arith.constant 0 : index
    %c0_329 = arith.constant 0 : index
    %724 = vector.load %arg14[%c3_327, %c0_328, %c0_329] : memref<4x128x64xbf16, #tpu.memory_space<vmem>>, vector<1x128x64xbf16>
    %725 = vector.shape_cast %724 : vector<1x128x64xbf16> to vector<128x64xbf16>
    %c3_330 = arith.constant 3 : index
    %c0_331 = arith.constant 0 : index
    %c0_332 = arith.constant 0 : index
    %726 = vector.load %arg15[%c3_330, %c0_331, %c0_332] : memref<4x1x64xf32, #tpu.memory_space<vmem>>, vector<1x1x64xf32>
    %727 = vector.shape_cast %726 : vector<1x1x64xf32> to vector<1x64xf32>
    %728 = arith.extf %725 : vector<128x64xbf16> to vector<128x64xf32>
    %cst_333 = arith.constant dense<0.000000e+00> : vector<8x64xf32>
    %729 = tpu.matmul %723, %728, %cst_333 {dimension_numbers = #tpu.dot_dimension_numbers<[1], [0], [0], [1], [0, 0, 1, 1], [], []>} : vector<8x128xf32>, vector<128x64xf32>, vector<8x64xf32> -> vector<8x64xf32>
    %730 = vector.broadcast %727 : vector<1x64xf32> to vector<8x64xf32>
    %731 = arith.addf %729, %730 : vector<8x64xf32>
    %732 = tpu.concatenate %284, %433, %582, %731 in 1 : vector<8x64xf32>, vector<8x64xf32>, vector<8x64xf32>, vector<8x64xf32> -> vector<8x256xf32>
    %c0_334 = arith.constant 0 : index
    %c0_335 = arith.constant 0 : index
    %733 = vector.load %arg16[%c0_334, %c0_335] : memref<8x256xf32, #tpu.memory_space<vmem>>, vector<8x256xf32>
    tpu.vector_store %arg16[%c0_334, %c0_335], %732 {strides = array<i32>} : memref<8x256xf32, #tpu.memory_space<vmem>>, vector<8x256xf32>,
    return
  }
  func.func @transform_0(%arg0: i32) -> (i32, i32) {
    %c0_i32 = arith.constant 0 : i32
    %c0_i32_0 = arith.constant 0 : i32
    return %arg0, %c0_i32 : i32, i32
  }
  func.func @transform_1(%arg0: i32) -> (i32, i32) {
    %c0_i32 = arith.constant 0 : i32
    %c0_i32_0 = arith.constant 0 : i32
    %c0_i32_1 = arith.constant 0 : i32
    return %c0_i32, %c0_i32_0 : i32, i32
  }
  func.func @transform_2(%arg0: i32) -> (i32, i32) {
    %c0_i32 = arith.constant 0 : i32
    %c0_i32_0 = arith.constant 0 : i32
    %c0_i32_1 = arith.constant 0 : i32
    return %c0_i32, %c0_i32_0 : i32, i32
  }
  func.func @transform_3(%arg0: i32) -> (i32, i32) {
    %c0_i32 = arith.constant 0 : i32
    %c0_i32_0 = arith.constant 0 : i32
    %c0_i32_1 = arith.constant 0 : i32
    return %c0_i32, %c0_i32_0 : i32, i32
  }
  func.func @transform_4(%arg0: i32) -> (i32, i32) {
    %c0_i32 = arith.constant 0 : i32
    %c0_i32_0 = arith.constant 0 : i32
    %c0_i32_1 = arith.constant 0 : i32
    return %c0_i32, %c0_i32_0 : i32, i32
  }
  func.func @transform_5(%arg0: i32) -> (i32, i32) {
    %c0_i32 = arith.constant 0 : i32
    %c0_i32_0 = arith.constant 0 : i32
    %c0_i32_1 = arith.constant 0 : i32
    return %c0_i32, %c0_i32_0 : i32, i32
  }
  func.func @transform_6(%arg0: i32) -> (i32, i32) {
    %c0_i32 = arith.constant 0 : i32
    %c0_i32_0 = arith.constant 0 : i32
    %c0_i32_1 = arith.constant 0 : i32
    return %c0_i32, %c0_i32_0 : i32, i32
  }
  func.func @transform_7(%arg0: i32) -> (i32, i32, i32) {
    %c0_i32 = arith.constant 0 : i32
    %c0_i32_0 = arith.constant 0 : i32
    %c0_i32_1 = arith.constant 0 : i32
    %c0_i32_2 = arith.constant 0 : i32
    return %c0_i32, %c0_i32_0, %c0_i32_1 : i32, i32, i32
  }
  func.func @transform_8(%arg0: i32) -> (i32, i32, i32) {
    %c0_i32 = arith.constant 0 : i32
    %c0_i32_0 = arith.constant 0 : i32
    %c0_i32_1 = arith.constant 0 : i32
    %c0_i32_2 = arith.constant 0 : i32
    return %c0_i32, %c0_i32_0, %c0_i32_1 : i32, i32, i32
  }
  func.func @transform_9(%arg0: i32) -> (i32, i32, i32) {
    %c0_i32 = arith.constant 0 : i32
    %c0_i32_0 = arith.constant 0 : i32
    %c0_i32_1 = arith.constant 0 : i32
    %c0_i32_2 = arith.constant 0 : i32
    return %c0_i32, %c0_i32_0, %c0_i32_1 : i32, i32, i32
  }
  func.func @transform_10(%arg0: i32) -> (i32, i32, i32) {
    %c0_i32 = arith.constant 0 : i32
    %c0_i32_0 = arith.constant 0 : i32
    %c0_i32_1 = arith.constant 0 : i32
    %c0_i32_2 = arith.constant 0 : i32
    return %c0_i32, %c0_i32_0, %c0_i32_1 : i32, i32, i32
  }
  func.func @transform_11(%arg0: i32) -> (i32, i32, i32) {
    %c0_i32 = arith.constant 0 : i32
    %c0_i32_0 = arith.constant 0 : i32
    %c0_i32_1 = arith.constant 0 : i32
    %c0_i32_2 = arith.constant 0 : i32
    return %c0_i32, %c0_i32_0, %c0_i32_1 : i32, i32, i32
  }
  func.func @transform_12(%arg0: i32) -> (i32, i32, i32) {
    %c0_i32 = arith.constant 0 : i32
    %c0_i32_0 = arith.constant 0 : i32
    %c0_i32_1 = arith.constant 0 : i32
    %c0_i32_2 = arith.constant 0 : i32
    return %c0_i32, %c0_i32_0, %c0_i32_1 : i32, i32, i32
  }
  func.func @transform_13(%arg0: i32) -> (i32, i32, i32) {
    %c0_i32 = arith.constant 0 : i32
    %c0_i32_0 = arith.constant 0 : i32
    %c0_i32_1 = arith.constant 0 : i32
    %c0_i32_2 = arith.constant 0 : i32
    return %c0_i32, %c0_i32_0, %c0_i32_1 : i32, i32, i32
  }
  func.func @transform_14(%arg0: i32) -> (i32, i32, i32) {
    %c0_i32 = arith.constant 0 : i32
    %c0_i32_0 = arith.constant 0 : i32
    %c0_i32_1 = arith.constant 0 : i32
    %c0_i32_2 = arith.constant 0 : i32
    return %c0_i32, %c0_i32_0, %c0_i32_1 : i32, i32, i32
  }
  func.func @transform_15(%arg0: i32) -> (i32, i32) {
    %c0_i32 = arith.constant 0 : i32
    %c0_i32_0 = arith.constant 0 : i32
    return %arg0, %c0_i32 : i32, i32
  }
}

</mosaic_0001>

<bundles_post_ra>
// kernel: tpu_custom_call.1
= control target key start
LH: loop header
LB: loop body
LE: loop exit
PB: predicated region body
PF: predicated region fallthrough
CT: control target
= control target key end

     0   :  { %20 = vsyncpa [#allocation3], 0  ;;  %s5500_s0 = inlined_call_operand.hbm [shape: f32[8,32], index: 0, kind: input, shape index: {}]   ;;  %s5501_s1 = inlined_call_operand.hbm [shape: bf16[32,256], index: 1, kind: input, shape index: {}]   ;;  %s5502_s2 = inlined_call_operand.hbm [shape: f32[1,256], index: 2, kind: input, shape index: {}]   ;;  %s5503_s3 = inlined_call_operand.vmem [shape: bf16[256,256], index: 3, kind: input, shape index: {}]   ;;  %s5504_s4 = inlined_call_operand.hbm [shape: f32[1,256], index: 4, kind: input, shape index: {}]   ;;  %s5505_s5 = inlined_call_operand.vmem [shape: bf16[256,128], index: 5, kind: input, shape index: {}]   ;;  %s5506_s6 = inlined_call_operand.hbm [shape: f32[1,128], index: 6, kind: input, shape index: {}]   ;;  %s5507_s7 = inlined_call_operand.hbm [shape: bf16[4,128,128], index: 7, kind: input, shape index: {}]   ;;  %s5508_s8 = inlined_call_operand.vmem [shape: f32[4,1,128], index: 8, kind: input, shape index: {}]   ;;  %s5509_s9 = inlined_call_operand.hbm [shape: bf16[4,128,128], index: 9, kind: input, shape index: {}]   ;;  %s5510_s10 = inlined_call_operand.vmem [shape: f32[4,1,128], index: 10, kind: input, shape index: {}]   ;;  %s5511_s11 = inlined_call_operand.hbm [shape: bf16[4,128,128], index: 11, kind: input, shape index: {}]   ;;  %s5512_s12 = inlined_call_operand.vmem [shape: f32[4,1,128], index: 12, kind: input, shape index: {}]   ;;  %s5513_s13 = inlined_call_operand.vmem [shape: bf16[4,128,64], index: 13, kind: input, shape index: {}]   ;;  %s5514_s14 = inlined_call_operand.vmem [shape: f32[4,1,64], index: 14, kind: input, shape index: {}]   ;;  %s5515_s15 = inlined_call_operand.hbm [shape: f32[8,256], index: 15, kind: output, shape index: {}]  }
   0x1   :  { %21 = vsyncpa [#allocation6], 0 }
   0x2   :  { %22 = vsyncpa [#allocation9], 0 }
   0x3   :  { %23 = vsyncpa [#allocation12], 0 }
   0x4   :  { %24 = vsyncpa [#allocation15], 0 }
   0x5   :  { %25 = vsyncpa [#allocation4], 0  ;;  %s4740_s18 = smov [#allocation5]  }
   0x6   :  { %s41_s19 = sshll.u32 %s4740_s18, 4  ;;  %s42_s19 = int_to_ptr.vmem [resolvable:$true] %s41_s19 }
   0x7   :  { %s4556_s20 = scalar_lea.vmem %s42_s19, 512  ;;  %p4561_p1 = scmp.lt.s32.totalorder %s42_s19, %s42_s19 }
   0x8   :  { %p4557_p0 = scmp.ne.s32.totalorder %s42_s19, %s4556_s20  ;;  %p4562_p2 = scmp.lt.s32.totalorder %s4556_s20, %s4556_s20 }
   0xa   :  { %p4563_p3 = por %p4562_p2, %p4561_p1 }
   0xc   :  { %p4564_p4 = pnand %p4563_p3, %p4557_p0 }
   0xe   :  { %4567 = shalt.err (!%p4564_p4)
}
   0xf   :  { %s4741_s21 = smov 128   ;;  %s4742_s22 = smov 8  }
  0x10   :  { %47 = dma.hbm_to_vmem [thread:$0]  %s5501_s1, 512, %s42_s19, [#allocation6], %s4741_s21, %s4741_s21, %s4742_s22  }
  0x11   :  { %s4743_s25 = smov [#allocation8]   ;;  %s4744_s27 = smov [#allocation11]  }
  0x12   :  { %s66_s26 = sshll.u32 %s4743_s25, 4  ;;  %s87_s28 = sshll.u32 %s4744_s27, 4  ;;  %s67_s26 = int_to_ptr.vmem [resolvable:$true] %s66_s26  ;;  %s88_s28 = int_to_ptr.vmem [resolvable:$true] %s87_s28 }
  0x13   :  { %s4576_s29 = scalar_lea.vmem %s67_s26, 32  ;;  %p4581_p6 = scmp.lt.s32.totalorder %s67_s26, %s67_s26 }
  0x14   :  { %p4577_p5 = scmp.ne.s32.totalorder %s67_s26, %s4576_s29  ;;  %p4582_p7 = scmp.lt.s32.totalorder %s4576_s29, %s4576_s29 }
  0x16   :  { %p4583_p8 = por %p4582_p7, %p4581_p6 }
  0x18   :  { %p4584_p9 = pnand %p4583_p8, %p4577_p5 }
  0x1a   :  { %4587 = shalt.err (!%p4584_p9)
}
  0x1b   :  { %69 = dma.hbm_to_vmem [thread:$0]  %s5504_s4, 32, %s67_s26, [#allocation9]  }
  0x1c   :  { %s4596_s17 = scalar_lea.vmem %s88_s28, 4096  ;;  %p4601_p11 = scmp.lt.s32.totalorder %s88_s28, %s88_s28 }
  0x1d   :  { %p4597_p10 = scmp.ne.s32.totalorder %s88_s28, %s4596_s17  ;;  %p4602_p12 = scmp.lt.s32.totalorder %s4596_s17, %s4596_s17 }
  0x1f   :  { %p4603_p13 = por %p4602_p12, %p4601_p11 }
  0x21   :  { %p4604_p0 = pnand %p4603_p13, %p4597_p10 }
  0x23   :  { %4607 = shalt.err (!%p4604_p0)
}
  0x24   :  { %s4745_s1 = smov 64   ;;  %s4746_s18 = smov 4  }
  0x25   :  { %93 = dma.hbm_to_vmem [thread:$0]  %s5507_s7, 4096, %s88_s28, [#allocation12], %s4745_s1, %s4745_s1, %s4746_s18  }
  0x26   :  { %s4747_s21 = smov [#allocation2]   ;;  %s4748_s4 = smov [#allocation7]  }
  0x27   :  { %s32_s22 = sshll.u32 %s4747_s21, 4  ;;  %s54_s23 = sshll.u32 %s4748_s4, 4  ;;  %s33_s22 = int_to_ptr.vmem [resolvable:$true] %s32_s22  ;;  %s55_s23 = int_to_ptr.vmem [resolvable:$true] %s54_s23 }
  0x28   :  { %s4616_s24 = scalar_lea.vmem %s33_s22, 128  ;;  %p4621_p2 = scmp.lt.s32.totalorder %s33_s22, %s33_s22 }
  0x29   :  { %p4617_p1 = scmp.ne.s32.totalorder %s33_s22, %s4616_s24  ;;  %p4622_p3 = scmp.lt.s32.totalorder %s4616_s24, %s4616_s24 }
  0x2b   :  { %p4623_p4 = por %p4622_p3, %p4621_p2 }
  0x2d   :  { %p4624_p5 = pnand %p4623_p4, %p4617_p1 }
  0x2f   :  { %4627 = shalt.err (!%p4624_p5)
}
  0x30   :  { %35 = dma.hbm_to_vmem [thread:$0]  %s5500_s0, 128, %s33_s22, [#allocation3]  }
  0x31   :  { %s4636_s27 = scalar_lea.vmem %s55_s23, 32  ;;  %p4641_p7 = scmp.lt.s32.totalorder %s55_s23, %s55_s23 }
  0x32   :  { %p4637_p6 = scmp.ne.s32.totalorder %s55_s23, %s4636_s27  ;;  %p4642_p8 = scmp.lt.s32.totalorder %s4636_s27, %s4636_s27 }
  0x34   :  { %p4643_p9 = por %p4642_p8, %p4641_p7 }
  0x36   :  { %p4644_p10 = pnand %p4643_p9, %p4637_p6 }
  0x38   :  { %4647 = shalt.err (!%p4644_p10)
}
  0x39   :  { %57 = dma.hbm_to_vmem [thread:$0]  %s5502_s2, 32, %s55_s23, [#allocation6]  }
  0x3a   :  { %s4749_s29 = smov [#allocation10]   ;;  %s4750_s16 = smov [#allocation13]  }
  0x3b   :  { %s78_s30 = sshll.u32 %s4749_s29, 4  ;;  %s101_s17 = sshll.u32 %s4750_s16, 4  ;;  %s79_s30 = int_to_ptr.vmem [resolvable:$true] %s78_s30  ;;  %s102_s17 = int_to_ptr.vmem [resolvable:$true] %s101_s17 }
  0x3c   :  { %s4656_s19 = scalar_lea.vmem %s79_s30, 16  ;;  %s4660_s0 = scalar_lea.vmem %s79_s30, 32 }
  0x3d   :  { %p4657_p11 = scmp.ne.s32.totalorder %s79_s30, %s4656_s19  ;;  %p4661_p12 = scmp.lt.s32.totalorder %s79_s30, %s79_s30 }
  0x3e   :  { %p4662_p13 = scmp.lt.s32.totalorder %s4660_s0, %s4656_s19 }
  0x40   :  { %p4663_p0 = por %p4662_p13, %p4661_p12 }
  0x42   :  { %p4664_p1 = pnand %p4663_p0, %p4657_p11 }
  0x44   :  { %4667 = shalt.err (!%p4664_p1)
}
  0x45   :  { %81 = dma.hbm_to_vmem [thread:$0]  %s5506_s6, 16, %s79_s30, [#allocation9]  }
  0x46   :  { %s4676_s22 = scalar_lea.vmem %s102_s17, 4096  ;;  %p4681_p3 = scmp.lt.s32.totalorder %s102_s17, %s102_s17 }
  0x47   :  { %p4677_p2 = scmp.ne.s32.totalorder %s102_s17, %s4676_s22  ;;  %p4682_p4 = scmp.lt.s32.totalorder %s4676_s22, %s4676_s22 }
  0x49   :  { %p4683_p5 = por %p4682_p4, %p4681_p3 }
  0x4b   :  { %p4684_p6 = pnand %p4683_p5, %p4677_p2 }
  0x4d   :  { %4687 = shalt.err (!%p4684_p6)
}
  0x4e   :  { %107 = dma.hbm_to_vmem [thread:$0]  %s5509_s9, 4096, %s102_s17, [#allocation12], %s4745_s1, %s4745_s1, %s4746_s18  }
  0x4f   :  { %s4751_s23 = smov [#allocation14]  }
  0x50   :  { %s115_s24 = sshll.u32 %s4751_s23, 4  ;;  %s116_s24 = int_to_ptr.vmem [resolvable:$true] %s115_s24 }
  0x51   :  { %s4696_s25 = scalar_lea.vmem %s116_s24, 4096  ;;  %p4701_p8 = scmp.lt.s32.totalorder %s116_s24, %s116_s24 }
  0x52   :  { %p4697_p7 = scmp.ne.s32.totalorder %s116_s24, %s4696_s25  ;;  %p4702_p9 = scmp.lt.s32.totalorder %s4696_s25, %s4696_s25 }
  0x54   :  { %p4703_p10 = por %p4702_p9, %p4701_p8 }
  0x56   :  { %p4704_p11 = pnand %p4703_p10, %p4697_p7 }
  0x58   :  { %4707 = shalt.err (!%p4704_p11)
}
  0x59   :  { %121 = dma.hbm_to_vmem [thread:$0]  %s5511_s11, 4096, %s116_s24, [#allocation15], %s4745_s1, %s4745_s1, %s4746_s18  }
  0x5a   :  { %4728 = dma.done.wait [#allocation3], 128  }
  0x5b   :  { %4729 = vsyncadd [#allocation3], 4294967168 }
  0x5c   :  { %4730 = dma.done.wait [#allocation6], 544  }
  0x5d   :  { %4731 = vsyncadd [#allocation6], 4294966752 }
  0x5e   :  { %4732 = dma.done.wait [#allocation9], 48  }
  0x5f   :  { %4733 = vsyncadd [#allocation9], 4294967248 }
  0x60   :  { %4734 = dma.done.wait [#allocation12], 8192  }
  0x61   :  { %4735 = vsyncadd [#allocation12], 4294959104 }
  0x62   :  { %4736 = dma.done.wait [#allocation15], 4096  }
  0x63   :  { %4737 = vsyncadd [#allocation15], 4294963200  ;;  %v4752_v0 = vmov 0.0   ;;  %v156_v1 = vld [vmem:[#allocation5 + $0x18] sm:$0xff]  ;;  %v155_v2 = vld [vmem:[#allocation5 + $0x10] sm:$0xff]  ;;  %vm177_vm0 = vcmask 261120  }
  0x64   :  { %245 = vmatprep.mubr.f32.mxu0 %v4752_v0  ;;  %v154_v3 = vld [vmem:[#allocation5 + $0x8] sm:$0xff]  ;;  %v165_v4 = vunpack.c.h.bf16 %v156_v1  ;;  %v164_v5 = vunpack.c.l.bf16 %v156_v1  ;;  %v163_v6 = vunpack.c.h.bf16 %v155_v2  ;;  %v319_v7 = vld [vmem:[%s5503_s3 + $0x78] sm:$0xff]  ;;  %v162_v8 = vunpack.c.l.bf16 %v155_v2  ;;  %v153_v9 = vld [vmem:[#allocation5] sm:$0xff]  ;;  %s4754_s18 = smov [#allocation16]  }
  0x65   :  { %v318_v10 = vld [vmem:[%s5503_s3 + $0x70] sm:$0xff]  ;;  %v317_v11 = vld [vmem:[%s5503_s3 + $0x68] sm:$0xff]  ;;  %v161_v12 = vunpack.c.h.bf16 %v154_v3  ;;  %v368_v13 = vunpack.c.h.bf16 %v319_v7  ;;  %v367_v14 = vunpack.c.l.bf16 %v319_v7  ;;  %v160_v16 = vunpack.c.l.bf16 %v154_v3  ;;  %v316_v18 = vld [vmem:[%s5503_s3 + $0x60] sm:$0xff]  ;;  %s2801_s27 = sshll.u32 %s4754_s18, 4  ;;  %s2802_s27 = int_to_ptr.vmem [resolvable:$true] %s2801_s27 }
  0x66   :  { %205 = vmatprep.subr.mxu0 %v165_v4  ;;  %v366_v15 = vunpack.c.h.bf16 %v318_v10  ;;  %v365_v17 = vunpack.c.l.bf16 %v318_v10  ;;  %v159_v19 = vunpack.c.h.bf16 %v153_v9  ;;  %v364_v20 = vunpack.c.h.bf16 %v317_v11  ;;  %v152_v24 = vld [vmem:[#allocation2] sm:$0xff]  ;;  %v315_v26 = vld [vmem:[%s5503_s3 + $0x58] sm:$0xff]  ;;  %v314_v29 = vld [vmem:[%s5503_s3 + $0x50] sm:$0xff]  ;;  %s4708_s7 = scalar_lea.vmem %s2802_s27, 256  ;;  %p4713_p13 = scmp.lt.s32.totalorder %s2802_s27, %s2802_s27 }
  0x67   :  { %206 = vmatpush1.msra.mxu0 %v164_v5  ;;  %412 = vmatprep.subr.mxu1 %v368_v13  ;;  %v158_v21 = vunpack.c.l.bf16 %v153_v9  ;;  %v363_v22 = vunpack.c.l.bf16 %v317_v11  ;;  %v362_v23 = vunpack.c.h.bf16 %v316_v18  ;;  %v361_v25 = vunpack.c.l.bf16 %v316_v18  ;;  %v313_v32 = vld [vmem:[%s5503_s3 + $0x48] sm:$0xff]  ;;  %v312_v35 = vld [vmem:[%s5503_s3 + $0x40] sm:$0xff]  ;;  %v311_v38 = vld [vmem:[%s5503_s3 + $0x38] sm:$0xff]  ;;  %p4709_p12 = scmp.ne.s32.totalorder %s2802_s27, %s4708_s7  ;;  %p4714_p0 = scmp.lt.s32.totalorder %s4708_s7, %s4708_s7 }
  0x68   :  { %207 = vmatprep.subr.mxu0 %v163_v6  ;;  %413 = vmatpush1.msra.mxu1 %v367_v14  ;;  %v360_v27 = vunpack.c.h.bf16 %v315_v26  ;;  %v359_v28 = vunpack.c.l.bf16 %v315_v26  ;;  %v358_v30 = vunpack.c.h.bf16 %v314_v29  ;;  %v357_v31 = vunpack.c.l.bf16 %v314_v29  ;;  %v310_v41 = vld [vmem:[%s5503_s3 + $0x30] sm:$0xff]  ;;  %v309_v44 = vld [vmem:[%s5503_s3 + $0x28] sm:$0xff]  ;;  %v308_v47 = vld [vmem:[%s5503_s3 + $0x20] sm:$0xff] }
  0x69   :  { %208 = vmatpush1.msra.mxu0 %v162_v8  ;;  %414 = vmatprep.subr.mxu1 %v366_v15  ;;  %v356_v33 = vunpack.c.h.bf16 %v313_v32  ;;  %v355_v34 = vunpack.c.l.bf16 %v313_v32  ;;  %v354_v36 = vunpack.c.h.bf16 %v312_v35  ;;  %v353_v37 = vunpack.c.l.bf16 %v312_v35  ;;  %v307_v50 = vld [vmem:[%s5503_s3 + $0x18] sm:$0xff]  ;;  %v306_v51 = vld [vmem:[%s5503_s3 + $0x10] sm:$0xff]  ;;  %v305_v52 = vld [vmem:[%s5503_s3 + $0x8] sm:$0xff]  ;;  %p4715_p1 = por %p4714_p0, %p4713_p13 }
  0x6a   :  { %209 = vmatprep.subr.mxu0 %v161_v12  ;;  %415 = vmatpush1.msra.mxu1 %v365_v17  ;;  %v352_v39 = vunpack.c.h.bf16 %v311_v38  ;;  %v351_v40 = vunpack.c.l.bf16 %v311_v38  ;;  %v350_v42 = vunpack.c.h.bf16 %v310_v41  ;;  %v349_v43 = vunpack.c.l.bf16 %v310_v41  ;;  %v304_v57 = vld [vmem:[%s5503_s3] sm:$0xff]  ;;  %v335_v60 = vld [vmem:[%s5503_s3 + $0xf8] sm:$0xff]  ;;  %v334_v63 = vld [vmem:[%s5503_s3 + $0xf0] sm:$0xff] }
  0x6b   :  { %210 = vmatpush1.msra.mxu0 %v160_v16  ;;  %416 = vmatprep.subr.mxu1 %v364_v20  ;;  %v348_v45 = vunpack.c.h.bf16 %v309_v44  ;;  %v347_v46 = vunpack.c.l.bf16 %v309_v44  ;;  %v346_v48 = vunpack.c.h.bf16 %v308_v47  ;;  %v345_v49 = vunpack.c.l.bf16 %v308_v47  ;;  %v333_v3 = vld [vmem:[%s5503_s3 + $0xe8] sm:$0xff]  ;;  %v332_v6 = vld [vmem:[%s5503_s3 + $0xe0] sm:$0xff]  ;;  %v331_v9 = vld [vmem:[%s5503_s3 + $0xd8] sm:$0xff]  ;;  %p4716_p2 = pnand %p4715_p1, %p4709_p12 }
  0x6c   :  { %211 = vmatprep.subr.mxu0 %v159_v19  ;;  %417 = vmatpush1.msra.mxu1 %v363_v22  ;;  %v344_v53 = vunpack.c.h.bf16 %v307_v50  ;;  %v343_v54 = vunpack.c.l.bf16 %v307_v50  ;;  %v342_v55 = vunpack.c.h.bf16 %v306_v51  ;;  %v341_v56 = vunpack.c.l.bf16 %v306_v51  ;;  %v330_v12 = vld [vmem:[%s5503_s3 + $0xd0] sm:$0xff]  ;;  %v329_v15 = vld [vmem:[%s5503_s3 + $0xc8] sm:$0xff]  ;;  %v328_v18 = vld [vmem:[%s5503_s3 + $0xc0] sm:$0xff] }
  0x6d   :  { %212 = vmatpush1.msra.mxu0 %v158_v21  ;;  %418 = vmatprep.subr.mxu1 %v362_v23  ;;  %v340_v58 = vunpack.c.h.bf16 %v305_v52  ;;  %v339_v59 = vunpack.c.l.bf16 %v305_v52  ;;  %v338_v61 = vunpack.c.h.bf16 %v304_v57  ;;  %v337_v62 = vunpack.c.l.bf16 %v304_v57  ;;  %v327_v21 = vld [vmem:[%s5503_s3 + $0xb8] sm:$0xff]  ;;  %v157_v50 = vld [vmem:[#allocation7] sm:$0x3] }
  0x6e   :  { %2814 = vmatmul.mubr.msk.f32.vlgmr.msra.gmra.mxu0 %vm177_vm0, %v152_v24  ;;  %419 = vmatpush1.msra.mxu1 %v361_v25  ;;  %v400_v1 = vunpack.c.h.bf16 %v335_v60  ;;  %v399_v2 = vunpack.c.l.bf16 %v335_v60  ;;  %v398_v4 = vunpack.c.h.bf16 %v334_v63  ;;  %v397_v5 = vunpack.c.l.bf16 %v334_v63  ;;  %v326_v24 = vld [vmem:[%s5503_s3 + $0xb0] sm:$0xff] }
  0x6f   :  { %420 = vmatprep.subr.mxu1 %v360_v27  ;;  %v396_v7 = vunpack.c.h.bf16 %v333_v3  ;;  %v395_v8 = vunpack.c.l.bf16 %v333_v3  ;;  %v394_v10 = vunpack.c.h.bf16 %v332_v6  ;;  %v393_v11 = vunpack.c.l.bf16 %v332_v6  ;;  %v325_v27 = vld [vmem:[%s5503_s3 + $0xa8] sm:$0xff] }
  0x70   :  { %421 = vmatpush1.msra.mxu1 %v359_v28  ;;  %v392_v13 = vunpack.c.h.bf16 %v331_v9  ;;  %v391_v14 = vunpack.c.l.bf16 %v331_v9  ;;  %v390_v16 = vunpack.c.h.bf16 %v330_v12  ;;  %v389_v17 = vunpack.c.l.bf16 %v330_v12 }
  0x71   :  { %422 = vmatprep.subr.mxu1 %v358_v30  ;;  %v388_v19 = vunpack.c.h.bf16 %v329_v15  ;;  %v387_v20 = vunpack.c.l.bf16 %v329_v15  ;;  %v386_v22 = vunpack.c.h.bf16 %v328_v18  ;;  %v385_v23 = vunpack.c.l.bf16 %v328_v18  ;;  %v324_v30 = vld [vmem:[%s5503_s3 + $0xa0] sm:$0xff] }
  0x72   :  { %423 = vmatpush1.msra.mxu1 %v357_v31  ;;  %v384_v25 = vunpack.c.h.bf16 %v327_v21  ;;  %v383_v26 = vunpack.c.l.bf16 %v327_v21  ;;  %v382_v28 = vunpack.c.h.bf16 %v326_v24  ;;  %v381_v29 = vunpack.c.l.bf16 %v326_v24 }
  0x73   :  { %424 = vmatprep.subr.mxu1 %v356_v33  ;;  %v380_v31 = vunpack.c.h.bf16 %v325_v27  ;;  %v379_v32 = vunpack.c.l.bf16 %v325_v27  ;;  %v323_v33 = vld [vmem:[%s5503_s3 + $0x98] sm:$0xff]  ;;  %v377_v35 = vunpack.c.l.bf16 %v324_v30  ;;  %v167_v47 = vlaneseq }
  0x74   :  { %425 = vmatpush1.msra.mxu1 %v355_v34  ;;  %v378_v34 = vunpack.c.h.bf16 %v324_v30  ;;  %v375_v38 = vunpack.c.l.bf16 %v323_v33  ;;  %vm4753_vm5 = vmmov 0   ;;  %vm2790_vm15 = vcmask 523264  }
  0x75   :  { %426 = vmatprep.subr.mxu1 %v354_v36  ;;  %v322_v36 = vld [vmem:[%s5503_s3 + $0x90] sm:$0xff] }
  0x76   :  { %427 = vmatpush1.msra.mxu1 %v353_v37  ;;  %v376_v37 = vunpack.c.h.bf16 %v323_v33  ;;  %v373_v41 = vunpack.c.l.bf16 %v322_v36 }
  0x77   :  { %428 = vmatprep.subr.mxu1 %v352_v39  ;;  %v321_v39 = vld [vmem:[%s5503_s3 + $0x88] sm:$0xff] }
  0x78   :  { %429 = vmatpush1.msra.mxu1 %v351_v40  ;;  %v374_v40 = vunpack.c.h.bf16 %v322_v36  ;;  %v371_v44 = vunpack.c.l.bf16 %v321_v39 }
  0x79   :  { %430 = vmatprep.subr.mxu1 %v350_v42  ;;  %v320_v42 = vld [vmem:[%s5503_s3 + $0x80] sm:$0xff] }
  0x7a   :  { %431 = vmatpush1.msra.mxu1 %v349_v43  ;;  %v372_v43 = vunpack.c.h.bf16 %v321_v39 }
  0x7b   :  { %432 = vmatprep.subr.mxu1 %v348_v45  ;;  %v370_v45 = vunpack.c.h.bf16 %v320_v42 }
  0x7c   :  { %433 = vmatpush1.msra.mxu1 %v347_v46  ;;  %v369_v46 = vunpack.c.l.bf16 %v320_v42 }
  0x7d   :  { %434 = vmatprep.subr.mxu1 %v346_v48  ;;  %v4966_v48 = vshrl.u32 %v167_v47, 7  ;;  %v3474_v47 = vld [vmem:[%s5505_s5 + $0x38] sm:$0xff]  }
  0x7e   :  { %435 = vmatpush1.msra.mxu1 %v345_v49 }
  0x7f   :  { %436 = vmatprep.subr.mxu1 %v344_v53  ;;  %v169_v49 = vsub.s32 0, %v4966_v48  ;;  %v173_v51 = vsub.s32 1, %v4966_v48 }
  0x80   :  { %437 = vmatpush1.msra.mxu1 %v343_v54 }
  0x81   :  { %438 = vmatprep.subr.mxu1 %v342_v55  ;;  %v170_v52 = vrot.slane %v157_v50, %v169_v49  ;;  %v174_v53 = vrot.slane %v157_v50, %v173_v51  ;;  %v2923_v50 = vunpack.c.h.bf16 %v3474_v47 }
  0x82   :  { %439 = vmatpush1.msra.mxu1 %v341_v56 }
  0x83   :  { %440 = vmatprep.subr.mxu1 %v340_v58 }
  0x84   :  { %441 = vmatpush1.msra.mxu1 %v339_v59 }
  0x85   :  { %442 = vmatprep.subr.mxu1 %v338_v61 }
  0x86   :  { %443 = vmatpush1.msra.mxu1 %v337_v62 }
  0x87   :  { %444 = vmatprep.subr.mxu1 %v400_v1 }
  0x88   :  { %445 = vmatpush2.msra.mxu1 %v399_v2 }
  0x89   :  { %446 = vmatprep.subr.mxu1 %v398_v4 }
  0x8a   :  { %447 = vmatpush2.msra.mxu1 %v397_v5 }
  0x8b   :  { %448 = vmatprep.subr.mxu1 %v396_v7 }
  0x8c   :  { %449 = vmatpush2.msra.mxu1 %v395_v8 }
  0x8d   :  { %450 = vmatprep.subr.mxu1 %v394_v10 }
  0x8e   :  { %451 = vmatpush2.msra.mxu1 %v393_v11 }
  0x8f   :  { %452 = vmatprep.subr.mxu1 %v392_v13 }
  0x90   :  { %453 = vmatpush2.msra.mxu1 %v391_v14 }
  0x91   :  { %454 = vmatprep.subr.mxu1 %v390_v16 }
  0x92   :  { %455 = vmatpush2.msra.mxu1 %v389_v17 }
  0x93   :  { %456 = vmatprep.subr.mxu1 %v388_v19 }
  0x94   :  { %457 = vmatpush2.msra.mxu1 %v387_v20 }
  0x95   :  { %458 = vmatprep.subr.mxu1 %v386_v22 }
  0x96   :  { %459 = vmatpush2.msra.mxu1 %v385_v23 }
  0x97   :  { %460 = vmatprep.subr.mxu1 %v384_v25 }
  0x98   :  { %461 = vmatpush2.msra.mxu1 %v383_v26 }
  0x99   :  { %462 = vmatprep.subr.mxu1 %v382_v28 }
  0x9a   :  { %463 = vmatpush2.msra.mxu1 %v381_v29 }
  0x9b   :  { %464 = vmatprep.subr.mxu1 %v380_v31 }
  0x9c   :  { %465 = vmatpush2.msra.mxu1 %v379_v32 }
  0x9d   :  { %466 = vmatprep.subr.mxu1 %v378_v34 }
  0x9e   :  { %467 = vmatpush2.msra.mxu1 %v377_v35 }
  0x9f   :  { %468 = vmatprep.subr.mxu1 %v376_v37 }
  0xa0   :  { %469 = vmatpush2.msra.mxu1 %v375_v38 }
  0xa1   :  { %470 = vmatprep.subr.mxu1 %v374_v40 }
  0xa2   :  { %471 = vmatpush2.msra.mxu1 %v373_v41 }
  0xa3   :  { %472 = vmatprep.subr.mxu1 %v372_v43 }
  0xa4   :  { %473 = vmatpush2.msra.mxu1 %v371_v44 }
  0xa5   :  { %474 = vmatprep.subr.mxu1 %v370_v45  ;;  %v3482_v45 = vld [vmem:[%s5505_s5 + $0x78] sm:$0xff]  }
  0xa6   :  { %475 = vmatpush2.msra.mxu1 %v369_v46  ;;  %v2955_v46 = vunpack.c.h.bf16 %v3482_v45 }
  0xa7   :  { %3940 = vmatprep.subr.mxu1 %v4752_v0 }
  0xa8   :  { %3598 = vmatprep.subr.mxu0 %v2955_v46 }
  0xa9   :  { %3599 = vmatpush3.msra.mxu0 %v2923_v50 }
 0x12e   :  { %v247_v54 = vpop.f32.mrf.mxu0 }
 0x12f   :  { %v248_v55 = vadd.f32 %v247_v54, %v170_v52  ;;  %v2954_v52 = vunpack.c.l.bf16 %v3482_v45  ;;  %v3481_v54 = vld [vmem:[%s5505_s5 + $0x70] sm:$0xff]  }
 0x130   :  { %v249_v56 = vpop.f32.mrf.mxu0 }
 0x131   :  { %v254_v57 = vmul.f32 0.70710677, %v248_v55  ;;  %v250_v58 = vadd.f32 %v249_v56, %v174_v53  ;;  %v252_v42 = vmul.f32 0.5, %v248_v55  ;;  %v2922_v53 = vunpack.c.l.bf16 %v3474_v47  ;;  %3600 = vmatprep.subr.mxu0 %v2954_v52  ;;  %v3473_v56 = vld [vmem:[%s5505_s5 + $0x30] sm:$0xff]  }
 0x132   :  { %v2951_v55 = vunpack.c.h.bf16 %v3481_v54 }
 0x133   :  { %v256_v59 = vand.u32 2147483647, %v254_v57  ;;  %v255_v60 = vmul.f32 0.70710677, %v250_v58  ;;  %vm294_vm1 = vcmp.ge.f32.partialorder %v254_v57, 0.0  ;;  %v253_v40 = vmul.f32 0.5, %v250_v58  ;;  %3601 = vmatpush3.msra.mxu0 %v2922_v53 }
 0x134   :  { %v2919_v57 = vunpack.c.h.bf16 %v3473_v56  ;;  %3602 = vmatprep.subr.mxu0 %v2951_v55  ;;  %v2950_v58 = vunpack.c.l.bf16 %v3481_v54 }
 0x135   :  { %v258_v61 = vmul.f32 0.3275911, %v256_v59  ;;  %v257_v62 = vand.u32 2147483647, %v255_v60  ;;  %v282_v3 = vsub.f32 0.0, %v256_v59  ;;  %vm295_vm2 = vcmp.ge.f32.partialorder %v255_v60, 0.0 }
 0x136   :  { %3603 = vmatpush3.msra.mxu0 %v2919_v57  ;;  %v3480_v60 = vld [vmem:[%s5505_s5 + $0x68] sm:$0xff]  }
 0x137   :  { %v260_v63 = vadd.f32 1.0, %v258_v61  ;;  %v259_v1 = vmul.f32 0.3275911, %v257_v62  ;;  %v283_v4 = vsub.f32 0.0, %v257_v62  ;;  %v284_v5 = vmul.f32 %v282_v3, %v256_v59  ;;  %3604 = vmatprep.subr.mxu0 %v2950_v58  ;;  %v3479_v3 = vld [vmem:[%s5505_s5 + $0x60] sm:$0xff]  }
 0x138   :  { %v2918_v59 = vunpack.c.l.bf16 %v3473_v56  ;;  %v2947_v61 = vunpack.c.h.bf16 %v3480_v60 }
 0x139   :  { %4480 = vrcp.f32 %v260_v63  ;;  %v261_v2 = vadd.f32 1.0, %v259_v1  ;;  %v285_v7 = vmul.f32 %v283_v4, %v257_v62  ;;  %v286_v8 = vmul.f32 1.442695, %v284_v5  ;;  %v3472_v62 = vld [vmem:[%s5505_s5 + $0x28] sm:$0xff]   ;;  %v3471_v5 = vld [vmem:[%s5505_s5 + $0x20] sm:$0xff]  }
 0x13a   :  { %3605 = vmatpush3.msra.mxu0 %v2918_v59  ;;  %v2915_v63 = vunpack.c.h.bf16 %v3472_v62  ;;  %v2946_v1 = vunpack.c.l.bf16 %v3480_v60  ;;  %v2943_v4 = vunpack.c.h.bf16 %v3479_v3 }
 0x13b   :  { %4482 = vrcp.f32 %v261_v2  ;;  %v288_v12 = vmul.f32 1.442695, %v285_v7  ;;  %3606 = vmatprep.subr.mxu0 %v2947_v61  ;;  %v2914_v2 = vunpack.c.l.bf16 %v3472_v62  ;;  %v2942_v7 = vunpack.c.l.bf16 %v3479_v3 }
 0x13c   :  { %4484 = vpow2.f32 %v286_v8  ;;  %3607 = vmatpush3.msra.mxu0 %v2915_v63  ;;  %v2910_v8 = vunpack.c.l.bf16 %v3471_v5 }
 0x13d   :  { %4486 = vpow2.f32 %v288_v12  ;;  %3608 = vmatprep.subr.mxu0 %v2946_v1 }
 0x13e   :  { %3609 = vmatpush3.msra.mxu0 %v2914_v2 }
 0x13f   :  { %3610 = vmatprep.subr.mxu0 %v2943_v4 }
 0x146   :  { %v4481_v6 = vpop.eup %4480 }
 0x147   :  { %v264_v9 = vmul.f32 1.0614054, %v4481_v6 }
 0x148   :  { %v4483_v10 = vpop.eup %4482 }
 0x149   :  { %v266_v11 = vadd.f32 -1.4531521, %v264_v9  ;;  %v265_v13 = vmul.f32 1.0614054, %v4483_v10  ;;  %v4485_v27 = vpop.eup %4484  ;;  %v3478_v9 = vld [vmem:[%s5505_s5 + $0x58] sm:$0xff]  }
 0x14a   :  { %v4487_v31 = vpop.eup %4486 }
 0x14b   :  { %v268_v14 = vmul.f32 %v4481_v6, %v266_v11  ;;  %v267_v15 = vadd.f32 -1.4531521, %v265_v13  ;;  %v3470_v11 = vld [vmem:[%s5505_s5 + $0x18] sm:$0xff]   ;;  %v2938_v13 = vunpack.c.l.bf16 %v3478_v9 }
 0x14c   :  { %v2907_v12 = vunpack.c.h.bf16 %v3470_v11 }
 0x14d   :  { %v270_v16 = vadd.f32 1.4214138, %v268_v14  ;;  %v269_v17 = vmul.f32 %v4483_v10, %v267_v15  ;;  %v2906_v14 = vunpack.c.l.bf16 %v3470_v11  ;;  %v3477_v15 = vld [vmem:[%s5505_s5 + $0x50] sm:$0xff]  }
 0x14f   :  { %v272_v18 = vmul.f32 %v4481_v6, %v270_v16  ;;  %v271_v19 = vadd.f32 1.4214138, %v269_v17  ;;  %v2935_v16 = vunpack.c.h.bf16 %v3477_v15  ;;  %v3469_v17 = vld [vmem:[%s5505_s5 + $0x10] sm:$0xff]  }
 0x151   :  { %v274_v20 = vadd.f32 -0.28449672, %v272_v18  ;;  %v273_v21 = vmul.f32 %v4483_v10, %v271_v19  ;;  %v2903_v18 = vunpack.c.h.bf16 %v3469_v17  ;;  %v2934_v19 = vunpack.c.l.bf16 %v3477_v15 }
 0x153   :  { %v276_v22 = vmul.f32 %v4481_v6, %v274_v20  ;;  %v275_v23 = vadd.f32 -0.28449672, %v273_v21  ;;  %v2902_v20 = vunpack.c.l.bf16 %v3469_v17  ;;  %v3476_v21 = vld [vmem:[%s5505_s5 + $0x48] sm:$0xff]  }
 0x155   :  { %v278_v24 = vadd.f32 0.2548296, %v276_v22  ;;  %v277_v25 = vmul.f32 %v4483_v10, %v275_v23  ;;  %v2931_v22 = vunpack.c.h.bf16 %v3476_v21  ;;  %v3468_v23 = vld [vmem:[%s5505_s5 + $0x8] sm:$0xff]  }
 0x157   :  { %v280_v26 = vmul.f32 %v4481_v6, %v278_v24  ;;  %v279_v28 = vadd.f32 0.2548296, %v277_v25  ;;  %v2911_v6 = vunpack.c.h.bf16 %v3471_v5  ;;  %v2899_v24 = vunpack.c.h.bf16 %v3468_v23 }
 0x158   :  { %v2930_v25 = vunpack.c.l.bf16 %v3476_v21 }
 0x159   :  { %v290_v29 = vmul.f32 %v4485_v27, %v280_v26  ;;  %v281_v30 = vmul.f32 %v4483_v10, %v279_v28  ;;  %3611 = vmatpush3.msra.mxu0 %v2911_v6  ;;  %v2939_v10 = vunpack.c.h.bf16 %v3478_v9  ;;  %v2898_v26 = vunpack.c.l.bf16 %v3468_v23  ;;  %v3475_v27 = vld [vmem:[%s5505_s5 + $0x40] sm:$0xff]  }
 0x15a   :  { %3612 = vmatprep.subr.mxu0 %v2942_v7  ;;  %v2927_v28 = vunpack.c.h.bf16 %v3475_v27 }
 0x15b   :  { %v292_v32 = vsub.f32 1.0, %v290_v29  ;;  %v291_v33 = vmul.f32 %v4487_v31, %v281_v30  ;;  %3613 = vmatpush3.msra.mxu0 %v2910_v8  ;;  %v2893_v29 = vld [vmem:[%s5505_s5] sm:$0xff]   ;;  %v2926_v30 = vunpack.c.l.bf16 %v3475_v27 }
 0x15c   :  { %3614 = vmatprep.subr.mxu0 %v2939_v10  ;;  %v2895_v31 = vunpack.c.h.bf16 %v2893_v29  ;;  %v3489_v27 = vld [vmem:[#allocation11 + $0x38] sm:$0xff]  }
 0x15d   :  { %v296_v34 = vsub.f32 0.0, %v292_v32  ;;  %v293_v35 = vsub.f32 1.0, %v291_v33  ;;  %3615 = vmatpush3.msra.mxu0 %v2907_v12  ;;  %v336_v33 = vld [vmem:[#allocation8] sm:$0x3] }
 0x15e   :  { %3616 = vmatprep.subr.mxu0 %v2938_v13 }
 0x15f   :  { %v298_v36 = vsel %vm294_vm1, %v292_v32, %v296_v34  ;;  %v297_v37 = vsub.f32 0.0, %v293_v35  ;;  %3617 = vmatpush3.msra.mxu0 %v2906_v14  ;;  %v2894_v32 = vunpack.c.l.bf16 %v2893_v29  ;;  %v405_v34 = vrot.slane %v336_v33, %v169_v49 }
 0x160   :  { %v300_v39 = vadd.f32 1.0, %v298_v36  ;;  %3618 = vmatprep.subr.mxu0 %v2935_v16  ;;  %v2986_v29 = vunpack.c.l.bf16 %v3489_v27 }
 0x161   :  { %v299_v38 = vsel %vm295_vm2, %v293_v35, %v297_v37  ;;  %3619 = vmatpush3.msra.mxu0 %v2903_v18  ;;  %v409_v35 = vrot.slane %v336_v33, %v173_v51  ;;  %v3487_v33 = vld [vmem:[#allocation11 + $0x28] sm:$0xff]  }
 0x162   :  { %v301_v41 = vadd.f32 1.0, %v299_v38  ;;  %v302_v44 = vmul.f32 %v300_v39, %v252_v42  ;;  %3620 = vmatprep.subr.mxu0 %v2934_v19 }
 0x163   :  { %3621 = vmatpush3.msra.mxu0 %v2902_v20 }
 0x164   :  { %v303_v43 = vmul.f32 %v301_v41, %v253_v40  ;;  %3622 = vmatprep.subr.mxu0 %v2931_v22 }
 0x165   :  { %3623 = vmatpush3.msra.mxu0 %v2899_v24 }
 0x166   :  { %476 = vmatprep.mubr.f32.mxu1 %v303_v43  ;;  %3624 = vmatprep.subr.mxu0 %v2930_v25 }
 0x167   :  { %477 = vmatmul.mubr.f32.vlgmr.msra.gmra.mxu1 %v302_v44  ;;  %3625 = vmatpush3.msra.mxu0 %v2898_v26 }
 0x168   :  { %3626 = vmatprep.subr.mxu0 %v2927_v28  ;;  %v2987_v28 = vunpack.c.h.bf16 %v3489_v27  ;;  %3972 = vmatprep.mubr.msk.f32.mxu1 %vm4753_vm5, %v4752_v0  ;;  %v3493_v27 = vld [vmem:[#allocation13 + $0x20] sm:$0xff]  }
 0x169   :  { %3627 = vmatpush3.msra.mxu0 %v2895_v31 }
 0x16a   :  { %3628 = vmatprep.subr.mxu0 %v2926_v30  ;;  %v3488_v30 = vld [vmem:[#allocation11 + $0x30] sm:$0xff]  }
 0x16b   :  { %3629 = vmatpush3.msra.mxu0 %v2894_v32  ;;  %v2983_v31 = vunpack.c.h.bf16 %v3488_v30  ;;  %v2982_v32 = vunpack.c.l.bf16 %v3488_v30  ;;  %v3492_v30 = vld [vmem:[#allocation13 + $0x18] sm:$0xff]  }
 0x16c   :  { %3905 = vmatprep.subr.mxu0 %v4752_v0 }
 0x227   :  { %v478_v36 = vpop.f32.mrf.mxu1 }
 0x228   :  { %v479_v37 = vadd.f32 %v478_v36, %v405_v34  ;;  %v2979_v34 = vunpack.c.h.bf16 %v3487_v33  ;;  %v3486_v36 = vld [vmem:[#allocation11 + $0x20] sm:$0xff]  }
 0x229   :  { %v480_v38 = vpop.f32.mrf.mxu1 }
 0x22a   :  { %v485_v39 = vmul.f32 0.70710677, %v479_v37  ;;  %v481_v40 = vadd.f32 %v480_v38, %v409_v35  ;;  %v483_v24 = vmul.f32 0.5, %v479_v37  ;;  %v2978_v35 = vunpack.c.l.bf16 %v3487_v33  ;;  %v3491_v33 = vld [vmem:[#allocation13 + $0x10] sm:$0xff]  }
 0x22b   :  { %v2975_v37 = vunpack.c.h.bf16 %v3486_v36  ;;  %v2974_v38 = vunpack.c.l.bf16 %v3486_v36  ;;  %v3490_v36 = vld [vmem:[#allocation13 + $0x8] sm:$0xff]  }
 0x22c   :  { %v487_v41 = vand.u32 2147483647, %v485_v39  ;;  %v486_v42 = vmul.f32 0.70710677, %v481_v40  ;;  %vm525_vm3 = vcmp.ge.f32.partialorder %v485_v39, 0.0  ;;  %v484_v22 = vmul.f32 0.5, %v481_v40 }
 0x22d   :  { %v3485_v39 = vld [vmem:[#allocation11 + $0x18] sm:$0xff]  }
 0x22e   :  { %v489_v43 = vmul.f32 0.3275911, %v487_v41  ;;  %v488_v44 = vand.u32 2147483647, %v486_v42  ;;  %v513_v50 = vsub.f32 0.0, %v487_v41  ;;  %vm526_vm4 = vcmp.ge.f32.partialorder %v486_v42, 0.0 }
 0x22f   :  { %v2971_v40 = vunpack.c.h.bf16 %v3485_v39  ;;  %v3484_v42 = vld [vmem:[#allocation11 + $0x10] sm:$0xff]  }
 0x230   :  { %v491_v45 = vadd.f32 1.0, %v489_v43  ;;  %v490_v46 = vmul.f32 0.3275911, %v488_v44  ;;  %v514_v52 = vsub.f32 0.0, %v488_v44  ;;  %v515_v49 = vmul.f32 %v513_v50, %v487_v41  ;;  %v2957_v50 = vld [vmem:[#allocation11] sm:$0xff]  }
 0x231   :  { %v2970_v41 = vunpack.c.l.bf16 %v3485_v39  ;;  %v2967_v43 = vunpack.c.h.bf16 %v3484_v42  ;;  %v2989_v39 = vld [vmem:[#allocation13] sm:$0xff]  }
 0x232   :  { %4488 = vrcp.f32 %v491_v45  ;;  %v492_v47 = vadd.f32 1.0, %v490_v46  ;;  %v516_v48 = vmul.f32 %v514_v52, %v488_v44  ;;  %v517_v54 = vmul.f32 1.442695, %v515_v49  ;;  %v3483_v45 = vld [vmem:[#allocation11 + $0x8] sm:$0xff]  }
 0x233   :  { %v2966_v44 = vunpack.c.l.bf16 %v3484_v42  ;;  %v2963_v46 = vunpack.c.h.bf16 %v3483_v45  ;;  %v2959_v52 = vunpack.c.h.bf16 %v2957_v50  ;;  %v2958_v49 = vunpack.c.l.bf16 %v2957_v50  ;;  %v2816_v42 = vld [vmem:[%s5508_s8] ss:$0 sm:$0xff] }
 0x234   :  { %4490 = vrcp.f32 %v492_v47  ;;  %v519_v57 = vmul.f32 1.442695, %v516_v48  ;;  %v2962_v47 = vunpack.c.l.bf16 %v3483_v45  ;;  %v2815_v48 = vld [vmem:[#allocation10] ss:$0 sm:$0xff] }
 0x235   :  { %4492 = vpow2.f32 %v517_v54 }
 0x236   :  { %4494 = vpow2.f32 %v519_v57 }
 0x23f   :  { %v4489_v53 = vpop.eup %4488 }
 0x240   :  { %v495_v51 = vmul.f32 1.0614054, %v4489_v53 }
 0x241   :  { %v4491_v55 = vpop.eup %4490 }
 0x242   :  { %v497_v56 = vadd.f32 -1.4531521, %v495_v51  ;;  %v496_v58 = vmul.f32 1.0614054, %v4491_v55  ;;  %v4493_v9 = vpop.eup %4492 }
 0x243   :  { %v4495_v13 = vpop.eup %4494 }
 0x244   :  { %v499_v59 = vmul.f32 %v4489_v53, %v497_v56  ;;  %v498_v60 = vadd.f32 -1.4531521, %v496_v58 }
 0x246   :  { %v501_v61 = vadd.f32 1.4214138, %v499_v59  ;;  %v500_v62 = vmul.f32 %v4491_v55, %v498_v60 }
 0x248   :  { %v503_v63 = vmul.f32 %v4489_v53, %v501_v61  ;;  %v502_v1 = vadd.f32 1.4214138, %v500_v62 }
 0x24a   :  { %v505_v2 = vadd.f32 -0.28449672, %v503_v63  ;;  %v504_v3 = vmul.f32 %v4491_v55, %v502_v1 }
 0x24c   :  { %v507_v4 = vmul.f32 %v4489_v53, %v505_v2  ;;  %v506_v5 = vadd.f32 -0.28449672, %v504_v3 }
 0x24e   :  { %v509_v6 = vadd.f32 0.2548296, %v507_v4  ;;  %v508_v7 = vmul.f32 %v4491_v55, %v506_v5 }
 0x250   :  { %v511_v8 = vmul.f32 %v4489_v53, %v509_v6  ;;  %v510_v10 = vadd.f32 0.2548296, %v508_v7 }
 0x252   :  { %v521_v11 = vmul.f32 %v4493_v9, %v511_v8  ;;  %v512_v12 = vmul.f32 %v4491_v55, %v510_v10 }
 0x254   :  { %v523_v14 = vsub.f32 1.0, %v521_v11  ;;  %v522_v15 = vmul.f32 %v4495_v13, %v512_v12 }
 0x256   :  { %v527_v16 = vsub.f32 0.0, %v523_v14  ;;  %v524_v17 = vsub.f32 1.0, %v522_v15 }
 0x258   :  { %v529_v18 = vsel %vm525_vm3, %v523_v14, %v527_v16  ;;  %v528_v19 = vsub.f32 0.0, %v524_v17 }
 0x259   :  { %v531_v20 = vadd.f32 1.0, %v529_v18  ;;  %v3496_v18 = vld [vmem:[#allocation13 + $0x38] sm:$0xff]  }
 0x25a   :  { %v530_v21 = vsel %vm526_vm4, %v524_v17, %v528_v19  ;;  %v3019_v19 = vunpack.c.h.bf16 %v3496_v18 }
 0x25b   :  { %v532_v23 = vadd.f32 1.0, %v530_v21  ;;  %v533_v26 = vmul.f32 %v531_v20, %v483_v24  ;;  %v3018_v20 = vunpack.c.l.bf16 %v3496_v18  ;;  %v3495_v21 = vld [vmem:[#allocation13 + $0x30] sm:$0xff]   ;;  %v3494_v24 = vld [vmem:[#allocation13 + $0x28] sm:$0xff]   ;;  %v3500_v18 = vld [vmem:[#allocation14 + $0x20] sm:$0xff]  }
 0x25c   :  { %3941 = vmatpush3.msra.mxu1 %v3019_v19  ;;  %v3039_v19 = vunpack.c.h.bf16 %v3500_v18 }
 0x25d   :  { %v534_v25 = vmul.f32 %v532_v23, %v484_v22  ;;  %3942 = vmatprep.subr.mxu1 %v4752_v0  ;;  %v3015_v22 = vunpack.c.h.bf16 %v3495_v21  ;;  %v3014_v23 = vunpack.c.l.bf16 %v3495_v21  ;;  %v3499_v21 = vld [vmem:[#allocation14 + $0x18] sm:$0xff]  }
 0x25e   :  { %3943 = vmatpush3.msra.mxu1 %v3018_v20  ;;  %v3038_v20 = vunpack.c.l.bf16 %v3500_v18 }
 0x25f   :  { %670 = vmatprep.mubr.f32.mxu0 %v534_v25  ;;  %3944 = vmatprep.subr.mxu1 %v4752_v0  ;;  %v3011_v25 = vunpack.c.h.bf16 %v3494_v24 }
 0x260   :  { %671 = vmatmul.mubr.f32.vlgmr.msra.gmra.mxu0 %v533_v26  ;;  %3945 = vmatpush3.msra.mxu1 %v3015_v22  ;;  %v3010_v26 = vunpack.c.l.bf16 %v3494_v24  ;;  %v3035_v22 = vunpack.c.h.bf16 %v3499_v21  ;;  %v3498_v24 = vld [vmem:[#allocation14 + $0x10] sm:$0xff]  }
 0x261   :  { %3906 = vmatpush3.msra.mxu0 %v2987_v28  ;;  %3937 = vmatprep.mubr.msk.f32.mxu0 %vm4753_vm5, %v4752_v0  ;;  %v3007_v28 = vunpack.c.h.bf16 %v3493_v27 }
 0x262   :  { %3907 = vmatprep.subr.mxu0 %v4752_v0  ;;  %3946 = vmatprep.subr.mxu1 %v4752_v0 }
 0x263   :  { %3908 = vmatpush3.msra.mxu0 %v2986_v29  ;;  %3947 = vmatpush3.msra.mxu1 %v3014_v23  ;;  %v3006_v29 = vunpack.c.l.bf16 %v3493_v27  ;;  %v3034_v23 = vunpack.c.l.bf16 %v3499_v21  ;;  %v3497_v27 = vld [vmem:[#allocation14 + $0x8] sm:$0xff]  }
 0x264   :  { %3909 = vmatprep.subr.mxu0 %v4752_v0  ;;  %3948 = vmatprep.subr.mxu1 %v4752_v0 }
 0x265   :  { %3910 = vmatpush3.msra.mxu0 %v2983_v31  ;;  %3949 = vmatpush3.msra.mxu1 %v3011_v25  ;;  %v3003_v31 = vunpack.c.h.bf16 %v3492_v30  ;;  %v3031_v25 = vunpack.c.h.bf16 %v3498_v24 }
 0x266   :  { %3911 = vmatprep.subr.mxu0 %v4752_v0  ;;  %3950 = vmatprep.subr.mxu1 %v4752_v0 }
 0x267   :  { %3912 = vmatpush3.msra.mxu0 %v2982_v32  ;;  %3951 = vmatpush3.msra.mxu1 %v3010_v26  ;;  %v3002_v32 = vunpack.c.l.bf16 %v3492_v30  ;;  %v3030_v26 = vunpack.c.l.bf16 %v3498_v24  ;;  %v3021_v30 = vld [vmem:[#allocation14] sm:$0xff]   ;;  %v3510_v24 = vld [vmem:[%s5513_s13 + $0x38] sm:$0xff]  }
 0x268   :  { %3913 = vmatprep.subr.mxu0 %v4752_v0  ;;  %3952 = vmatprep.subr.mxu1 %v4752_v0 }
 0x269   :  { %3914 = vmatpush3.msra.mxu0 %v2979_v34  ;;  %3953 = vmatpush3.msra.mxu1 %v3007_v28  ;;  %v2999_v34 = vunpack.c.h.bf16 %v3491_v33  ;;  %v3027_v28 = vunpack.c.h.bf16 %v3497_v27 }
 0x26a   :  { %3915 = vmatprep.subr.mxu0 %v4752_v0  ;;  %3954 = vmatprep.subr.mxu1 %v4752_v0 }
 0x26b   :  { %3916 = vmatpush3.msra.mxu0 %v2978_v35  ;;  %3955 = vmatpush3.msra.mxu1 %v3006_v29  ;;  %v2998_v35 = vunpack.c.l.bf16 %v3491_v33  ;;  %v3026_v29 = vunpack.c.l.bf16 %v3497_v27  ;;  %v2817_v33 = vld [vmem:[%s5510_s10] ss:$0 sm:$0xff]  ;;  %v3509_v27 = vld [vmem:[%s5513_s13 + $0x30] sm:$0xff]  }
 0x26c   :  { %3917 = vmatprep.subr.mxu0 %v4752_v0  ;;  %3956 = vmatprep.subr.mxu1 %v4752_v0 }
 0x26d   :  { %3918 = vmatpush3.msra.mxu0 %v2975_v37  ;;  %3957 = vmatpush3.msra.mxu1 %v3003_v31  ;;  %v2995_v37 = vunpack.c.h.bf16 %v3490_v36  ;;  %v3023_v31 = vunpack.c.h.bf16 %v3021_v30 }
 0x26e   :  { %3919 = vmatprep.subr.mxu0 %v4752_v0  ;;  %3958 = vmatprep.subr.mxu1 %v4752_v0 }
 0x26f   :  { %3920 = vmatpush3.msra.mxu0 %v2974_v38  ;;  %3959 = vmatpush3.msra.mxu1 %v3002_v32  ;;  %v2994_v38 = vunpack.c.l.bf16 %v3490_v36  ;;  %v3022_v32 = vunpack.c.l.bf16 %v3021_v30  ;;  %v3508_v30 = vld [vmem:[%s5513_s13 + $0x28] sm:$0xff]  }
 0x270   :  { %3921 = vmatprep.subr.mxu0 %v4752_v0  ;;  %3960 = vmatprep.subr.mxu1 %v4752_v0 }
 0x271   :  { %3922 = vmatpush3.msra.mxu0 %v2971_v40  ;;  %3961 = vmatpush3.msra.mxu1 %v2999_v34  ;;  %v2991_v40 = vunpack.c.h.bf16 %v2989_v39 }
 0x272   :  { %3923 = vmatprep.subr.mxu0 %v4752_v0  ;;  %3962 = vmatprep.subr.mxu1 %v4752_v0 }
 0x273   :  { %3924 = vmatpush3.msra.mxu0 %v2970_v41  ;;  %3963 = vmatpush3.msra.mxu1 %v2998_v35  ;;  %v2990_v41 = vunpack.c.l.bf16 %v2989_v39 }
 0x274   :  { %3925 = vmatprep.subr.mxu0 %v4752_v0  ;;  %3964 = vmatprep.subr.mxu1 %v4752_v0 }
 0x275   :  { %3926 = vmatpush3.msra.mxu0 %v2967_v43  ;;  %3965 = vmatpush3.msra.mxu1 %v2995_v37 }
 0x276   :  { %3927 = vmatprep.subr.mxu0 %v4752_v0  ;;  %3966 = vmatprep.subr.mxu1 %v4752_v0 }
 0x277   :  { %3928 = vmatpush3.msra.mxu0 %v2966_v44  ;;  %3967 = vmatpush3.msra.mxu1 %v2994_v38 }
 0x278   :  { %3929 = vmatprep.subr.mxu0 %v4752_v0  ;;  %3968 = vmatprep.subr.mxu1 %v4752_v0 }
 0x279   :  { %3930 = vmatpush3.msra.mxu0 %v2963_v46  ;;  %3969 = vmatpush3.msra.mxu1 %v2991_v40 }
 0x27a   :  { %3931 = vmatprep.subr.mxu0 %v4752_v0  ;;  %3970 = vmatprep.subr.mxu1 %v4752_v0 }
 0x27b   :  { %3932 = vmatpush3.msra.mxu0 %v2962_v47  ;;  %3971 = vmatpush3.msra.mxu1 %v2990_v41 }
 0x27c   :  { %3933 = vmatprep.subr.mxu0 %v4752_v0  ;;  %4010 = vmatprep.subr.mxu1 %v4752_v0 }
 0x27d   :  { %3934 = vmatpush3.msra.mxu0 %v2959_v52 }
 0x27e   :  { %3935 = vmatprep.subr.mxu0 %v4752_v0 }
 0x27f   :  { %3936 = vmatpush3.msra.mxu0 %v2958_v49 }
 0x280   :  { %3975 = vmatprep.subr.mxu0 %v4752_v0 }
 0x320   :  { %v3630_v53 = vpop.f32.mrf.mxu0 }
 0x322   :  { %v3631_v51 = vpop.f32.mrf.mxu0 }
 0x323   :  { %v3632_v54 = vadd.f32 %v3631_v51, %v3630_v53 }
 0x325   :  { %v673_v55 = vadd.f32 %v3632_v54, %v2815_v48 }
 0x327   :  { %v677_v56 = vmul.f32 0.70710677, %v673_v55  ;;  %v676_v15 = vmul.f32 0.5, %v673_v55 }
 0x329   :  { %v678_v57 = vand.u32 2147483647, %v677_v56  ;;  %vm697_vm6 = vcmp.ge.f32.partialorder %v677_v56, 0.0 }
 0x32b   :  { %v679_v58 = vmul.f32 0.3275911, %v678_v57  ;;  %v691_v60 = vsub.f32 0.0, %v678_v57 }
 0x32d   :  { %v680_v59 = vadd.f32 1.0, %v679_v58  ;;  %v692_v61 = vmul.f32 %v691_v60, %v678_v57 }
 0x32f   :  { %4496 = vrcp.f32 %v680_v59  ;;  %v693_v1 = vmul.f32 1.442695, %v692_v61 }
 0x331   :  { %4498 = vpow2.f32 %v693_v1 }
 0x33c   :  { %v4497_v62 = vpop.eup %4496 }
 0x33d   :  { %v682_v63 = vmul.f32 1.0614054, %v4497_v62 }
 0x33e   :  { %v4499_v10 = vpop.eup %4498 }
 0x33f   :  { %v683_v2 = vadd.f32 -1.4531521, %v682_v63 }
 0x341   :  { %v684_v3 = vmul.f32 %v4497_v62, %v683_v2 }
 0x343   :  { %v685_v4 = vadd.f32 1.4214138, %v684_v3 }
 0x345   :  { %v686_v5 = vmul.f32 %v4497_v62, %v685_v4 }
 0x347   :  { %v687_v6 = vadd.f32 -0.28449672, %v686_v5 }
 0x349   :  { %v688_v7 = vmul.f32 %v4497_v62, %v687_v6 }
 0x34b   :  { %v689_v8 = vadd.f32 0.2548296, %v688_v7 }
 0x34d   :  { %v690_v9 = vmul.f32 %v4497_v62, %v689_v8  ;;  %v3503_v8 = vld [vmem:[#allocation14 + $0x38] sm:$0xff]  }
 0x34f   :  { %v695_v11 = vmul.f32 %v4499_v10, %v690_v9  ;;  %v3051_v9 = vunpack.c.h.bf16 %v3503_v8  ;;  %v3050_v10 = vunpack.c.l.bf16 %v3503_v8 }
 0x351   :  { %v696_v12 = vsub.f32 1.0, %v695_v11  ;;  %v3502_v11 = vld [vmem:[#allocation14 + $0x30] sm:$0xff]  }
 0x353   :  { %v698_v13 = vsub.f32 0.0, %v696_v12 }
 0x355   :  { %v699_v14 = vsel %vm697_vm6, %v696_v12, %v698_v13  ;;  %v3047_v12 = vunpack.c.h.bf16 %v3502_v11  ;;  %v3046_v13 = vunpack.c.l.bf16 %v3502_v11 }
 0x356   :  { %v700_v16 = vadd.f32 1.0, %v699_v14  ;;  %v3501_v14 = vld [vmem:[#allocation14 + $0x28] sm:$0xff]  }
 0x358   :  { %v5047_v17 = vmul.f32 %v700_v16, %v676_v15  ;;  %v3043_v15 = vunpack.c.h.bf16 %v3501_v14  ;;  %v3042_v16 = vunpack.c.l.bf16 %v3501_v14 }
 0x35a   :  { %3938 = vmatmul.mubr.f32.vlgmr.msra.gmra.mxu0 %v5047_v17 }
 0x35b   :  { %4007 = vmatprep.mubr.msk.f32.mxu0 %vm4753_vm5, %v4752_v0  ;;  %3976 = vmatpush3.msra.mxu0 %v3051_v9 }
 0x35c   :  { %3977 = vmatprep.subr.mxu0 %v4752_v0 }
 0x35d   :  { %3978 = vmatpush3.msra.mxu0 %v3050_v10  ;;  %v3513_v10 = vld [vmem:[#allocation11 + $0x58] sm:$0xff]  }
 0x35e   :  { %3979 = vmatprep.subr.mxu0 %v4752_v0  ;;  %v3098_v14 = vunpack.c.l.bf16 %v3513_v10 }
 0x35f   :  { %3980 = vmatpush3.msra.mxu0 %v3047_v12  ;;  %v3099_v12 = vunpack.c.h.bf16 %v3513_v10 }
 0x360   :  { %3981 = vmatprep.subr.mxu0 %v4752_v0 }
 0x361   :  { %3982 = vmatpush3.msra.mxu0 %v3046_v13  ;;  %v3512_v13 = vld [vmem:[#allocation11 + $0x50] sm:$0xff]  }
 0x362   :  { %3983 = vmatprep.subr.mxu0 %v4752_v0  ;;  %v3094_v18 = vunpack.c.l.bf16 %v3512_v13 }
 0x363   :  { %3984 = vmatpush3.msra.mxu0 %v3043_v15  ;;  %v3095_v15 = vunpack.c.h.bf16 %v3512_v13 }
 0x364   :  { %3985 = vmatprep.subr.mxu0 %v4752_v0 }
 0x365   :  { %3986 = vmatpush3.msra.mxu0 %v3042_v16  ;;  %v3511_v16 = vld [vmem:[#allocation11 + $0x48] sm:$0xff]  }
 0x366   :  { %3987 = vmatprep.subr.mxu0 %v4752_v0  ;;  %v3090_v21 = vunpack.c.l.bf16 %v3511_v16 }
 0x367   :  { %3988 = vmatpush3.msra.mxu0 %v3039_v19  ;;  %v3091_v19 = vunpack.c.h.bf16 %v3511_v16 }
 0x368   :  { %3989 = vmatprep.subr.mxu0 %v4752_v0 }
 0x369   :  { %3990 = vmatpush3.msra.mxu0 %v3038_v20  ;;  %v3085_v20 = vld [vmem:[#allocation11 + $0x40] sm:$0xff]  }
 0x36a   :  { %3991 = vmatprep.subr.mxu0 %v4752_v0 }
 0x36b   :  { %3992 = vmatpush3.msra.mxu0 %v3035_v22  ;;  %v3087_v22 = vunpack.c.h.bf16 %v3085_v20 }
 0x36c   :  { %3993 = vmatprep.subr.mxu0 %v4752_v0 }
 0x36d   :  { %3994 = vmatpush3.msra.mxu0 %v3034_v23  ;;  %v3086_v23 = vunpack.c.l.bf16 %v3085_v20 }
 0x36e   :  { %3995 = vmatprep.subr.mxu0 %v4752_v0 }
 0x36f   :  { %3996 = vmatpush3.msra.mxu0 %v3031_v25  ;;  %v3083_v25 = vunpack.c.h.bf16 %v3510_v24 }
 0x370   :  { %3997 = vmatprep.subr.mxu0 %v4752_v0 }
 0x371   :  { %3998 = vmatpush3.msra.mxu0 %v3030_v26  ;;  %v3082_v26 = vunpack.c.l.bf16 %v3510_v24 }
 0x372   :  { %3999 = vmatprep.subr.mxu0 %v4752_v0 }
 0x373   :  { %4000 = vmatpush3.msra.mxu0 %v3027_v28  ;;  %v3079_v28 = vunpack.c.h.bf16 %v3509_v27 }
 0x374   :  { %4001 = vmatprep.subr.mxu0 %v4752_v0 }
 0x375   :  { %4002 = vmatpush3.msra.mxu0 %v3026_v29  ;;  %v3078_v29 = vunpack.c.l.bf16 %v3509_v27 }
 0x376   :  { %4003 = vmatprep.subr.mxu0 %v4752_v0 }
 0x377   :  { %4004 = vmatpush3.msra.mxu0 %v3023_v31  ;;  %v3075_v31 = vunpack.c.h.bf16 %v3508_v30 }
 0x378   :  { %4005 = vmatprep.subr.mxu0 %v4752_v0 }
 0x379   :  { %4006 = vmatpush3.msra.mxu0 %v3022_v32  ;;  %v3074_v32 = vunpack.c.l.bf16 %v3508_v30 }
 0x37a   :  { %4045 = vmatprep.subr.mxu0 %v4752_v0 }
 0x41a   :  { %v807_v43 = vpop.f32.mrf.mxu0 }
 0x41b   :  { %v808_v44 = vadd.f32 %v2816_v42, %v807_v43 }
 0x41c   :  { %v3939_v45 = vpop.f32.mrf.mxu0 }
 0x41d   :  { %v812_v46 = vmul.f32 0.70710677, %v808_v44  ;;  %v811_v5 = vmul.f32 0.5, %v808_v44 }
 0x41f   :  { %v813_v47 = vand.u32 2147483647, %v812_v46  ;;  %vm832_vm7 = vcmp.ge.f32.partialorder %v812_v46, 0.0 }
 0x421   :  { %v814_v50 = vmul.f32 0.3275911, %v813_v47  ;;  %v826_v49 = vsub.f32 0.0, %v813_v47 }
 0x423   :  { %v815_v52 = vadd.f32 1.0, %v814_v50  ;;  %v827_v53 = vmul.f32 %v826_v49, %v813_v47 }
 0x425   :  { %4500 = vrcp.f32 %v815_v52  ;;  %v828_v54 = vmul.f32 1.442695, %v827_v53 }
 0x427   :  { %4502 = vpow2.f32 %v828_v54 }
 0x432   :  { %v4501_v48 = vpop.eup %4500 }
 0x433   :  { %v817_v51 = vmul.f32 1.0614054, %v4501_v48 }
 0x434   :  { %v4503_v63 = vpop.eup %4502 }
 0x435   :  { %v818_v55 = vadd.f32 -1.4531521, %v817_v51 }
 0x437   :  { %v819_v56 = vmul.f32 %v4501_v48, %v818_v55 }
 0x439   :  { %v820_v57 = vadd.f32 1.4214138, %v819_v56 }
 0x43b   :  { %v821_v58 = vmul.f32 %v4501_v48, %v820_v57 }
 0x43d   :  { %v822_v59 = vadd.f32 -0.28449672, %v821_v58  ;;  %v3517_v58 = vld [vmem:[#allocation11 + $0x78] sm:$0xff]  }
 0x43f   :  { %v823_v60 = vmul.f32 %v4501_v48, %v822_v59 }
 0x441   :  { %v824_v61 = vadd.f32 0.2548296, %v823_v60 }
 0x443   :  { %v825_v62 = vmul.f32 %v4501_v48, %v824_v61 }
 0x445   :  { %v830_v1 = vmul.f32 %v4503_v63, %v825_v62  ;;  %v3115_v62 = vunpack.c.h.bf16 %v3517_v58 }
 0x447   :  { %v831_v2 = vsub.f32 1.0, %v830_v1  ;;  %v3516_v1 = vld [vmem:[#allocation11 + $0x70] sm:$0xff]  }
 0x449   :  { %v833_v3 = vsub.f32 0.0, %v831_v2 }
 0x44b   :  { %v834_v4 = vsel %vm832_vm7, %v831_v2, %v833_v3  ;;  %v3114_v2 = vunpack.c.l.bf16 %v3517_v58  ;;  %v3111_v3 = vunpack.c.h.bf16 %v3516_v1 }
 0x44c   :  { %v835_v6 = vadd.f32 1.0, %v834_v4  ;;  %v3515_v4 = vld [vmem:[#allocation11 + $0x68] sm:$0xff]  }
 0x44d   :  { %v3106_v8 = vunpack.c.l.bf16 %v3515_v4 }
 0x44e   :  { %v836_v7 = vmul.f32 %v835_v6, %v811_v5  ;;  %v3110_v5 = vunpack.c.l.bf16 %v3516_v1  ;;  %v3107_v6 = vunpack.c.h.bf16 %v3515_v4 }
 0x450   :  { %3973 = vmatmul.mubr.f32.vlgmr.msra.gmra.mxu1 %v836_v7  ;;  %v3514_v7 = vld [vmem:[#allocation11 + $0x60] sm:$0xff]  }
 0x451   :  { %4042 = vmatprep.mubr.msk.f32.mxu1 %vm4753_vm5, %v4752_v0  ;;  %v3103_v9 = vunpack.c.h.bf16 %v3514_v7  ;;  %v3102_v11 = vunpack.c.l.bf16 %v3514_v7  ;;  %4011 = vmatpush3.msra.mxu1 %v3083_v25 }
 0x452   :  { %4012 = vmatprep.subr.mxu1 %v4752_v0 }
 0x453   :  { %4013 = vmatpush3.msra.mxu1 %v3082_v26  ;;  %v3523_v26 = vld [vmem:[#allocation13 + $0x70] sm:$0xff]  }
 0x454   :  { %4014 = vmatprep.subr.mxu1 %v4752_v0 }
 0x455   :  { %4015 = vmatpush3.msra.mxu1 %v3079_v28 }
 0x456   :  { %4016 = vmatprep.subr.mxu1 %v4752_v0 }
 0x457   :  { %4017 = vmatpush3.msra.mxu1 %v3078_v29  ;;  %v3143_v29 = vunpack.c.h.bf16 %v3523_v26 }
 0x458   :  { %4018 = vmatprep.subr.mxu1 %v4752_v0 }
 0x459   :  { %4019 = vmatpush3.msra.mxu1 %v3075_v31  ;;  %v3522_v31 = vld [vmem:[#allocation13 + $0x68] sm:$0xff]  }
 0x45a   :  { %4020 = vmatprep.subr.mxu1 %v4752_v0 }
 0x45b   :  { %4021 = vmatpush3.msra.mxu1 %v3074_v32 }
 0x45c   :  { %4022 = vmatprep.subr.mxu1 %v4752_v0 }
 0x510   :  { %v942_v34 = vpop.f32.mrf.mxu1 }
 0x511   :  { %v943_v35 = vadd.f32 %v2817_v33, %v942_v34  ;;  %v3507_v33 = vld [vmem:[%s5513_s13 + $0x20] sm:$0xff]  }
 0x512   :  { %v3974_v36 = vpop.f32.mrf.mxu1  ;;  %v3071_v34 = vunpack.c.h.bf16 %v3507_v33 }
 0x513   :  { %v947_v37 = vmul.f32 0.70710677, %v943_v35  ;;  %v946_v60 = vmul.f32 0.5, %v943_v35  ;;  %v3070_v35 = vunpack.c.l.bf16 %v3507_v33  ;;  %v3506_v36 = vld [vmem:[%s5513_s13 + $0x18] sm:$0xff]  }
 0x514   :  { %4023 = vmatpush3.msra.mxu1 %v3071_v34  ;;  %v3142_v34 = vunpack.c.l.bf16 %v3523_v26 }
 0x515   :  { %v948_v38 = vand.u32 2147483647, %v947_v37  ;;  %vm967_vm8 = vcmp.ge.f32.partialorder %v947_v37, 0.0  ;;  %4024 = vmatprep.subr.mxu1 %v4752_v0  ;;  %v3067_v37 = vunpack.c.h.bf16 %v3506_v36 }
 0x516   :  { %4025 = vmatpush3.msra.mxu1 %v3070_v35 }
 0x517   :  { %v949_v39 = vmul.f32 0.3275911, %v948_v38  ;;  %v961_v41 = vsub.f32 0.0, %v948_v38  ;;  %4026 = vmatprep.subr.mxu1 %v4752_v0 }
 0x518   :  { %4027 = vmatpush3.msra.mxu1 %v3067_v37  ;;  %v3521_v37 = vld [vmem:[#allocation13 + $0x60] sm:$0xff]  }
 0x519   :  { %v950_v40 = vadd.f32 1.0, %v949_v39  ;;  %v962_v42 = vmul.f32 %v961_v41, %v948_v38  ;;  %v3066_v38 = vunpack.c.l.bf16 %v3506_v36  ;;  %4028 = vmatprep.subr.mxu1 %v4752_v0  ;;  %v3505_v39 = vld [vmem:[%s5513_s13 + $0x10] sm:$0xff]   ;;  %v3139_v36 = vunpack.c.h.bf16 %v3522_v31 }
 0x51a   :  { %v3062_v41 = vunpack.c.l.bf16 %v3505_v39 }
 0x51b   :  { %4504 = vrcp.f32 %v950_v40  ;;  %v963_v45 = vmul.f32 1.442695, %v962_v42  ;;  %4029 = vmatpush3.msra.mxu1 %v3066_v38  ;;  %v3063_v40 = vunpack.c.h.bf16 %v3505_v39  ;;  %v3504_v42 = vld [vmem:[%s5513_s13 + $0x8] sm:$0xff]   ;;  %v3138_v39 = vunpack.c.l.bf16 %v3522_v31 }
 0x51c   :  { %4030 = vmatprep.subr.mxu1 %v4752_v0 }
 0x51d   :  { %4506 = vpow2.f32 %v963_v45  ;;  %4031 = vmatpush3.msra.mxu1 %v3063_v40  ;;  %v3053_v45 = vld [vmem:[%s5513_s13] sm:$0xff]  }
 0x51e   :  { %4032 = vmatprep.subr.mxu1 %v4752_v0 }
 0x51f   :  { %4033 = vmatpush3.msra.mxu1 %v3062_v41  ;;  %v3135_v41 = vunpack.c.h.bf16 %v3521_v37 }
 0x520   :  { %4034 = vmatprep.subr.mxu1 %v4752_v0 }
 0x528   :  { %v4505_v43 = vpop.eup %4504 }
 0x529   :  { %v952_v44 = vmul.f32 1.0614054, %v4505_v43 }
 0x52a   :  { %v4507_v54 = vpop.eup %4506 }
 0x52b   :  { %v953_v46 = vadd.f32 -1.4531521, %v952_v44  ;;  %v3058_v44 = vunpack.c.l.bf16 %v3504_v42 }
 0x52d   :  { %v954_v47 = vmul.f32 %v4505_v43, %v953_v46  ;;  %v3055_v46 = vunpack.c.h.bf16 %v3053_v45 }
 0x52f   :  { %v955_v50 = vadd.f32 1.4214138, %v954_v47  ;;  %v3054_v47 = vunpack.c.l.bf16 %v3053_v45 }
 0x531   :  { %v956_v52 = vmul.f32 %v4505_v43, %v955_v50  ;;  %v2818_v50 = vld [vmem:[%s5512_s12] ss:$0 sm:$0xff] }
 0x533   :  { %v957_v49 = vadd.f32 -0.28449672, %v956_v52 }
 0x535   :  { %v958_v53 = vmul.f32 %v4505_v43, %v957_v49 }
 0x537   :  { %v959_v48 = vadd.f32 0.2548296, %v958_v53 }
 0x539   :  { %v960_v51 = vmul.f32 %v4505_v43, %v959_v48  ;;  %v3059_v43 = vunpack.c.h.bf16 %v3504_v42  ;;  %v3520_v42 = vld [vmem:[#allocation13 + $0x58] sm:$0xff]  }
 0x53b   :  { %v965_v55 = vmul.f32 %v4507_v54, %v960_v51  ;;  %4035 = vmatpush3.msra.mxu1 %v3059_v43 }
 0x53c   :  { %4036 = vmatprep.subr.mxu1 %v4752_v0 }
 0x53d   :  { %v966_v56 = vsub.f32 1.0, %v965_v55  ;;  %4037 = vmatpush3.msra.mxu1 %v3058_v44  ;;  %v3134_v44 = vunpack.c.l.bf16 %v3521_v37 }
 0x53e   :  { %4038 = vmatprep.subr.mxu1 %v4752_v0 }
 0x53f   :  { %v968_v57 = vsub.f32 0.0, %v966_v56  ;;  %4039 = vmatpush3.msra.mxu1 %v3055_v46  ;;  %v3131_v46 = vunpack.c.h.bf16 %v3520_v42 }
 0x540   :  { %4040 = vmatprep.subr.mxu1 %v4752_v0 }
 0x541   :  { %v969_v59 = vsel %vm967_vm8, %v966_v56, %v968_v57  ;;  %4041 = vmatpush3.msra.mxu1 %v3054_v47  ;;  %v3519_v47 = vld [vmem:[#allocation13 + $0x50] sm:$0xff]  }
 0x542   :  { %v970_v61 = vadd.f32 1.0, %v969_v59  ;;  %4080 = vmatprep.subr.mxu1 %v4752_v0 }
 0x544   :  { %v971_v63 = vmul.f32 %v970_v61, %v946_v60 }
 0x546   :  { %4008 = vmatmul.mubr.f32.vlgmr.msra.gmra.mxu0 %v971_v63  ;;  %v2821_v63 = vld [vmem:[%s5508_s8 + $0x1] ss:$0 sm:$0xff] }
 0x547   :  { %4046 = vmatpush3.msra.mxu0 %v3115_v62  ;;  %4077 = vmatprep.mubr.msk.f32.mxu0 %vm4753_vm5, %v4752_v0 }
 0x548   :  { %4047 = vmatprep.subr.mxu0 %v4752_v0 }
 0x549   :  { %4048 = vmatpush3.msra.mxu0 %v3114_v2 }
 0x54a   :  { %4049 = vmatprep.subr.mxu0 %v4752_v0 }
 0x54b   :  { %4050 = vmatpush3.msra.mxu0 %v3111_v3 }
 0x54c   :  { %4051 = vmatprep.subr.mxu0 %v4752_v0 }
 0x54d   :  { %4052 = vmatpush3.msra.mxu0 %v3110_v5 }
 0x54e   :  { %4053 = vmatprep.subr.mxu0 %v4752_v0 }
 0x54f   :  { %4054 = vmatpush3.msra.mxu0 %v3107_v6 }
 0x550   :  { %4055 = vmatprep.subr.mxu0 %v4752_v0 }
 0x551   :  { %4056 = vmatpush3.msra.mxu0 %v3106_v8 }
 0x552   :  { %4057 = vmatprep.subr.mxu0 %v4752_v0 }
 0x553   :  { %4058 = vmatpush3.msra.mxu0 %v3103_v9 }
 0x554   :  { %4059 = vmatprep.subr.mxu0 %v4752_v0 }
 0x555   :  { %4060 = vmatpush3.msra.mxu0 %v3102_v11 }
 0x556   :  { %4061 = vmatprep.subr.mxu0 %v4752_v0 }
 0x557   :  { %4062 = vmatpush3.msra.mxu0 %v3099_v12 }
 0x558   :  { %4063 = vmatprep.subr.mxu0 %v4752_v0 }
 0x559   :  { %4064 = vmatpush3.msra.mxu0 %v3098_v14 }
 0x55a   :  { %4065 = vmatprep.subr.mxu0 %v4752_v0 }
 0x55b   :  { %4066 = vmatpush3.msra.mxu0 %v3095_v15 }
 0x55c   :  { %4067 = vmatprep.subr.mxu0 %v4752_v0 }
 0x55d   :  { %4068 = vmatpush3.msra.mxu0 %v3094_v18 }
 0x55e   :  { %4069 = vmatprep.subr.mxu0 %v4752_v0 }
 0x55f   :  { %4070 = vmatpush3.msra.mxu0 %v3091_v19  ;;  %v3524_v19 = vld [vmem:[#allocation13 + $0x78] sm:$0xff]  }
 0x560   :  { %4071 = vmatprep.subr.mxu0 %v4752_v0  ;;  %v3147_v24 = vunpack.c.h.bf16 %v3524_v19  ;;  %v3146_v28 = vunpack.c.l.bf16 %v3524_v19 }
 0x561   :  { %4072 = vmatpush3.msra.mxu0 %v3090_v21 }
 0x562   :  { %4073 = vmatprep.subr.mxu0 %v4752_v0 }
 0x563   :  { %4074 = vmatpush3.msra.mxu0 %v3087_v22 }
 0x564   :  { %4075 = vmatprep.subr.mxu0 %v4752_v0 }
 0x565   :  { %4076 = vmatpush3.msra.mxu0 %v3086_v23 }
 0x566   :  { %4078 = vmatmul.mubr.f32.vlgmr.msra.gmra.mxu0 %v5047_v17  ;;  %4115 = vmatprep.subr.mxu0 %v4752_v0 }
 0x567   :  { %4147 = vmatprep.mubr.msk.f32.mxu0 %vm4753_vm5, %v4752_v0 }
 0x606   :  { %v1077_v52 = vpop.f32.mrf.mxu0 }
 0x607   :  { %v1078_v49 = vadd.f32 %v2818_v50, %v1077_v52  ;;  %v3130_v52 = vunpack.c.l.bf16 %v3520_v42 }
 0x608   :  { %v4009_v53 = vpop.f32.mrf.mxu0 }
 0x609   :  { %v1082_v48 = vmul.f32 0.70710677, %v1078_v49  ;;  %v1081_v22 = vmul.f32 0.5, %v1078_v49  ;;  %v3127_v53 = vunpack.c.h.bf16 %v3519_v47 }
 0x60b   :  { %v1083_v51 = vand.u32 2147483647, %v1082_v48  ;;  %vm1102_vm9 = vcmp.ge.f32.partialorder %v1082_v48, 0.0  ;;  %v3518_v48 = vld [vmem:[#allocation13 + $0x48] sm:$0xff]  }
 0x60d   :  { %v1084_v54 = vmul.f32 0.3275911, %v1083_v51  ;;  %v1096_v56 = vsub.f32 0.0, %v1083_v51 }
 0x60f   :  { %v1085_v55 = vadd.f32 1.0, %v1084_v54  ;;  %v1097_v57 = vmul.f32 %v1096_v56, %v1083_v51  ;;  %v3126_v54 = vunpack.c.l.bf16 %v3519_v47 }
 0x611   :  { %4508 = vrcp.f32 %v1085_v55  ;;  %v1098_v60 = vmul.f32 1.442695, %v1097_v57  ;;  %v3123_v57 = vunpack.c.h.bf16 %v3518_v48 }
 0x613   :  { %4510 = vpow2.f32 %v1098_v60  ;;  %v3122_v60 = vunpack.c.l.bf16 %v3518_v48 }
 0x61e   :  { %v4509_v58 = vpop.eup %4508 }
 0x61f   :  { %v1087_v59 = vmul.f32 1.0614054, %v4509_v58 }
 0x620   :  { %v4511_v14 = vpop.eup %4510 }
 0x621   :  { %v1088_v61 = vadd.f32 -1.4531521, %v1087_v59 }
 0x623   :  { %v1089_v62 = vmul.f32 %v4509_v58, %v1088_v61 }
 0x625   :  { %v1090_v1 = vadd.f32 1.4214138, %v1089_v62 }
 0x626   :  { %v1323_v2 = vpop.f32.mrf.mxu0 }
 0x627   :  { %v1091_v3 = vmul.f32 %v4509_v58, %v1090_v1  ;;  %v5159_v4 = vadd.f32 %v2821_v63, %v1323_v2 }
 0x628   :  { %v4079_v5 = vpop.f32.mrf.mxu0 }
 0x629   :  { %v1092_v6 = vadd.f32 -0.28449672, %v1091_v3  ;;  %v5162_v7 = vmul.f32 0.70710677, %v5159_v4  ;;  %v1327_v2 = vmul.f32 0.5, %v5159_v4  ;;  %v3530_v4 = vld [vmem:[#allocation14 + $0x70] sm:$0xff]  }
 0x62b   :  { %v1093_v8 = vmul.f32 %v4509_v58, %v1092_v6  ;;  %v1329_v9 = vand.u32 2147483647, %v5162_v7  ;;  %vm1348_vm10 = vcmp.ge.f32.partialorder %v5162_v7, 0.0  ;;  %v3531_v6 = vld [vmem:[#allocation14 + $0x78] sm:$0xff]  }
 0x62c   :  { %v3179_v7 = vunpack.c.h.bf16 %v3531_v6 }
 0x62d   :  { %v1094_v10 = vadd.f32 0.2548296, %v1093_v8  ;;  %v1330_v11 = vmul.f32 0.3275911, %v1329_v9  ;;  %v1342_v21 = vsub.f32 0.0, %v1329_v9  ;;  %v3178_v8 = vunpack.c.l.bf16 %v3531_v6 }
 0x62e   :  { %4116 = vmatpush3.msra.mxu0 %v3179_v7  ;;  %v3543_v7 = vld [vmem:[#allocation11 + $0xa0] sm:$0xff]  }
 0x62f   :  { %v1095_v12 = vmul.f32 %v4509_v58, %v1094_v10  ;;  %v1331_v13 = vadd.f32 1.0, %v1330_v11  ;;  %v1343_v27 = vmul.f32 %v1342_v21, %v1329_v9  ;;  %v3117_v58 = vld [vmem:[#allocation13 + $0x40] sm:$0xff]   ;;  %4117 = vmatprep.subr.mxu0 %v4752_v0  ;;  %v3175_v9 = vunpack.c.h.bf16 %v3530_v4  ;;  %v3529_v11 = vld [vmem:[#allocation14 + $0x68] sm:$0xff]   ;;  %v3526_v21 = vld [vmem:[#allocation14 + $0x50] sm:$0xff]  }
 0x630   :  { %v3119_v62 = vunpack.c.h.bf16 %v3117_v58  ;;  %v3118_v1 = vunpack.c.l.bf16 %v3117_v58  ;;  %4118 = vmatpush3.msra.mxu0 %v3178_v8  ;;  %v3174_v10 = vunpack.c.l.bf16 %v3530_v4  ;;  %v3231_v4 = vunpack.c.h.bf16 %v3543_v7 }
 0x631   :  { %v1100_v15 = vmul.f32 %v4511_v14, %v1095_v12  ;;  %4512 = vrcp.f32 %v1331_v13  ;;  %v1344_v33 = vmul.f32 1.442695, %v1343_v27  ;;  %4119 = vmatprep.subr.mxu0 %v4752_v0  ;;  %v3171_v12 = vunpack.c.h.bf16 %v3529_v11  ;;  %v3528_v14 = vld [vmem:[#allocation14 + $0x60] sm:$0xff]  }
 0x632   :  { %4120 = vmatpush3.msra.mxu0 %v3175_v9  ;;  %v3170_v13 = vunpack.c.l.bf16 %v3529_v11  ;;  %v3149_v27 = vld [vmem:[#allocation14 + $0x40] sm:$0xff]   ;;  %v3542_v9 = vld [vmem:[#allocation11 + $0x98] sm:$0xff]  }
 0x633   :  { %v1101_v16 = vsub.f32 1.0, %v1100_v15  ;;  %4514 = vpow2.f32 %v1344_v33  ;;  %4121 = vmatprep.subr.mxu0 %v4752_v0  ;;  %v3167_v15 = vunpack.c.h.bf16 %v3528_v14  ;;  %v3227_v11 = vunpack.c.h.bf16 %v3542_v9 }
 0x634   :  { %4122 = vmatpush3.msra.mxu0 %v3174_v10  ;;  %v3230_v10 = vunpack.c.l.bf16 %v3543_v7 }
 0x635   :  { %v1103_v18 = vsub.f32 0.0, %v1101_v16  ;;  %4123 = vmatprep.subr.mxu0 %v4752_v0 }
 0x636   :  { %4124 = vmatpush3.msra.mxu0 %v3171_v12  ;;  %v3541_v12 = vld [vmem:[#allocation11 + $0x90] sm:$0xff]  }
 0x637   :  { %v1104_v20 = vsel %vm1102_vm9, %v1101_v16, %v1103_v18  ;;  %4125 = vmatprep.subr.mxu0 %v4752_v0  ;;  %v3166_v16 = vunpack.c.l.bf16 %v3528_v14  ;;  %v3527_v18 = vld [vmem:[#allocation14 + $0x58] sm:$0xff]   ;;  %v3223_v14 = vunpack.c.h.bf16 %v3541_v12 }
 0x638   :  { %v1105_v23 = vadd.f32 1.0, %v1104_v20  ;;  %4126 = vmatpush3.msra.mxu0 %v3170_v13  ;;  %v3163_v19 = vunpack.c.h.bf16 %v3527_v18  ;;  %v3162_v20 = vunpack.c.l.bf16 %v3527_v18  ;;  %v3226_v13 = vunpack.c.l.bf16 %v3542_v9 }
 0x639   :  { %4127 = vmatprep.subr.mxu0 %v4752_v0 }
 0x63a   :  { %v1106_v25 = vmul.f32 %v1105_v23, %v1081_v22  ;;  %4128 = vmatpush3.msra.mxu0 %v3167_v15  ;;  %v3159_v22 = vunpack.c.h.bf16 %v3526_v21  ;;  %v3158_v23 = vunpack.c.l.bf16 %v3526_v21  ;;  %v3540_v15 = vld [vmem:[#allocation11 + $0x88] sm:$0xff]  }
 0x63b   :  { %4129 = vmatprep.subr.mxu0 %v4752_v0  ;;  %v3219_v18 = vunpack.c.h.bf16 %v3540_v15 }
 0x63c   :  { %4043 = vmatmul.mubr.f32.vlgmr.msra.gmra.mxu1 %v1106_v25  ;;  %4130 = vmatpush3.msra.mxu0 %v3166_v16  ;;  %v3222_v16 = vunpack.c.l.bf16 %v3541_v12 }
 0x63d   :  { %4081 = vmatpush3.msra.mxu1 %v3147_v24  ;;  %4112 = vmatprep.mubr.msk.f32.mxu1 %vm4753_vm5, %v4752_v0  ;;  %v3525_v24 = vld [vmem:[#allocation14 + $0x48] sm:$0xff]  }
 0x63e   :  { %v4513_v30 = vpop.eup %4512  ;;  %4082 = vmatprep.subr.mxu1 %v4752_v0  ;;  %4131 = vmatprep.subr.mxu0 %v4752_v0  ;;  %v3155_v25 = vunpack.c.h.bf16 %v3525_v24  ;;  %v3154_v26 = vunpack.c.l.bf16 %v3525_v24 }
 0x63f   :  { %v1333_v32 = vmul.f32 1.0614054, %v4513_v30  ;;  %4083 = vmatpush3.msra.mxu1 %v3146_v28  ;;  %4132 = vmatpush3.msra.mxu0 %v3163_v19  ;;  %v3151_v28 = vunpack.c.h.bf16 %v3149_v27  ;;  %v3213_v19 = vld [vmem:[#allocation11 + $0x80] sm:$0xff]  }
 0x640   :  { %4084 = vmatprep.subr.mxu1 %v4752_v0  ;;  %v4515_v55 = vpop.eup %4514  ;;  %4133 = vmatprep.subr.mxu0 %v4752_v0  ;;  %v3215_v21 = vunpack.c.h.bf16 %v3213_v19 }
 0x641   :  { %v1334_v35 = vadd.f32 -1.4531521, %v1333_v32  ;;  %4085 = vmatpush3.msra.mxu1 %v3143_v29  ;;  %4134 = vmatpush3.msra.mxu0 %v3162_v20  ;;  %v3150_v29 = vunpack.c.l.bf16 %v3149_v27  ;;  %v2823_v32 = vld [vmem:[%s5510_s10 + $0x1] ss:$0 sm:$0xff]  ;;  %v3218_v20 = vunpack.c.l.bf16 %v3540_v15 }
 0x642   :  { %4086 = vmatprep.subr.mxu1 %v4752_v0  ;;  %4135 = vmatprep.subr.mxu0 %v4752_v0 }
 0x643   :  { %v1335_v38 = vmul.f32 %v4513_v30, %v1334_v35  ;;  %4087 = vmatpush3.msra.mxu1 %v3142_v34  ;;  %4136 = vmatpush3.msra.mxu0 %v3159_v22  ;;  %v3214_v22 = vunpack.c.l.bf16 %v3213_v19  ;;  %v3553_v19 = vld [vmem:[#allocation13 + $0xb8] sm:$0xff]  }
 0x644   :  { %4088 = vmatprep.subr.mxu1 %v4752_v0  ;;  %4137 = vmatprep.subr.mxu0 %v4752_v0 }
 0x645   :  { %v1336_v40 = vadd.f32 1.4214138, %v1335_v38  ;;  %4089 = vmatpush3.msra.mxu1 %v3139_v36  ;;  %4138 = vmatpush3.msra.mxu0 %v3158_v23  ;;  %v3539_v23 = vld [vmem:[%s5513_s13 + $0x78] sm:$0xff]  }
 0x646   :  { %4090 = vmatprep.subr.mxu1 %v4752_v0  ;;  %4139 = vmatprep.subr.mxu0 %v4752_v0  ;;  %v3211_v24 = vunpack.c.h.bf16 %v3539_v23 }
 0x647   :  { %v1337_v43 = vmul.f32 %v4513_v30, %v1336_v40  ;;  %4091 = vmatpush3.msra.mxu1 %v3138_v39  ;;  %4140 = vmatpush3.msra.mxu0 %v3155_v25  ;;  %v3210_v25 = vunpack.c.l.bf16 %v3539_v23 }
 0x648   :  { %4092 = vmatprep.subr.mxu1 %v4752_v0  ;;  %4141 = vmatprep.subr.mxu0 %v4752_v0 }
 0x649   :  { %v1338_v45 = vadd.f32 -0.28449672, %v1337_v43  ;;  %4093 = vmatpush3.msra.mxu1 %v3135_v41  ;;  %4142 = vmatpush3.msra.mxu0 %v3154_v26  ;;  %v3538_v26 = vld [vmem:[%s5513_s13 + $0x70] sm:$0xff]  }
 0x64a   :  { %4094 = vmatprep.subr.mxu1 %v4752_v0  ;;  %4143 = vmatprep.subr.mxu0 %v4752_v0  ;;  %v3207_v27 = vunpack.c.h.bf16 %v3538_v26 }
 0x64b   :  { %v1339_v50 = vmul.f32 %v4513_v30, %v1338_v45  ;;  %4095 = vmatpush3.msra.mxu1 %v3134_v44  ;;  %4144 = vmatpush3.msra.mxu0 %v3151_v28  ;;  %v3206_v28 = vunpack.c.l.bf16 %v3538_v26  ;;  %v3552_v26 = vld [vmem:[#allocation13 + $0xb0] sm:$0xff]  }
 0x64c   :  { %4096 = vmatprep.subr.mxu1 %v4752_v0  ;;  %4145 = vmatprep.subr.mxu0 %v4752_v0 }
 0x64d   :  { %v1340_v49 = vadd.f32 0.2548296, %v1339_v50  ;;  %4097 = vmatpush3.msra.mxu1 %v3131_v46  ;;  %4146 = vmatpush3.msra.mxu0 %v3150_v29  ;;  %v3537_v29 = vld [vmem:[%s5513_s13 + $0x68] sm:$0xff]  }
 0x64e   :  { %4098 = vmatprep.subr.mxu1 %v4752_v0  ;;  %4185 = vmatprep.subr.mxu0 %v4752_v0 }
 0x64f   :  { %v1341_v51 = vmul.f32 %v4513_v30, %v1340_v49  ;;  %4099 = vmatpush3.msra.mxu1 %v3130_v52 }
 0x650   :  { %4100 = vmatprep.subr.mxu1 %v4752_v0 }
 0x651   :  { %v1346_v56 = vmul.f32 %v4515_v55, %v1341_v51  ;;  %4101 = vmatpush3.msra.mxu1 %v3127_v53 }
 0x652   :  { %4102 = vmatprep.subr.mxu1 %v4752_v0 }
 0x653   :  { %v1347_v59 = vsub.f32 1.0, %v1346_v56  ;;  %4103 = vmatpush3.msra.mxu1 %v3126_v54 }
 0x654   :  { %4104 = vmatprep.subr.mxu1 %v4752_v0 }
 0x655   :  { %v1349_v61 = vsub.f32 0.0, %v1347_v59  ;;  %4105 = vmatpush3.msra.mxu1 %v3123_v57  ;;  %v3546_v57 = vld [vmem:[#allocation11 + $0xb8] sm:$0xff]  }
 0x656   :  { %4106 = vmatprep.subr.mxu1 %v4752_v0 }
 0x657   :  { %v1350_v63 = vsel %vm1348_vm10, %v1347_v59, %v1349_v61  ;;  %4107 = vmatpush3.msra.mxu1 %v3122_v60  ;;  %v3243_v61 = vunpack.c.h.bf16 %v3546_v57 }
 0x658   :  { %v1351_v3 = vadd.f32 1.0, %v1350_v63  ;;  %4108 = vmatprep.subr.mxu1 %v4752_v0  ;;  %v3545_v63 = vld [vmem:[#allocation11 + $0xb0] sm:$0xff]  }
 0x659   :  { %4109 = vmatpush3.msra.mxu1 %v3119_v62 }
 0x65a   :  { %v1352_v5 = vmul.f32 %v1351_v3, %v1327_v2  ;;  %4110 = vmatprep.subr.mxu1 %v4752_v0  ;;  %v3239_v2 = vunpack.c.h.bf16 %v3545_v63  ;;  %v3544_v3 = vld [vmem:[#allocation11 + $0xa8] sm:$0xff]  }
 0x65b   :  { %4111 = vmatpush3.msra.mxu1 %v3118_v1  ;;  %v3242_v1 = vunpack.c.l.bf16 %v3546_v57  ;;  %v3235_v6 = vunpack.c.h.bf16 %v3544_v3  ;;  %v3234_v8 = vunpack.c.l.bf16 %v3544_v3 }
 0x65c   :  { %4113 = vmatmul.mubr.f32.vlgmr.msra.gmra.mxu1 %v1352_v5  ;;  %4150 = vmatprep.subr.mxu1 %v4752_v0  ;;  %v3238_v5 = vunpack.c.l.bf16 %v3545_v63  ;;  %v2845_v63 = vld [vmem:[%s5508_s8 + $0x2] ss:$0 sm:$0xff] }
 0x65d   :  { %4182 = vmatprep.mubr.msk.f32.mxu1 %vm4753_vm5, %v4752_v0  ;;  %4151 = vmatpush3.msra.mxu1 %v3211_v24  ;;  %v3275_v24 = vunpack.c.h.bf16 %v3553_v19 }
 0x65e   :  { %4152 = vmatprep.subr.mxu1 %v4752_v0 }
 0x65f   :  { %4153 = vmatpush3.msra.mxu1 %v3210_v25 }
 0x660   :  { %4154 = vmatprep.subr.mxu1 %v4752_v0 }
 0x661   :  { %4155 = vmatpush3.msra.mxu1 %v3207_v27 }
 0x662   :  { %4156 = vmatprep.subr.mxu1 %v4752_v0 }
 0x663   :  { %4157 = vmatpush3.msra.mxu1 %v3206_v28  ;;  %v3274_v28 = vunpack.c.l.bf16 %v3553_v19  ;;  %v3556_v19 = vld [vmem:[#allocation14 + $0x98] sm:$0xff]  }
 0x664   :  { %4158 = vmatprep.subr.mxu1 %v4752_v0 }
 0x6fc   :  { %v5203_v30 = vpop.f32.mrf.mxu1 }
 0x6fe   :  { %v4044_v31 = vpop.f32.mrf.mxu1 }
 0x6ff   :  { %v3203_v31 = vunpack.c.h.bf16 %v3537_v29 }
 0x701   :  { %4159 = vmatpush3.msra.mxu1 %v3203_v31 }
 0x702   :  { %4160 = vmatprep.subr.mxu1 %v4752_v0 }
 0x71c   :  { %v1460_v33 = vpop.f32.mrf.mxu1 }
 0x71d   :  { %v1461_v34 = vadd.f32 %v2823_v32, %v1460_v33  ;;  %v3202_v32 = vunpack.c.l.bf16 %v3537_v29  ;;  %v3536_v33 = vld [vmem:[%s5513_s13 + $0x60] sm:$0xff]   ;;  %v3271_v29 = vunpack.c.h.bf16 %v3552_v26 }
 0x71e   :  { %v4114_v35 = vpop.f32.mrf.mxu1 }
 0x71f   :  { %v1465_v36 = vmul.f32 0.70710677, %v1461_v34  ;;  %v1464_v59 = vmul.f32 0.5, %v1461_v34  ;;  %4161 = vmatpush3.msra.mxu1 %v3202_v32  ;;  %v3199_v34 = vunpack.c.h.bf16 %v3536_v33  ;;  %v3198_v35 = vunpack.c.l.bf16 %v3536_v33  ;;  %v3551_v32 = vld [vmem:[#allocation13 + $0xa8] sm:$0xff]  }
 0x720   :  { %4162 = vmatprep.subr.mxu1 %v4752_v0 }
 0x721   :  { %v1466_v37 = vand.u32 2147483647, %v1465_v36  ;;  %vm1485_vm11 = vcmp.ge.f32.partialorder %v1465_v36, 0.0  ;;  %4163 = vmatpush3.msra.mxu1 %v3199_v34  ;;  %v3535_v36 = vld [vmem:[%s5513_s13 + $0x58] sm:$0xff]  }
 0x722   :  { %4164 = vmatprep.subr.mxu1 %v4752_v0 }
 0x723   :  { %v1467_v38 = vmul.f32 0.3275911, %v1466_v37  ;;  %v1479_v40 = vsub.f32 0.0, %v1466_v37  ;;  %4165 = vmatpush3.msra.mxu1 %v3198_v35  ;;  %v3270_v35 = vunpack.c.l.bf16 %v3552_v26 }
 0x724   :  { %4166 = vmatprep.subr.mxu1 %v4752_v0 }
 0x725   :  { %v1468_v39 = vadd.f32 1.0, %v1467_v38  ;;  %v1480_v41 = vmul.f32 %v1479_v40, %v1466_v37  ;;  %v3195_v37 = vunpack.c.h.bf16 %v3535_v36  ;;  %v3194_v38 = vunpack.c.l.bf16 %v3535_v36 }
 0x727   :  { %4516 = vrcp.f32 %v1468_v39  ;;  %v1481_v44 = vmul.f32 1.442695, %v1480_v41  ;;  %4167 = vmatpush3.msra.mxu1 %v3195_v37  ;;  %v3534_v39 = vld [vmem:[%s5513_s13 + $0x50] sm:$0xff]   ;;  %v3267_v37 = vunpack.c.h.bf16 %v3551_v32 }
 0x728   :  { %4168 = vmatprep.subr.mxu1 %v4752_v0  ;;  %v3191_v40 = vunpack.c.h.bf16 %v3534_v39  ;;  %v3190_v41 = vunpack.c.l.bf16 %v3534_v39 }
 0x729   :  { %4518 = vpow2.f32 %v1481_v44  ;;  %4169 = vmatpush3.msra.mxu1 %v3194_v38  ;;  %v3550_v38 = vld [vmem:[#allocation13 + $0xa0] sm:$0xff]  }
 0x72a   :  { %4170 = vmatprep.subr.mxu1 %v4752_v0 }
 0x72b   :  { %4171 = vmatpush3.msra.mxu1 %v3191_v40  ;;  %v3266_v40 = vunpack.c.l.bf16 %v3551_v32  ;;  %v2843_v32 = vld [vmem:[%s5514_s14 + $0x1] ss:$0 sm:$0xff] }
 0x72c   :  { %4172 = vmatprep.subr.mxu1 %v4752_v0 }
 0x72d   :  { %4173 = vmatpush3.msra.mxu1 %v3190_v41 }
 0x72e   :  { %4174 = vmatprep.subr.mxu1 %v4752_v0 }
 0x734   :  { %v4517_v42 = vpop.eup %4516 }
 0x735   :  { %v1470_v43 = vmul.f32 1.0614054, %v4517_v42 }
 0x736   :  { %v4519_v51 = vpop.eup %4518 }
 0x737   :  { %v1471_v45 = vadd.f32 -1.4531521, %v1470_v43 }
 0x739   :  { %v1472_v46 = vmul.f32 %v4517_v42, %v1471_v45  ;;  %v3532_v45 = vld [vmem:[%s5513_s13 + $0x40] sm:$0xff]  }
 0x73b   :  { %v1473_v47 = vadd.f32 1.4214138, %v1472_v46  ;;  %v3183_v46 = vunpack.c.h.bf16 %v3532_v45 }
 0x73d   :  { %v1474_v50 = vmul.f32 %v4517_v42, %v1473_v47  ;;  %v3182_v47 = vunpack.c.l.bf16 %v3532_v45  ;;  %v3262_v45 = vunpack.c.l.bf16 %v3550_v38 }
 0x73f   :  { %v1475_v52 = vadd.f32 -0.28449672, %v1474_v50  ;;  %v2825_v50 = vld [vmem:[%s5512_s12 + $0x1] ss:$0 sm:$0xff] }
 0x741   :  { %v1476_v49 = vmul.f32 %v4517_v42, %v1475_v52 }
 0x743   :  { %v1477_v53 = vadd.f32 0.2548296, %v1476_v49 }
 0x745   :  { %v1478_v48 = vmul.f32 %v4517_v42, %v1477_v53  ;;  %v3533_v42 = vld [vmem:[%s5513_s13 + $0x48] sm:$0xff]  }
 0x746   :  { %v3187_v43 = vunpack.c.h.bf16 %v3533_v42  ;;  %v3186_v44 = vunpack.c.l.bf16 %v3533_v42  ;;  %v3263_v42 = vunpack.c.h.bf16 %v3550_v38 }
 0x747   :  { %v1483_v54 = vmul.f32 %v4519_v51, %v1478_v48 }
 0x748   :  { %4175 = vmatpush3.msra.mxu1 %v3187_v43  ;;  %v3549_v43 = vld [vmem:[#allocation13 + $0x98] sm:$0xff]  }
 0x749   :  { %v1484_v55 = vsub.f32 1.0, %v1483_v54  ;;  %4176 = vmatprep.subr.mxu1 %v4752_v0 }
 0x74a   :  { %4177 = vmatpush3.msra.mxu1 %v3186_v44 }
 0x74b   :  { %v1486_v56 = vsub.f32 0.0, %v1484_v55  ;;  %4178 = vmatprep.subr.mxu1 %v4752_v0 }
 0x74c   :  { %4179 = vmatpush3.msra.mxu1 %v3183_v46 }
 0x74d   :  { %v1487_v58 = vsel %vm1485_vm11, %v1484_v55, %v1486_v56  ;;  %4180 = vmatprep.subr.mxu1 %v4752_v0 }
 0x74e   :  { %v1488_v60 = vadd.f32 1.0, %v1487_v58  ;;  %4181 = vmatpush3.msra.mxu1 %v3182_v47  ;;  %v3259_v47 = vunpack.c.h.bf16 %v3549_v43 }
 0x74f   :  { %4220 = vmatprep.subr.mxu1 %v4752_v0 }
 0x750   :  { %v1489_v62 = vmul.f32 %v1488_v60, %v1464_v59 }
 0x752   :  { %4148 = vmatmul.mubr.f32.vlgmr.msra.gmra.mxu0 %v1489_v62 }
 0x753   :  { %4186 = vmatpush3.msra.mxu0 %v3243_v61  ;;  %4217 = vmatprep.mubr.msk.f32.mxu0 %vm4753_vm5, %v4752_v0 }
 0x754   :  { %4187 = vmatprep.subr.mxu0 %v4752_v0 }
 0x755   :  { %4188 = vmatpush3.msra.mxu0 %v3242_v1 }
 0x756   :  { %4189 = vmatprep.subr.mxu0 %v4752_v0 }
 0x757   :  { %4190 = vmatpush3.msra.mxu0 %v3239_v2 }
 0x758   :  { %4191 = vmatprep.subr.mxu0 %v4752_v0 }
 0x759   :  { %4192 = vmatpush3.msra.mxu0 %v3238_v5 }
 0x75a   :  { %4193 = vmatprep.subr.mxu0 %v4752_v0 }
 0x75b   :  { %4194 = vmatpush3.msra.mxu0 %v3235_v6 }
 0x75c   :  { %4195 = vmatprep.subr.mxu0 %v4752_v0 }
 0x75d   :  { %4196 = vmatpush3.msra.mxu0 %v3234_v8 }
 0x75e   :  { %4197 = vmatprep.subr.mxu0 %v4752_v0 }
 0x75f   :  { %4198 = vmatpush3.msra.mxu0 %v3231_v4 }
 0x760   :  { %4199 = vmatprep.subr.mxu0 %v4752_v0 }
 0x761   :  { %4200 = vmatpush3.msra.mxu0 %v3230_v10 }
 0x762   :  { %4201 = vmatprep.subr.mxu0 %v4752_v0 }
 0x763   :  { %4202 = vmatpush3.msra.mxu0 %v3227_v11 }
 0x764   :  { %4203 = vmatprep.subr.mxu0 %v4752_v0 }
 0x765   :  { %4204 = vmatpush3.msra.mxu0 %v3226_v13 }
 0x766   :  { %4205 = vmatprep.subr.mxu0 %v4752_v0 }
 0x767   :  { %4206 = vmatpush3.msra.mxu0 %v3223_v14 }
 0x768   :  { %4207 = vmatprep.subr.mxu0 %v4752_v0 }
 0x769   :  { %4208 = vmatpush3.msra.mxu0 %v3222_v16 }
 0x76a   :  { %4209 = vmatprep.subr.mxu0 %v4752_v0 }
 0x76b   :  { %4210 = vmatpush3.msra.mxu0 %v3219_v18 }
 0x76c   :  { %4211 = vmatprep.subr.mxu0 %v4752_v0 }
 0x76d   :  { %4212 = vmatpush3.msra.mxu0 %v3218_v20 }
 0x76e   :  { %4213 = vmatprep.subr.mxu0 %v4752_v0 }
 0x76f   :  { %4214 = vmatpush3.msra.mxu0 %v3215_v21 }
 0x770   :  { %4215 = vmatprep.subr.mxu0 %v4752_v0 }
 0x771   :  { %4216 = vmatpush3.msra.mxu0 %v3214_v22 }
 0x772   :  { %4218 = vmatmul.mubr.f32.vlgmr.msra.gmra.mxu0 %v5047_v17  ;;  %4255 = vmatprep.subr.mxu0 %v4752_v0 }
 0x773   :  { %4287 = vmatprep.mubr.msk.f32.mxu0 %vm4753_vm5, %v4752_v0 }
 0x812   :  { %v1597_v52 = vpop.f32.mrf.mxu0 }
 0x813   :  { %v1598_v49 = vadd.f32 %v2825_v50, %v1597_v52  ;;  %v3548_v50 = vld [vmem:[#allocation13 + $0x90] sm:$0xff]  }
 0x814   :  { %v4149_v53 = vpop.f32.mrf.mxu0 }
 0x815   :  { %v1602_v48 = vmul.f32 0.70710677, %v1598_v49  ;;  %v1601_v22 = vmul.f32 0.5, %v1598_v49  ;;  %v3258_v49 = vunpack.c.l.bf16 %v3549_v43 }
 0x817   :  { %v1603_v51 = vand.u32 2147483647, %v1602_v48  ;;  %vm1622_vm12 = vcmp.ge.f32.partialorder %v1602_v48, 0.0  ;;  %v3255_v48 = vunpack.c.h.bf16 %v3548_v50 }
 0x819   :  { %v1604_v54 = vmul.f32 0.3275911, %v1603_v51  ;;  %v1616_v56 = vsub.f32 0.0, %v1603_v51 }
 0x81b   :  { %v1605_v55 = vadd.f32 1.0, %v1604_v54  ;;  %v1617_v57 = vmul.f32 %v1616_v56, %v1603_v51  ;;  %v3547_v51 = vld [vmem:[#allocation13 + $0x88] sm:$0xff]  }
 0x81d   :  { %4520 = vrcp.f32 %v1605_v55  ;;  %v1618_v60 = vmul.f32 1.442695, %v1617_v57  ;;  %v3254_v55 = vunpack.c.l.bf16 %v3548_v50 }
 0x81f   :  { %4522 = vpow2.f32 %v1618_v60 }
 0x82a   :  { %v4521_v58 = vpop.eup %4520 }
 0x82b   :  { %v1607_v59 = vmul.f32 1.0614054, %v4521_v58 }
 0x82c   :  { %v4523_v14 = vpop.eup %4522 }
 0x82d   :  { %v1608_v61 = vadd.f32 -1.4531521, %v1607_v59  ;;  %v3245_v59 = vld [vmem:[#allocation13 + $0x80] sm:$0xff]  }
 0x82f   :  { %v1609_v62 = vmul.f32 %v4521_v58, %v1608_v61  ;;  %v3250_v61 = vunpack.c.l.bf16 %v3547_v51 }
 0x831   :  { %v1610_v1 = vadd.f32 1.4214138, %v1609_v62 }
 0x832   :  { %v1845_v2 = vpop.f32.mrf.mxu0 }
 0x833   :  { %v1611_v3 = vmul.f32 %v4521_v58, %v1610_v1  ;;  %v5275_v5 = vadd.f32 %v2845_v63, %v1845_v2  ;;  %v3247_v63 = vunpack.c.h.bf16 %v3245_v59  ;;  %v3246_v2 = vunpack.c.l.bf16 %v3245_v59 }
 0x834   :  { %v4219_v6 = vpop.f32.mrf.mxu0 }
 0x835   :  { %v1612_v7 = vadd.f32 -0.28449672, %v1611_v3  ;;  %v5278_v8 = vmul.f32 0.70710677, %v5275_v5  ;;  %v1849_v3 = vmul.f32 0.5, %v5275_v5  ;;  %v3559_v5 = vld [vmem:[#allocation14 + $0xb0] sm:$0xff]  }
 0x837   :  { %v1613_v4 = vmul.f32 %v4521_v58, %v1612_v7  ;;  %v1851_v9 = vand.u32 2147483647, %v5278_v8  ;;  %vm1870_vm13 = vcmp.ge.f32.partialorder %v5278_v8, 0.0  ;;  %v3560_v8 = vld [vmem:[#allocation14 + $0xb8] sm:$0xff]  }
 0x839   :  { %v1614_v10 = vadd.f32 0.2548296, %v1613_v4  ;;  %v1852_v11 = vmul.f32 0.3275911, %v1851_v9  ;;  %v1864_v21 = vsub.f32 0.0, %v1851_v9  ;;  %v3307_v4 = vunpack.c.h.bf16 %v3560_v8 }
 0x83b   :  { %v1615_v12 = vmul.f32 %v4521_v58, %v1614_v10  ;;  %v1853_v13 = vadd.f32 1.0, %v1852_v11  ;;  %v1865_v27 = vmul.f32 %v1864_v21, %v1851_v9  ;;  %v3251_v58 = vunpack.c.h.bf16 %v3547_v51  ;;  %4256 = vmatpush3.msra.mxu0 %v3307_v4  ;;  %v3573_v4 = vld [vmem:[#allocation11 + $0xe8] sm:$0xff]  }
 0x83c   :  { %v3306_v9 = vunpack.c.l.bf16 %v3560_v8  ;;  %4257 = vmatprep.subr.mxu0 %v4752_v0  ;;  %v3303_v10 = vunpack.c.h.bf16 %v3559_v5  ;;  %v3302_v11 = vunpack.c.l.bf16 %v3559_v5  ;;  %v3290_v21 = vunpack.c.l.bf16 %v3556_v19 }
 0x83d   :  { %v1620_v15 = vmul.f32 %v4523_v14, %v1615_v12  ;;  %4524 = vrcp.f32 %v1853_v13  ;;  %v1866_v34 = vmul.f32 1.442695, %v1865_v27  ;;  %v3558_v12 = vld [vmem:[#allocation14 + $0xa8] sm:$0xff]   ;;  %v3363_v5 = vunpack.c.h.bf16 %v3573_v4 }
 0x83e   :  { %4258 = vmatpush3.msra.mxu0 %v3306_v9  ;;  %v3299_v13 = vunpack.c.h.bf16 %v3558_v12  ;;  %v3298_v14 = vunpack.c.l.bf16 %v3558_v12 }
 0x83f   :  { %v1621_v16 = vsub.f32 1.0, %v1620_v15  ;;  %4526 = vpow2.f32 %v1866_v34  ;;  %4259 = vmatprep.subr.mxu0 %v4752_v0  ;;  %v3557_v15 = vld [vmem:[#allocation14 + $0xa0] sm:$0xff]  }
 0x840   :  { %4260 = vmatpush3.msra.mxu0 %v3303_v10  ;;  %v3572_v10 = vld [vmem:[#allocation11 + $0xe0] sm:$0xff]  }
 0x841   :  { %v1623_v18 = vsub.f32 0.0, %v1621_v16  ;;  %4261 = vmatprep.subr.mxu0 %v4752_v0  ;;  %v3359_v12 = vunpack.c.h.bf16 %v3572_v10 }
 0x842   :  { %4262 = vmatpush3.msra.mxu0 %v3302_v11  ;;  %v3362_v11 = vunpack.c.l.bf16 %v3573_v4 }
 0x843   :  { %v1624_v20 = vsel %vm1622_vm12, %v1621_v16, %v1623_v18  ;;  %4263 = vmatprep.subr.mxu0 %v4752_v0  ;;  %v3295_v16 = vunpack.c.h.bf16 %v3557_v15  ;;  %v3294_v18 = vunpack.c.l.bf16 %v3557_v15 }
 0x844   :  { %v1625_v23 = vadd.f32 1.0, %v1624_v20  ;;  %4264 = vmatpush3.msra.mxu0 %v3299_v13  ;;  %v3291_v20 = vunpack.c.h.bf16 %v3556_v19  ;;  %v3571_v13 = vld [vmem:[#allocation11 + $0xd8] sm:$0xff]  }
 0x845   :  { %4265 = vmatprep.subr.mxu0 %v4752_v0  ;;  %v3355_v15 = vunpack.c.h.bf16 %v3571_v13 }
 0x846   :  { %v1626_v25 = vmul.f32 %v1625_v23, %v1601_v22  ;;  %4266 = vmatpush3.msra.mxu0 %v3298_v14  ;;  %v3555_v22 = vld [vmem:[#allocation14 + $0x90] sm:$0xff]   ;;  %v3358_v14 = vunpack.c.l.bf16 %v3572_v10 }
 0x847   :  { %4267 = vmatprep.subr.mxu0 %v4752_v0  ;;  %v3287_v23 = vunpack.c.h.bf16 %v3555_v22 }
 0x848   :  { %4183 = vmatmul.mubr.f32.vlgmr.msra.gmra.mxu1 %v1626_v25  ;;  %4268 = vmatpush3.msra.mxu0 %v3295_v16  ;;  %v3554_v25 = vld [vmem:[#allocation14 + $0x88] sm:$0xff]   ;;  %v3570_v16 = vld [vmem:[#allocation11 + $0xd0] sm:$0xff]  }
 0x849   :  { %4221 = vmatpush3.msra.mxu1 %v3275_v24  ;;  %4252 = vmatprep.mubr.msk.f32.mxu1 %vm4753_vm5, %v4752_v0  ;;  %v3286_v24 = vunpack.c.l.bf16 %v3555_v22  ;;  %v3283_v26 = vunpack.c.h.bf16 %v3554_v25  ;;  %v3282_v27 = vunpack.c.l.bf16 %v3554_v25  ;;  %v3351_v19 = vunpack.c.h.bf16 %v3570_v16 }
 0x84a   :  { %v4525_v31 = vpop.eup %4524  ;;  %4222 = vmatprep.subr.mxu1 %v4752_v0  ;;  %4269 = vmatprep.subr.mxu0 %v4752_v0 }
 0x84b   :  { %v1855_v33 = vmul.f32 1.0614054, %v4525_v31  ;;  %4223 = vmatpush3.msra.mxu1 %v3274_v28  ;;  %4270 = vmatpush3.msra.mxu0 %v3294_v18  ;;  %v3277_v28 = vld [vmem:[#allocation14 + $0x80] sm:$0xff]   ;;  %v3354_v18 = vunpack.c.l.bf16 %v3571_v13 }
 0x84c   :  { %4224 = vmatprep.subr.mxu1 %v4752_v0  ;;  %v4527_v56 = vpop.eup %4526  ;;  %4271 = vmatprep.subr.mxu0 %v4752_v0 }
 0x84d   :  { %v1856_v36 = vadd.f32 -1.4531521, %v1855_v33  ;;  %4225 = vmatpush3.msra.mxu1 %v3271_v29  ;;  %4272 = vmatpush3.msra.mxu0 %v3291_v20  ;;  %v3279_v29 = vunpack.c.h.bf16 %v3277_v28  ;;  %v3569_v20 = vld [vmem:[#allocation11 + $0xc8] sm:$0xff]  }
 0x84e   :  { %4226 = vmatprep.subr.mxu1 %v4752_v0  ;;  %4273 = vmatprep.subr.mxu0 %v4752_v0  ;;  %v3347_v22 = vunpack.c.h.bf16 %v3569_v20 }
 0x84f   :  { %v1857_v39 = vmul.f32 %v4525_v31, %v1856_v36  ;;  %4227 = vmatpush3.msra.mxu1 %v3270_v35  ;;  %4274 = vmatpush3.msra.mxu0 %v3290_v21  ;;  %v2847_v36 = vld [vmem:[%s5510_s10 + $0x2] ss:$0 sm:$0xff]  ;;  %v3350_v21 = vunpack.c.l.bf16 %v3570_v16 }
 0x850   :  { %4228 = vmatprep.subr.mxu1 %v4752_v0  ;;  %4275 = vmatprep.subr.mxu0 %v4752_v0 }
 0x851   :  { %v1858_v41 = vadd.f32 1.4214138, %v1857_v39  ;;  %4229 = vmatpush3.msra.mxu1 %v3267_v37  ;;  %4276 = vmatpush3.msra.mxu0 %v3287_v23  ;;  %v3341_v23 = vld [vmem:[#allocation11 + $0xc0] sm:$0xff]  }
 0x852   :  { %4230 = vmatprep.subr.mxu1 %v4752_v0  ;;  %4277 = vmatprep.subr.mxu0 %v4752_v0  ;;  %v3343_v25 = vunpack.c.h.bf16 %v3341_v23 }
 0x853   :  { %v1859_v44 = vmul.f32 %v4525_v31, %v1858_v41  ;;  %4231 = vmatpush3.msra.mxu1 %v3266_v40  ;;  %4278 = vmatpush3.msra.mxu0 %v3286_v24  ;;  %v3346_v24 = vunpack.c.l.bf16 %v3569_v20 }
 0x854   :  { %4232 = vmatprep.subr.mxu1 %v4752_v0  ;;  %4279 = vmatprep.subr.mxu0 %v4752_v0 }
 0x855   :  { %v1860_v46 = vadd.f32 -0.28449672, %v1859_v44  ;;  %4233 = vmatpush3.msra.mxu1 %v3263_v42  ;;  %4280 = vmatpush3.msra.mxu0 %v3283_v26  ;;  %v2819_v26 = vld [vmem:[%s5514_s14] ss:$0 sm:$0xff] }
 0x856   :  { %4234 = vmatprep.subr.mxu1 %v4752_v0  ;;  %4281 = vmatprep.subr.mxu0 %v4752_v0 }
 0x857   :  { %v1861_v52 = vmul.f32 %v4525_v31, %v1860_v46  ;;  %4235 = vmatpush3.msra.mxu1 %v3262_v45  ;;  %4282 = vmatpush3.msra.mxu0 %v3282_v27  ;;  %v3342_v27 = vunpack.c.l.bf16 %v3341_v23 }
 0x858   :  { %4236 = vmatprep.subr.mxu1 %v4752_v0  ;;  %4283 = vmatprep.subr.mxu0 %v4752_v0 }
 0x859   :  { %v1862_v53 = vadd.f32 0.2548296, %v1861_v52  ;;  %4237 = vmatpush3.msra.mxu1 %v3259_v47  ;;  %4284 = vmatpush3.msra.mxu0 %v3279_v29 }
 0x85a   :  { %4238 = vmatprep.subr.mxu1 %v4752_v0  ;;  %4285 = vmatprep.subr.mxu0 %v4752_v0 }
 0x85b   :  { %v1863_v54 = vmul.f32 %v4525_v31, %v1862_v53  ;;  %4239 = vmatpush3.msra.mxu1 %v3258_v49  ;;  %v3278_v31 = vunpack.c.l.bf16 %v3277_v28  ;;  %v1213_v28 = vadd.f32 %v2819_v26, %v5203_v30 }
 0x85c   :  { %4240 = vmatprep.subr.mxu1 %v4752_v0 }
 0x85d   :  { %v1868_v57 = vmul.f32 %v4527_v56, %v1863_v54  ;;  %4241 = vmatpush3.msra.mxu1 %v3255_v48  ;;  %4286 = vmatpush3.msra.mxu0 %v3278_v31 }
 0x85e   :  { %4242 = vmatprep.subr.mxu1 %v4752_v0  ;;  %4325 = vmatprep.subr.mxu0 %v4752_v0 }
 0x85f   :  { %v1869_v60 = vsub.f32 1.0, %v1868_v57  ;;  %4243 = vmatpush3.msra.mxu1 %v3254_v55 }
 0x860   :  { %4244 = vmatprep.subr.mxu1 %v4752_v0 }
 0x861   :  { %v1871_v62 = vsub.f32 0.0, %v1869_v60  ;;  %4245 = vmatpush3.msra.mxu1 %v3251_v58 }
 0x862   :  { %4246 = vmatprep.subr.mxu1 %v4752_v0 }
 0x863   :  { %v1872_v1 = vsel %vm1870_vm13, %v1869_v60, %v1871_v62  ;;  %4247 = vmatpush3.msra.mxu1 %v3250_v61  ;;  %v3575_v61 = vld [vmem:[#allocation11 + $0xf8] sm:$0xff]  }
 0x864   :  { %v1873_v6 = vadd.f32 1.0, %v1872_v1  ;;  %4248 = vmatprep.subr.mxu1 %v4752_v0 }
 0x865   :  { %4249 = vmatpush3.msra.mxu1 %v3247_v63 }
 0x866   :  { %v1874_v7 = vmul.f32 %v1873_v6, %v1849_v3  ;;  %4250 = vmatprep.subr.mxu1 %v4752_v0  ;;  %v3574_v6 = vld [vmem:[#allocation11 + $0xf0] sm:$0xff]  }
 0x867   :  { %4251 = vmatpush3.msra.mxu1 %v3246_v2  ;;  %v3371_v2 = vunpack.c.h.bf16 %v3575_v61  ;;  %v3367_v8 = vunpack.c.h.bf16 %v3574_v6  ;;  %v3366_v9 = vunpack.c.l.bf16 %v3574_v6 }
 0x868   :  { %4253 = vmatmul.mubr.f32.vlgmr.msra.gmra.mxu1 %v1874_v7  ;;  %4290 = vmatprep.subr.mxu1 %v4752_v0  ;;  %v3370_v7 = vunpack.c.l.bf16 %v3575_v61 }
 0x869   :  { %4322 = vmatprep.mubr.msk.f32.mxu1 %vm4753_vm5, %v4752_v0 }
 0x908   :  { %v1734_v33 = vpop.f32.mrf.mxu1 }
 0x909   :  { %v1735_v34 = vadd.f32 %v2843_v32, %v1734_v33  ;;  %v3568_v32 = vld [vmem:[%s5513_s13 + $0xb8] sm:$0xff]  }
 0x90a   :  { %v4184_v35 = vpop.f32.mrf.mxu1  ;;  %v3339_v33 = vunpack.c.h.bf16 %v3568_v32  ;;  %v3338_v30 = vunpack.c.l.bf16 %v3568_v32 }
 0x90b   :  { %2783 = vrot.lane.b32.xlu0 %v1735_v34, %s4745_s1 }
 0x90c   :  { %4291 = vmatpush3.msra.mxu1 %v3339_v33  ;;  %v3581_v33 = vld [vmem:[#allocation13 + $0xf0] sm:$0xff]  }
 0x90d   :  { %4292 = vmatprep.subr.mxu1 %v4752_v0 }
 0x90e   :  { %4293 = vmatpush3.msra.mxu1 %v3338_v30 }
 0x90f   :  { %4294 = vmatprep.subr.mxu1 %v4752_v0 }
 0x928   :  { %v1982_v37 = vpop.f32.mrf.mxu1 }
 0x929   :  { %v1983_v38 = vadd.f32 %v2847_v36, %v1982_v37  ;;  %v3566_v36 = vld [vmem:[%s5513_s13 + $0xa8] sm:$0xff]  }
 0x92a   :  { %v4254_v39 = vpop.f32.mrf.mxu1  ;;  %v3331_v37 = vunpack.c.h.bf16 %v3566_v36 }
 0x92b   :  { %v1987_v40 = vmul.f32 0.70710677, %v1983_v38  ;;  %v1986_v63 = vmul.f32 0.5, %v1983_v38  ;;  %v3330_v38 = vunpack.c.l.bf16 %v3566_v36  ;;  %v3565_v39 = vld [vmem:[%s5513_s13 + $0xa0] sm:$0xff]   ;;  %v3580_v36 = vld [vmem:[#allocation13 + $0xe8] sm:$0xff]  }
 0x92d   :  { %v1988_v41 = vand.u32 2147483647, %v1987_v40  ;;  %vm2007_vm14 = vcmp.ge.f32.partialorder %v1987_v40, 0.0  ;;  %v3327_v40 = vunpack.c.h.bf16 %v3565_v39 }
 0x92f   :  { %v1989_v42 = vmul.f32 0.3275911, %v1988_v41  ;;  %v2001_v44 = vsub.f32 0.0, %v1988_v41 }
 0x931   :  { %v1990_v43 = vadd.f32 1.0, %v1989_v42  ;;  %v2002_v45 = vmul.f32 %v2001_v44, %v1988_v41  ;;  %v3326_v41 = vunpack.c.l.bf16 %v3565_v39  ;;  %v3564_v42 = vld [vmem:[%s5513_s13 + $0x98] sm:$0xff]   ;;  %v3398_v39 = vunpack.c.l.bf16 %v3581_v33 }
 0x932   :  { %v3322_v44 = vunpack.c.l.bf16 %v3564_v42 }
 0x933   :  { %4528 = vrcp.f32 %v1990_v43  ;;  %v2003_v50 = vmul.f32 1.442695, %v2002_v45  ;;  %v3323_v43 = vunpack.c.h.bf16 %v3564_v42  ;;  %v3563_v45 = vld [vmem:[%s5513_s13 + $0x90] sm:$0xff]  }
 0x934   :  { %v3579_v42 = vld [vmem:[#allocation13 + $0xe0] sm:$0xff]  }
 0x935   :  { %4530 = vpow2.f32 %v2003_v50  ;;  %v3562_v50 = vld [vmem:[%s5513_s13 + $0x88] sm:$0xff]  }
 0x940   :  { %v4529_v46 = vpop.eup %4528 }
 0x941   :  { %v1992_v47 = vmul.f32 1.0614054, %v4529_v46 }
 0x942   :  { %v4531_v57 = vpop.eup %4530 }
 0x943   :  { %v1993_v52 = vadd.f32 -1.4531521, %v1992_v47  ;;  %v3318_v47 = vunpack.c.l.bf16 %v3563_v45 }
 0x945   :  { %v1994_v49 = vmul.f32 %v4529_v46, %v1993_v52  ;;  %v3315_v52 = vunpack.c.h.bf16 %v3562_v50 }
 0x947   :  { %v1995_v53 = vadd.f32 1.4214138, %v1994_v49  ;;  %v3314_v49 = vunpack.c.l.bf16 %v3562_v50 }
 0x949   :  { %v1996_v48 = vmul.f32 %v4529_v46, %v1995_v53  ;;  %v3561_v53 = vld [vmem:[%s5513_s13 + $0x80] sm:$0xff]  }
 0x94b   :  { %v1997_v51 = vadd.f32 -0.28449672, %v1996_v48  ;;  %v3311_v48 = vunpack.c.h.bf16 %v3561_v53 }
 0x94d   :  { %v1998_v54 = vmul.f32 %v4529_v46, %v1997_v51  ;;  %v3310_v51 = vunpack.c.l.bf16 %v3561_v53 }
 0x94f   :  { %v1999_v55 = vadd.f32 0.2548296, %v1998_v54  ;;  %v2849_v54 = vld [vmem:[%s5512_s12 + $0x2] ss:$0 sm:$0xff] }
 0x951   :  { %v2000_v56 = vmul.f32 %v4529_v46, %v1999_v55  ;;  %v3319_v46 = vunpack.c.h.bf16 %v3563_v45 }
 0x953   :  { %v2005_v58 = vmul.f32 %v4531_v57, %v2000_v56 }
 0x955   :  { %v2006_v59 = vsub.f32 1.0, %v2005_v58 }
 0x957   :  { %v2008_v60 = vsub.f32 0.0, %v2006_v59 }
 0x959   :  { %v2009_v62 = vsel %vm2007_vm14, %v2006_v59, %v2008_v60 }
 0x95a   :  { %v2010_v1 = vadd.f32 1.0, %v2009_v62 }
 0x95c   :  { %v2011_v3 = vmul.f32 %v2010_v1, %v1986_v63 }
 0x95e   :  { %4288 = vmatmul.mubr.f32.vlgmr.msra.gmra.mxu0 %v2011_v3 }
 0x95f   :  { %4326 = vmatpush3.msra.mxu0 %v3371_v2  ;;  %4357 = vmatprep.mubr.msk.f32.mxu0 %vm4753_vm5, %v4752_v0 }
 0x960   :  { %4327 = vmatprep.subr.mxu0 %v4752_v0 }
 0x961   :  { %4328 = vmatpush3.msra.mxu0 %v3370_v7 }
 0x962   :  { %4329 = vmatprep.subr.mxu0 %v4752_v0 }
 0x963   :  { %4330 = vmatpush3.msra.mxu0 %v3367_v8  ;;  %v2869_v8 = vld [vmem:[%s5508_s8 + $0x3] ss:$0 sm:$0xff] }
 0x964   :  { %4331 = vmatprep.subr.mxu0 %v4752_v0 }
 0x965   :  { %4332 = vmatpush3.msra.mxu0 %v3366_v9 }
 0x966   :  { %4333 = vmatprep.subr.mxu0 %v4752_v0 }
 0x967   :  { %4334 = vmatpush3.msra.mxu0 %v3363_v5 }
 0x968   :  { %4335 = vmatprep.subr.mxu0 %v4752_v0 }
 0x969   :  { %4336 = vmatpush3.msra.mxu0 %v3362_v11 }
 0x96a   :  { %4337 = vmatprep.subr.mxu0 %v4752_v0 }
 0x96b   :  { %4338 = vmatpush3.msra.mxu0 %v3359_v12 }
 0x96c   :  { %4339 = vmatprep.subr.mxu0 %v4752_v0 }
 0x96d   :  { %4340 = vmatpush3.msra.mxu0 %v3358_v14 }
 0x96e   :  { %4341 = vmatprep.subr.mxu0 %v4752_v0 }
 0x96f   :  { %4342 = vmatpush3.msra.mxu0 %v3355_v15 }
 0x970   :  { %4343 = vmatprep.subr.mxu0 %v4752_v0 }
 0x971   :  { %4344 = vmatpush3.msra.mxu0 %v3354_v18 }
 0x972   :  { %4345 = vmatprep.subr.mxu0 %v4752_v0 }
 0x973   :  { %4346 = vmatpush3.msra.mxu0 %v3351_v19 }
 0x974   :  { %4347 = vmatprep.subr.mxu0 %v4752_v0 }
 0x975   :  { %4348 = vmatpush3.msra.mxu0 %v3350_v21 }
 0x976   :  { %4349 = vmatprep.subr.mxu0 %v4752_v0 }
 0x977   :  { %4350 = vmatpush3.msra.mxu0 %v3347_v22 }
 0x978   :  { %4351 = vmatprep.subr.mxu0 %v4752_v0 }
 0x979   :  { %4352 = vmatpush3.msra.mxu0 %v3346_v24 }
 0x97a   :  { %4353 = vmatprep.subr.mxu0 %v4752_v0 }
 0x97b   :  { %4354 = vmatpush3.msra.mxu0 %v3343_v25  ;;  %v3582_v25 = vld [vmem:[#allocation13 + $0xf8] sm:$0xff]  }
 0x97c   :  { %4355 = vmatprep.subr.mxu0 %v4752_v0 }
 0x97d   :  { %4356 = vmatpush3.msra.mxu0 %v3342_v27  ;;  %v2784_v29 = vpop.permute.xlu0 %2783 }
 0x97e   :  { %4358 = vmatmul.mubr.f32.vlgmr.msra.gmra.mxu0 %v5047_v17  ;;  %v2791_v31 = vsel %vm2790_vm15, %v1213_v28, %v2784_v29  ;;  %4395 = vmatprep.subr.mxu0 %v4752_v0  ;;  %v3567_v17 = vld [vmem:[%s5513_s13 + $0xb0] sm:$0xff]  }
 0x97f   :  { %2793 = vst [vmem:[#allocation16] sm:$0xff] %v2791_v31  ;;  %4427 = vmatprep.mubr.msk.f32.mxu0 %vm4753_vm5, %v4752_v0  ;;  %v3335_v34 = vunpack.c.h.bf16 %v3567_v17  ;;  %v3334_v35 = vunpack.c.l.bf16 %v3567_v17  ;;  %v3403_v31 = vunpack.c.h.bf16 %v3582_v25  ;;  %v3402_v17 = vunpack.c.l.bf16 %v3582_v25 }
 0x981   :  { %4295 = vmatpush3.msra.mxu1 %v3335_v34  ;;  %v3399_v34 = vunpack.c.h.bf16 %v3581_v33  ;;  %v3405_v33 = vld [vmem:[#allocation14 + $0xc0] sm:$0xff]  }
 0x982   :  { %4296 = vmatprep.subr.mxu1 %v4752_v0 }
 0x983   :  { %4297 = vmatpush3.msra.mxu1 %v3334_v35 }
 0x984   :  { %4298 = vmatprep.subr.mxu1 %v4752_v0 }
 0x985   :  { %4299 = vmatpush3.msra.mxu1 %v3331_v37 }
 0x986   :  { %4300 = vmatprep.subr.mxu1 %v4752_v0 }
 0x987   :  { %4301 = vmatpush3.msra.mxu1 %v3330_v38 }
 0x988   :  { %4302 = vmatprep.subr.mxu1 %v4752_v0 }
 0x989   :  { %4303 = vmatpush3.msra.mxu1 %v3327_v40 }
 0x98a   :  { %4304 = vmatprep.subr.mxu1 %v4752_v0 }
 0x98b   :  { %4305 = vmatpush3.msra.mxu1 %v3326_v41  ;;  %v3395_v41 = vunpack.c.h.bf16 %v3580_v36 }
 0x98c   :  { %4306 = vmatprep.subr.mxu1 %v4752_v0 }
 0x98d   :  { %4307 = vmatpush3.msra.mxu1 %v3323_v43 }
 0x98e   :  { %4308 = vmatprep.subr.mxu1 %v4752_v0 }
 0x98f   :  { %4309 = vmatpush3.msra.mxu1 %v3322_v44  ;;  %v3394_v44 = vunpack.c.l.bf16 %v3580_v36  ;;  %v2871_v36 = vld [vmem:[%s5510_s10 + $0x3] ss:$0 sm:$0xff] }
 0x990   :  { %4310 = vmatprep.subr.mxu1 %v4752_v0 }
 0x991   :  { %4311 = vmatpush3.msra.mxu1 %v3319_v46  ;;  %v3391_v46 = vunpack.c.h.bf16 %v3579_v42 }
 0x992   :  { %4312 = vmatprep.subr.mxu1 %v4752_v0 }
 0x993   :  { %4313 = vmatpush3.msra.mxu1 %v3318_v47  ;;  %v3578_v47 = vld [vmem:[#allocation13 + $0xd8] sm:$0xff]  }
 0x994   :  { %4314 = vmatprep.subr.mxu1 %v4752_v0  ;;  %v3387_v53 = vunpack.c.h.bf16 %v3578_v47 }
 0x995   :  { %4315 = vmatpush3.msra.mxu1 %v3315_v52  ;;  %v3390_v52 = vunpack.c.l.bf16 %v3579_v42 }
 0x996   :  { %4316 = vmatprep.subr.mxu1 %v4752_v0 }
 0x997   :  { %4317 = vmatpush3.msra.mxu1 %v3314_v49 }
 0x998   :  { %4318 = vmatprep.subr.mxu1 %v4752_v0 }
 0x999   :  { %4319 = vmatpush3.msra.mxu1 %v3311_v48  ;;  %v3577_v48 = vld [vmem:[#allocation13 + $0xd0] sm:$0xff]  }
 0x99a   :  { %4320 = vmatprep.subr.mxu1 %v4752_v0 }
 0x99b   :  { %4321 = vmatpush3.msra.mxu1 %v3310_v51 }
 0x99c   :  { %4360 = vmatprep.subr.mxu1 %v4752_v0 }
 0xa1e   :  { %v2119_v55 = vpop.f32.mrf.mxu0 }
 0xa1f   :  { %v2120_v56 = vadd.f32 %v2849_v54, %v2119_v55  ;;  %v3386_v54 = vunpack.c.l.bf16 %v3578_v47 }
 0xa20   :  { %v4289_v57 = vpop.f32.mrf.mxu0 }
 0xa21   :  { %v2124_v58 = vmul.f32 0.70710677, %v2120_v56  ;;  %v2123_v28 = vmul.f32 0.5, %v2120_v56  ;;  %v3383_v56 = vunpack.c.h.bf16 %v3577_v48  ;;  %v3576_v57 = vld [vmem:[#allocation13 + $0xc8] sm:$0xff]  }
 0xa23   :  { %v2125_v59 = vand.u32 2147483647, %v2124_v58  ;;  %vm2144_vm0 = vcmp.ge.f32.partialorder %v2124_v58, 0.0 }
 0xa25   :  { %v2126_v60 = vmul.f32 0.3275911, %v2125_v59  ;;  %v2138_v62 = vsub.f32 0.0, %v2125_v59 }
 0xa27   :  { %v2127_v61 = vadd.f32 1.0, %v2126_v60  ;;  %v2139_v63 = vmul.f32 %v2138_v62, %v2125_v59  ;;  %v3382_v59 = vunpack.c.l.bf16 %v3577_v48  ;;  %v3379_v62 = vunpack.c.h.bf16 %v3576_v57 }
 0xa29   :  { %4532 = vrcp.f32 %v2127_v61  ;;  %v2140_v3 = vmul.f32 1.442695, %v2139_v63  ;;  %v3373_v63 = vld [vmem:[#allocation13 + $0xc0] sm:$0xff]  }
 0xa2b   :  { %4534 = vpow2.f32 %v2140_v3 }
 0xa36   :  { %v4533_v1 = vpop.eup %4532 }
 0xa37   :  { %v2129_v2 = vmul.f32 1.0614054, %v4533_v1 }
 0xa38   :  { %v4535_v21 = vpop.eup %4534 }
 0xa39   :  { %v2130_v6 = vadd.f32 -1.4531521, %v2129_v2  ;;  %v3378_v2 = vunpack.c.l.bf16 %v3576_v57 }
 0xa3b   :  { %v2131_v7 = vmul.f32 %v4533_v1, %v2130_v6  ;;  %v3375_v6 = vunpack.c.h.bf16 %v3373_v63 }
 0xa3d   :  { %v2132_v4 = vadd.f32 1.4214138, %v2131_v7 }
 0xa3e   :  { %v2367_v9 = vpop.f32.mrf.mxu0 }
 0xa3f   :  { %v2133_v5 = vmul.f32 %v4533_v1, %v2132_v4  ;;  %v5398_v10 = vadd.f32 %v2869_v8, %v2367_v9  ;;  %v3374_v8 = vunpack.c.l.bf16 %v3373_v63 }
 0xa40   :  { %v4359_v11 = vpop.f32.mrf.mxu0 }
 0xa41   :  { %v2134_v12 = vadd.f32 -0.28449672, %v2133_v5  ;;  %v5401_v13 = vmul.f32 0.70710677, %v5398_v10  ;;  %v2371_v4 = vmul.f32 0.5, %v5398_v10  ;;  %v3589_v11 = vld [vmem:[#allocation14 + $0xf8] sm:$0xff]  }
 0xa42   :  { %v3588_v10 = vld [vmem:[#allocation14 + $0xf0] sm:$0xff]  }
 0xa43   :  { %v2135_v14 = vmul.f32 %v4533_v1, %v2134_v12  ;;  %v2373_v15 = vand.u32 2147483647, %v5401_v13  ;;  %vm2392_vm1 = vcmp.ge.f32.partialorder %v5401_v13, 0.0  ;;  %v3435_v12 = vunpack.c.h.bf16 %v3589_v11 }
 0xa44   :  { %v3434_v13 = vunpack.c.l.bf16 %v3589_v11 }
 0xa45   :  { %v2136_v16 = vadd.f32 0.2548296, %v2135_v14  ;;  %v2374_v18 = vmul.f32 0.3275911, %v2373_v15  ;;  %v2386_v27 = vsub.f32 0.0, %v2373_v15  ;;  %4396 = vmatpush3.msra.mxu0 %v3435_v12  ;;  %v3431_v14 = vunpack.c.h.bf16 %v3588_v10  ;;  %v3594_v12 = vld [vmem:[%s5513_s13 + $0xe0] sm:$0xff]  }
 0xa46   :  { %4397 = vmatprep.subr.mxu0 %v4752_v0 }
 0xa47   :  { %v2137_v19 = vmul.f32 %v4533_v1, %v2136_v16  ;;  %v2375_v20 = vadd.f32 1.0, %v2374_v18  ;;  %v2387_v30 = vmul.f32 %v2386_v27, %v2373_v15  ;;  %4398 = vmatpush3.msra.mxu0 %v3434_v13  ;;  %v3430_v15 = vunpack.c.l.bf16 %v3588_v10  ;;  %v3587_v16 = vld [vmem:[#allocation14 + $0xe8] sm:$0xff]  }
 0xa48   :  { %4399 = vmatprep.subr.mxu0 %v4752_v0  ;;  %v3427_v18 = vunpack.c.h.bf16 %v3587_v16  ;;  %v3455_v13 = vunpack.c.h.bf16 %v3594_v12  ;;  %v3454_v10 = vunpack.c.l.bf16 %v3594_v12 }
 0xa49   :  { %v2142_v22 = vmul.f32 %v4535_v21, %v2137_v19  ;;  %4536 = vrcp.f32 %v2375_v20  ;;  %v2388_v38 = vmul.f32 1.442695, %v2387_v30  ;;  %4400 = vmatpush3.msra.mxu0 %v3431_v14  ;;  %v3426_v19 = vunpack.c.l.bf16 %v3587_v16  ;;  %v3586_v20 = vld [vmem:[#allocation14 + $0xe0] sm:$0xff]   ;;  %v3593_v14 = vld [vmem:[%s5513_s13 + $0xd8] sm:$0xff]  }
 0xa4a   :  { %4401 = vmatprep.subr.mxu0 %v4752_v0  ;;  %v3423_v21 = vunpack.c.h.bf16 %v3586_v20  ;;  %v3407_v30 = vunpack.c.h.bf16 %v3405_v33  ;;  %v3450_v16 = vunpack.c.l.bf16 %v3593_v14 }
 0xa4b   :  { %v2143_v23 = vsub.f32 1.0, %v2142_v22  ;;  %4538 = vpow2.f32 %v2388_v38  ;;  %4402 = vmatpush3.msra.mxu0 %v3430_v15  ;;  %v3422_v22 = vunpack.c.l.bf16 %v3586_v20  ;;  %v3451_v15 = vunpack.c.h.bf16 %v3593_v14 }
 0xa4c   :  { %4403 = vmatprep.subr.mxu0 %v4752_v0 }
 0xa4d   :  { %v2145_v24 = vsub.f32 0.0, %v2143_v23  ;;  %4404 = vmatpush3.msra.mxu0 %v3427_v18  ;;  %v3592_v18 = vld [vmem:[%s5513_s13 + $0xd0] sm:$0xff]  }
 0xa4e   :  { %4405 = vmatprep.subr.mxu0 %v4752_v0  ;;  %v3446_v20 = vunpack.c.l.bf16 %v3592_v18 }
 0xa4f   :  { %v2146_v26 = vsel %vm2144_vm0, %v2143_v23, %v2145_v24  ;;  %4406 = vmatpush3.msra.mxu0 %v3426_v19  ;;  %v3585_v23 = vld [vmem:[#allocation14 + $0xd8] sm:$0xff]   ;;  %v3447_v19 = vunpack.c.h.bf16 %v3592_v18 }
 0xa50   :  { %v2147_v29 = vadd.f32 1.0, %v2146_v26  ;;  %4407 = vmatprep.subr.mxu0 %v4752_v0  ;;  %v3419_v24 = vunpack.c.h.bf16 %v3585_v23  ;;  %v3418_v25 = vunpack.c.l.bf16 %v3585_v23  ;;  %v3584_v26 = vld [vmem:[#allocation14 + $0xd0] sm:$0xff]  }
 0xa51   :  { %4408 = vmatpush3.msra.mxu0 %v3423_v21  ;;  %v3415_v27 = vunpack.c.h.bf16 %v3584_v26  ;;  %v3591_v21 = vld [vmem:[%s5513_s13 + $0xc8] sm:$0xff]  }
 0xa52   :  { %v2148_v32 = vmul.f32 %v2147_v29, %v2123_v28  ;;  %4409 = vmatprep.subr.mxu0 %v4752_v0  ;;  %v3414_v28 = vunpack.c.l.bf16 %v3584_v26  ;;  %v3583_v29 = vld [vmem:[#allocation14 + $0xc8] sm:$0xff]   ;;  %v3442_v23 = vunpack.c.l.bf16 %v3591_v21 }
 0xa53   :  { %4410 = vmatpush3.msra.mxu0 %v3422_v22  ;;  %v3443_v22 = vunpack.c.h.bf16 %v3591_v21 }
 0xa54   :  { %4323 = vmatmul.mubr.f32.vlgmr.msra.gmra.mxu1 %v2148_v32  ;;  %4411 = vmatprep.subr.mxu0 %v4752_v0  ;;  %v3410_v32 = vunpack.c.l.bf16 %v3583_v29 }
 0xa55   :  { %4361 = vmatpush3.msra.mxu1 %v3403_v31  ;;  %4392 = vmatprep.mubr.msk.f32.mxu1 %vm4753_vm5, %v4752_v0  ;;  %v3411_v31 = vunpack.c.h.bf16 %v3583_v29 }
 0xa56   :  { %v4537_v35 = vpop.eup %4536  ;;  %4362 = vmatprep.subr.mxu1 %v4752_v0  ;;  %4412 = vmatpush3.msra.mxu0 %v3419_v24  ;;  %v3590_v24 = vld [vmem:[%s5513_s13 + $0xc0] sm:$0xff]  }
 0xa57   :  { %v2377_v37 = vmul.f32 1.0614054, %v4537_v35  ;;  %4363 = vmatpush3.msra.mxu1 %v3402_v17  ;;  %4413 = vmatprep.subr.mxu0 %v4752_v0  ;;  %v3406_v17 = vunpack.c.l.bf16 %v3405_v33  ;;  %v3438_v26 = vunpack.c.l.bf16 %v3590_v24 }
 0xa58   :  { %4364 = vmatprep.subr.mxu1 %v4752_v0  ;;  %v4539_v60 = vpop.eup %4538  ;;  %4414 = vmatpush3.msra.mxu0 %v3418_v25  ;;  %v3439_v25 = vunpack.c.h.bf16 %v3590_v24 }
 0xa59   :  { %v2378_v40 = vadd.f32 -1.4531521, %v2377_v37  ;;  %4365 = vmatpush3.msra.mxu1 %v3399_v34  ;;  %4415 = vmatprep.subr.mxu0 %v4752_v0 }
 0xa5a   :  { %4366 = vmatprep.subr.mxu1 %v4752_v0  ;;  %4416 = vmatpush3.msra.mxu0 %v3415_v27  ;;  %v2873_v27 = vld [vmem:[%s5512_s12 + $0x3] ss:$0 sm:$0xff] }
 0xa5b   :  { %v2379_v43 = vmul.f32 %v4537_v35, %v2378_v40  ;;  %4367 = vmatpush3.msra.mxu1 %v3398_v39  ;;  %4417 = vmatprep.subr.mxu0 %v4752_v0 }
 0xa5c   :  { %4368 = vmatprep.subr.mxu1 %v4752_v0  ;;  %4418 = vmatpush3.msra.mxu0 %v3414_v28 }
 0xa5d   :  { %v2380_v45 = vadd.f32 1.4214138, %v2379_v43  ;;  %4369 = vmatpush3.msra.mxu1 %v3395_v41  ;;  %4419 = vmatprep.subr.mxu0 %v4752_v0 }
 0xa5e   :  { %4370 = vmatprep.subr.mxu1 %v4752_v0  ;;  %4420 = vmatpush3.msra.mxu0 %v3411_v31 }
 0xa5f   :  { %v2381_v50 = vmul.f32 %v4537_v35, %v2380_v45  ;;  %4371 = vmatpush3.msra.mxu1 %v3394_v44  ;;  %4421 = vmatprep.subr.mxu0 %v4752_v0 }
 0xa60   :  { %4372 = vmatprep.subr.mxu1 %v4752_v0  ;;  %4422 = vmatpush3.msra.mxu0 %v3410_v32 }
 0xa61   :  { %v2382_v49 = vadd.f32 -0.28449672, %v2381_v50  ;;  %4373 = vmatpush3.msra.mxu1 %v3391_v46  ;;  %4423 = vmatprep.subr.mxu0 %v4752_v0 }
 0xa62   :  { %4374 = vmatprep.subr.mxu1 %v4752_v0  ;;  %4424 = vmatpush3.msra.mxu0 %v3407_v30 }
 0xa63   :  { %v2383_v51 = vmul.f32 %v4537_v35, %v2382_v49  ;;  %4375 = vmatpush3.msra.mxu1 %v3390_v52  ;;  %4425 = vmatprep.subr.mxu0 %v4752_v0 }
 0xa64   :  { %4376 = vmatprep.subr.mxu1 %v4752_v0  ;;  %4426 = vmatpush3.msra.mxu0 %v3406_v17 }
 0xa65   :  { %v2384_v55 = vadd.f32 0.2548296, %v2383_v51  ;;  %4377 = vmatpush3.msra.mxu1 %v3387_v53 }
 0xa66   :  { %4378 = vmatprep.subr.mxu1 %v4752_v0 }
 0xa67   :  { %v2385_v58 = vmul.f32 %v4537_v35, %v2384_v55  ;;  %4379 = vmatpush3.msra.mxu1 %v3386_v54 }
 0xa68   :  { %4380 = vmatprep.subr.mxu1 %v4752_v0 }
 0xa69   :  { %v2390_v61 = vmul.f32 %v4539_v60, %v2385_v58  ;;  %4381 = vmatpush3.msra.mxu1 %v3383_v56 }
 0xa6a   :  { %4382 = vmatprep.subr.mxu1 %v4752_v0 }
 0xa6b   :  { %v2391_v1 = vsub.f32 1.0, %v2390_v61  ;;  %4383 = vmatpush3.msra.mxu1 %v3382_v59 }
 0xa6c   :  { %4384 = vmatprep.subr.mxu1 %v4752_v0 }
 0xa6d   :  { %v2393_v3 = vsub.f32 0.0, %v2391_v1  ;;  %4385 = vmatpush3.msra.mxu1 %v3379_v62 }
 0xa6e   :  { %4386 = vmatprep.subr.mxu1 %v4752_v0 }
 0xa6f   :  { %v2394_v7 = vsel %vm2392_vm1, %v2391_v1, %v2393_v3  ;;  %4387 = vmatpush3.msra.mxu1 %v3378_v2  ;;  %v3597_v2 = vld [vmem:[%s5513_s13 + $0xf8] sm:$0xff]  }
 0xa70   :  { %v2395_v9 = vadd.f32 1.0, %v2394_v7  ;;  %4388 = vmatprep.subr.mxu1 %v4752_v0  ;;  %v3467_v3 = vunpack.c.h.bf16 %v3597_v2  ;;  %v3596_v7 = vld [vmem:[%s5513_s13 + $0xf0] sm:$0xff]  }
 0xa71   :  { %4389 = vmatpush3.msra.mxu1 %v3375_v6  ;;  %v3466_v6 = vunpack.c.l.bf16 %v3597_v2 }
 0xa72   :  { %v2396_v5 = vmul.f32 %v2395_v9, %v2371_v4  ;;  %4390 = vmatprep.subr.mxu1 %v4752_v0  ;;  %v3462_v4 = vunpack.c.l.bf16 %v3596_v7  ;;  %v3595_v9 = vld [vmem:[%s5513_s13 + $0xe8] sm:$0xff]  }
 0xa73   :  { %4391 = vmatpush3.msra.mxu1 %v3374_v8  ;;  %v3463_v8 = vunpack.c.h.bf16 %v3596_v7  ;;  %v3458_v11 = vunpack.c.l.bf16 %v3595_v9 }
 0xa74   :  { %4393 = vmatmul.mubr.f32.vlgmr.msra.gmra.mxu1 %v2396_v5  ;;  %4430 = vmatprep.subr.mxu1 %v4752_v0  ;;  %v3459_v5 = vunpack.c.h.bf16 %v3595_v9 }
 0xa75   :  { %4462 = vmatprep.mubr.msk.f32.mxu1 %vm4753_vm5, %v4752_v0  ;;  %4431 = vmatpush3.msra.mxu1 %v3467_v3 }
 0xa76   :  { %4432 = vmatprep.subr.mxu1 %v4752_v0 }
 0xa77   :  { %4433 = vmatpush3.msra.mxu1 %v3466_v6 }
 0xa78   :  { %4434 = vmatprep.subr.mxu1 %v4752_v0 }
 0xa79   :  { %4435 = vmatpush3.msra.mxu1 %v3463_v8 }
 0xa7a   :  { %4436 = vmatprep.subr.mxu1 %v4752_v0 }
 0xa7b   :  { %4437 = vmatpush3.msra.mxu1 %v3462_v4 }
 0xa7c   :  { %4438 = vmatprep.subr.mxu1 %v4752_v0 }
 0xa7d   :  { %4439 = vmatpush3.msra.mxu1 %v3459_v5 }
 0xa7e   :  { %4440 = vmatprep.subr.mxu1 %v4752_v0 }
 0xa7f   :  { %4441 = vmatpush3.msra.mxu1 %v3458_v11 }
 0xa80   :  { %4442 = vmatprep.subr.mxu1 %v4752_v0 }
 0xa81   :  { %4443 = vmatpush3.msra.mxu1 %v3455_v13 }
 0xa82   :  { %4444 = vmatprep.subr.mxu1 %v4752_v0 }
 0xa83   :  { %4445 = vmatpush3.msra.mxu1 %v3454_v10 }
 0xa84   :  { %4446 = vmatprep.subr.mxu1 %v4752_v0 }
 0xa85   :  { %4447 = vmatpush3.msra.mxu1 %v3451_v15 }
 0xa86   :  { %4448 = vmatprep.subr.mxu1 %v4752_v0 }
 0xa87   :  { %4449 = vmatpush3.msra.mxu1 %v3450_v16 }
 0xa88   :  { %4450 = vmatprep.subr.mxu1 %v4752_v0 }
 0xa89   :  { %4451 = vmatpush3.msra.mxu1 %v3447_v19 }
 0xa8a   :  { %4452 = vmatprep.subr.mxu1 %v4752_v0 }
 0xa8b   :  { %4453 = vmatpush3.msra.mxu1 %v3446_v20 }
 0xa8c   :  { %4454 = vmatprep.subr.mxu1 %v4752_v0 }
 0xa8d   :  { %4455 = vmatpush3.msra.mxu1 %v3443_v22 }
 0xa8e   :  { %4456 = vmatprep.subr.mxu1 %v4752_v0 }
 0xa8f   :  { %4457 = vmatpush3.msra.mxu1 %v3442_v23 }
 0xa90   :  { %4458 = vmatprep.subr.mxu1 %v4752_v0 }
 0xa91   :  { %4459 = vmatpush3.msra.mxu1 %v3439_v25 }
 0xa92   :  { %4460 = vmatprep.subr.mxu1 %v4752_v0 }
 0xa93   :  { %4461 = vmatpush3.msra.mxu1 %v3438_v26 }
 0xb14   :  { %v5441_v34 = vpop.f32.mrf.mxu1 }
 0xb16   :  { %v4324_v35 = vpop.f32.mrf.mxu1 }
 0xb34   :  { %v2504_v37 = vpop.f32.mrf.mxu1 }
 0xb35   :  { %v2505_v38 = vadd.f32 %v2871_v36, %v2504_v37 }
 0xb36   :  { %v4394_v39 = vpop.f32.mrf.mxu1 }
 0xb37   :  { %v2509_v40 = vmul.f32 0.70710677, %v2505_v38  ;;  %v2508_v62 = vmul.f32 0.5, %v2505_v38 }
 0xb39   :  { %v2510_v41 = vand.u32 2147483647, %v2509_v40  ;;  %vm2529_vm2 = vcmp.ge.f32.partialorder %v2509_v40, 0.0 }
 0xb3b   :  { %v2511_v42 = vmul.f32 0.3275911, %v2510_v41  ;;  %v2523_v44 = vsub.f32 0.0, %v2510_v41 }
 0xb3d   :  { %v2512_v43 = vadd.f32 1.0, %v2511_v42  ;;  %v2524_v45 = vmul.f32 %v2523_v44, %v2510_v41 }
 0xb3f   :  { %4540 = vrcp.f32 %v2512_v43  ;;  %v2525_v50 = vmul.f32 1.442695, %v2524_v45 }
 0xb41   :  { %4542 = vpow2.f32 %v2525_v50 }
 0xb4c   :  { %v4541_v46 = vpop.eup %4540 }
 0xb4d   :  { %v2514_v47 = vmul.f32 1.0614054, %v4541_v46 }
 0xb4e   :  { %v4543_v57 = vpop.eup %4542 }
 0xb4f   :  { %v2515_v52 = vadd.f32 -1.4531521, %v2514_v47 }
 0xb51   :  { %v2516_v49 = vmul.f32 %v4541_v46, %v2515_v52 }
 0xb53   :  { %v2517_v53 = vadd.f32 1.4214138, %v2516_v49 }
 0xb55   :  { %v2518_v48 = vmul.f32 %v4541_v46, %v2517_v53 }
 0xb57   :  { %v2519_v51 = vadd.f32 -0.28449672, %v2518_v48 }
 0xb59   :  { %v2520_v54 = vmul.f32 %v4541_v46, %v2519_v51 }
 0xb5b   :  { %v2521_v55 = vadd.f32 0.2548296, %v2520_v54 }
 0xb5d   :  { %v2522_v56 = vmul.f32 %v4541_v46, %v2521_v55  ;;  %v2891_v55 = vld [vmem:[%s5514_s14 + $0x3] ss:$0 sm:$0xff] }
 0xb5f   :  { %v2527_v58 = vmul.f32 %v4543_v57, %v2522_v56 }
 0xb61   :  { %v2528_v59 = vsub.f32 1.0, %v2527_v58 }
 0xb63   :  { %v2530_v60 = vsub.f32 0.0, %v2528_v59 }
 0xb65   :  { %v2531_v61 = vsel %vm2529_vm2, %v2528_v59, %v2530_v60  ;;  %v2867_v59 = vld [vmem:[%s5514_s14 + $0x2] ss:$0 sm:$0xff] }
 0xb66   :  { %v2532_v63 = vadd.f32 1.0, %v2531_v61  ;;  %v2257_v60 = vadd.f32 %v2867_v59, %v5441_v34 }
 0xb68   :  { %v2533_v1 = vmul.f32 %v2532_v63, %v2508_v62 }
 0xb6a   :  { %4428 = vmatmul.mubr.f32.vlgmr.msra.gmra.mxu0 %v2533_v1 }
 0xc2a   :  { %v2641_v28 = vpop.f32.mrf.mxu0 }
 0xc2b   :  { %v2642_v29 = vadd.f32 %v2873_v27, %v2641_v28 }
 0xc2c   :  { %v4429_v31 = vpop.f32.mrf.mxu0 }
 0xc2d   :  { %v2646_v32 = vmul.f32 0.70710677, %v2642_v29  ;;  %v2645_v48 = vmul.f32 0.5, %v2642_v29 }
 0xc2f   :  { %v2647_v33 = vand.u32 2147483647, %v2646_v32  ;;  %vm2666_vm3 = vcmp.ge.f32.partialorder %v2646_v32, 0.0 }
 0xc31   :  { %v2648_v30 = vmul.f32 0.3275911, %v2647_v33  ;;  %v2660_v35 = vsub.f32 0.0, %v2647_v33 }
 0xc33   :  { %v2649_v17 = vadd.f32 1.0, %v2648_v30  ;;  %v2661_v36 = vmul.f32 %v2660_v35, %v2647_v33 }
 0xc35   :  { %4544 = vrcp.f32 %v2649_v17  ;;  %v2662_v39 = vmul.f32 1.442695, %v2661_v36 }
 0xc37   :  { %4546 = vpow2.f32 %v2662_v39 }
 0xc42   :  { %v4545_v37 = vpop.eup %4544 }
 0xc43   :  { %v2651_v38 = vmul.f32 1.0614054, %v4545_v37 }
 0xc44   :  { %v4547_v47 = vpop.eup %4546 }
 0xc45   :  { %v2652_v40 = vadd.f32 -1.4531521, %v2651_v38 }
 0xc47   :  { %v2653_v0 = vmul.f32 %v4545_v37, %v2652_v40 }
 0xc49   :  { %v2654_v41 = vadd.f32 1.4214138, %v2653_v0 }
 0xc4b   :  { %v2655_v42 = vmul.f32 %v4545_v37, %v2654_v41 }
 0xc4d   :  { %v2656_v43 = vadd.f32 -0.28449672, %v2655_v42 }
 0xc4f   :  { %v2657_v44 = vmul.f32 %v4545_v37, %v2656_v43 }
 0xc51   :  { %v2658_v45 = vadd.f32 0.2548296, %v2657_v44 }
 0xc53   :  { %v2659_v46 = vmul.f32 %v4545_v37, %v2658_v45 }
 0xc55   :  { %v2664_v50 = vmul.f32 %v4547_v47, %v2659_v46 }
 0xc57   :  { %v2665_v52 = vsub.f32 1.0, %v2664_v50 }
 0xc59   :  { %v2667_v49 = vsub.f32 0.0, %v2665_v52 }
 0xc5b   :  { %v2668_v53 = vsel %vm2666_vm3, %v2665_v52, %v2667_v49 }
 0xc5c   :  { %v2669_v51 = vadd.f32 1.0, %v2668_v53 }
 0xc5e   :  { %v2670_v54 = vmul.f32 %v2669_v51, %v2645_v48 }
 0xc60   :  { %4463 = vmatmul.mubr.f32.vlgmr.msra.gmra.mxu1 %v2670_v54 }
 0xd20   :  { %v2778_v56 = vpop.f32.mrf.mxu1 }
 0xd21   :  { %v2779_v57 = vadd.f32 %v2891_v55, %v2778_v56 }
 0xd22   :  { %v4464_v58 = vpop.f32.mrf.mxu1 }
 0xd23   :  { %2787 = vrot.lane.b32.xlu0 %v2779_v57, %s4745_s1 }
 0xd95   :  { %v2788_v61 = vpop.permute.xlu0 %2787 }
 0xd96   :  { %v2792_v62 = vsel %vm2790_vm15, %v2257_v60, %v2788_v61 }
 0xd97   :  { %2794 = vst [vmem:[#allocation16 + $0x8] sm:$0xff] %v2792_v62 }
 0xd98   :  { %4719 = shalt.err (!%p4716_p2)
}
 0xd99   :  { %2804 = dma.vmem_to_hbm [thread:$0]  %s2802_s27, 256, %s5515_s15, [#allocation4]  }
 0xd9a   :  { %4738 = dma.done.wait [#allocation4], 256  }
 0xd9b   :  { %4739 = vsyncadd [#allocation4], 4294967040 }
 0xd9c   :  { %2808 = vsyncpa [#allocation3], 1 }
 0xd9d   :  { %2809 = vsyncpa [#allocation6], 1 }
 0xd9e   :  { %2810 = vsyncpa [#allocation9], 1 }
 0xd9f   :  { %2811 = vsyncpa [#allocation12], 1 }
 0xda0   :  { %2812 = vsyncpa [#allocation15], 1 }
 0xda1   :  { %2813 = vsyncpa [#allocation4], 1 }

</bundles_post_ra>
